<compile_context>
chip_gen: v5e
topology: v5e:2x2
jax: 0.10.0
libtpu: 0.0.40
codegen_flags: <defaults>
</compile_context>

<pallas_src>
import functools

import jax
import jax.numpy as jnp
from jax.experimental import pallas as pl
from jax.experimental.pallas import tpu as pltpu


# ---------------------------------------------------------------------------
# Fused single-call kernels (adjacency fully resident in VMEM)
# ---------------------------------------------------------------------------
def _fused_reassoc_kernel(adj_ref, x_ref, w1_ref, b1_ref, w2l_ref, bl_ref,
                          out_ref):
    """out = adj @ (relu((adj @ x) @ W1 + b1) @ (W2@Wl)) + b'   (nfeat < nhid)."""
    adj = adj_ref[...]                                              # [N, N] bf16
    # hop 1: O(N^2) contraction at the narrow width nfeat (bf16 in, f32 acc).
    ax = jnp.dot(adj, x_ref[...], preferred_element_type=jnp.float32)
    h = jnp.maximum(
        jnp.dot(ax, w1_ref[...], preferred_element_type=jnp.float32)
        + b1_ref[...], 0.0)                                         # [N, nhid]
    # dropout: eval mode -> identity.
    # Folded gc2-weight + final Linear: VPU multiply + lane reduce.
    z = jnp.sum(h * w2l_ref[...], axis=-1, keepdims=True)           # [N, 1] f32
    # hop 2: adj @ z + b'  (adj stays in VMEM; no second HBM read).
    out_ref[...] = (
        jnp.dot(adj, z.astype(jnp.bfloat16), preferred_element_type=jnp.float32)
        + bl_ref[...])


def _fused_prefolded_kernel(adj_ref, xw_ref, b1_ref, w2l_ref, bl_ref, out_ref):
    """out = adj @ (relu(adj @ (x@W1) + b1) @ (W2@Wl)) + b'   (nfeat >= nhid)."""
    adj = adj_ref[...]                                              # [N, N] bf16
    h = jnp.maximum(
        jnp.dot(adj, xw_ref[...], preferred_element_type=jnp.float32)
        + b1_ref[...], 0.0)
    z = jnp.sum(h * w2l_ref[...], axis=-1, keepdims=True)
    out_ref[...] = (
        jnp.dot(adj, z.astype(jnp.bfloat16), preferred_element_type=jnp.float32)
        + bl_ref[...])


# ---------------------------------------------------------------------------
# Streaming kernels (two passes over adj, BlockSpec-pipelined row strips)
# ---------------------------------------------------------------------------
def _hop1_reassoc_kernel(adj_ref, x_ref, w1_ref, b1_ref, w2l_ref, z_ref):
    """z_rows = relu((adj_rows @ x) @ W1 + b1) @ (W2 @ Wl).  (nfeat < nhid)"""
    ax = jnp.dot(adj_ref[...], x_ref[...], preferred_element_type=jnp.float32)
    h = jnp.maximum(
        jnp.dot(ax, w1_ref[...], preferred_element_type=jnp.float32)
        + b1_ref[...], 0.0)
    # dropout: eval mode -> identity.
    z_ref[...] = jnp.sum(h * w2l_ref[...], axis=-1, keepdims=True)


def _hop1_prefolded_kernel(adj_ref, xw_ref, b1_ref, w2l_ref, z_ref):
    """z_rows = relu(adj_rows @ (x @ W1) + b1) @ (W2 @ Wl).  (nfeat >= nhid)"""
    h = jnp.maximum(
        jnp.dot(adj_ref[...], xw_ref[...], preferred_element_type=jnp.float32)
        + b1_ref[...], 0.0)
    z_ref[...] = jnp.sum(h * w2l_ref[...], axis=-1, keepdims=True)


def _hop2_kernel(adj_ref, zrow_ref, b_ref, out_ref):
    """out_rows = adj_rows @ z + b'  as a VPU broadcast-mul + row-sum."""
    adj = adj_ref[...].astype(jnp.float32)                          # [TM, N]
    out = jnp.sum(adj * zrow_ref[...], axis=-1, keepdims=True) + b_ref[...]
    out_ref[...] = out.astype(out_ref.dtype)


# ---------------------------------------------------------------------------
# Wrapper
# ---------------------------------------------------------------------------
# bf16 adj footprint under which the single fused call is used (well inside the
# smallest, v5e 16 MiB, scoped-VMEM default even with pipeline buffering).
_FUSED_ADJ_BYTES_LIMIT = 4 * 1024 * 1024


def _pick_row_tile(n):
    """Largest MXU-friendly row tile that divides N, gives >=2 tiles (pipeline
    + megacore), and keeps the double-buffered bf16 adj strip well under the
    v5e 16 MiB scoped-VMEM default."""
    for tm in (512, 256, 128):
        if n % tm == 0 and n // tm >= 2 and 2 * tm * n * 2 <= 6 * 1024 * 1024:
            return tm
    return n  # tiny graphs: single full-array block


def gcn_forward(x, adj, params, *, force_streaming=False):
    """Fused GCN forward. x: [N, nfeat] f32, adj: [N, N] f32 -> [N, 1] f32."""
    w1, b1, w2, b2, wl, bl = params
    N, nfeat = x.shape
    nhid = w1.shape[1]

    # ---- trace-time algebraic folds ---------------------------------------
    # Linear(gc2(h)) = adj @ (h @ (W2 @ Wl)) + (b2 @ Wl + bl)
    w2l = (w2 @ wl).reshape(1, nhid).astype(jnp.float32)     # [1, nhid]
    blp = (b2 @ wl + bl).reshape(1, 1).astype(jnp.float32)   # [1, 1]
    b1r = b1.reshape(1, nhid).astype(jnp.float32)            # [1, nhid]

    # ---- dtype: stream the O(N^2) adjacency (and features) as bf16 --------
    adj_bf = adj.astype(jnp.bfloat16)
    reassoc = nfeat <= nhid
    # reassoc: raw features; otherwise precompute x @ W1 once in XLA.
    feats = (x if reassoc else (x @ w1)).astype(jnp.bfloat16)

    # ---- small-graph fast path: one pallas_call, adj resident in VMEM ------
    if (not force_streaming) and N * N * 2 <= _FUSED_ADJ_BYTES_LIMIT:
        if reassoc:
            kernel = _fused_reassoc_kernel
            args = (adj_bf, feats, w1.astype(jnp.float32), b1r, w2l, blp)
        else:
            kernel = _fused_prefolded_kernel
            args = (adj_bf, feats, b1r, w2l, blp)
        return pl.pallas_call(
            kernel,
            out_shape=jax.ShapeDtypeStruct((N, 1), jnp.float32),
        )(*args)

    # ---- streaming path: two pipelined passes over adj row strips ----------
    TM = _pick_row_tile(N)
    assert N % TM == 0, "streaming path expects N to be a multiple of the tile"
    grid = (N // TM,)
    cparams = pltpu.CompilerParams(dimension_semantics=("parallel",))
    adj_spec = pl.BlockSpec((TM, N), lambda i: (i, 0))
    col_spec = pl.BlockSpec((TM, 1), lambda i: (i, 0))

    if reassoc:
        kernel = _hop1_reassoc_kernel
        extra_in = [w1.astype(jnp.float32)]
        extra_specs = [pl.BlockSpec((nfeat, nhid), lambda i: (0, 0))]
        feat_spec = pl.BlockSpec((N, nfeat), lambda i: (0, 0))
    else:
        kernel = _hop1_prefolded_kernel
        extra_in = []
        extra_specs = []
        feat_spec = pl.BlockSpec((N, nhid), lambda i: (0, 0))

    z = pl.pallas_call(
        kernel,
        out_shape=jax.ShapeDtypeStruct((N, 1), jnp.float32),
        grid=grid,
        in_specs=[adj_spec, feat_spec] + extra_specs + [
            pl.BlockSpec((1, nhid), lambda i: (0, 0)),        # b1
            pl.BlockSpec((1, nhid), lambda i: (0, 0)),        # W2 @ Wl (row)
        ],
        out_specs=col_spec,
        compiler_params=cparams,
    )(adj_bf, feats, *extra_in, b1r, w2l)

    # hop 2: out = adj @ z + b'
    z_row = z.reshape(1, N)   # tiny relayout: [N,1] -> [1,N]
    out = pl.pallas_call(
        _hop2_kernel,
        out_shape=jax.ShapeDtypeStruct((N, 1), jnp.float32),
        grid=grid,
        in_specs=[adj_spec,
                  pl.BlockSpec((1, N), lambda i: (0, 0)),     # z as a row
                  pl.BlockSpec((1, 1), lambda i: (0, 0))],    # folded bias
        out_specs=col_spec,
        compiler_params=cparams,
    )(adj_bf, z_row, blp)
    return out


# ---------------------------------------------------------------------------
# Reference & init
# ---------------------------------------------------------------------------
def gcn_reference(x, adj, params):
    """Pure-JAX reference for correctness checking (f32 math)."""
    w1, b1, w2, b2, wl, bl = params
    h = jnp.maximum(adj @ (x @ w1) + b1, 0.0)
    h = adj @ (h @ w2) + b2
    return h @ wl + bl


def init_params(key, nfeat, nhid, nclass):
    """Deterministic init matching pygcn (uniform +-1/sqrt(fan)) shapes."""
    k1, k2, k3, k4, k5, k6 = jax.random.split(key, 6)
    s1 = 1.0 / jnp.sqrt(nhid)
    s2 = 1.0 / jnp.sqrt(nclass)
    sl = 1.0 / jnp.sqrt(nclass)
    w1 = jax.random.uniform(k1, (nfeat, nhid), jnp.float32, -s1, s1)
    b1 = jax.random.uniform(k2, (nhid,), jnp.float32, -s1, s1)
    w2 = jax.random.uniform(k3, (nhid, nclass), jnp.float32, -s2, s2)
    b2 = jax.random.uniform(k4, (nclass,), jnp.float32, -s2, s2)
    # nn.Linear(nclass, 1): weight [1, nclass] -> stored transposed [nclass, 1]
    wl = jax.random.uniform(k5, (nclass, 1), jnp.float32, -sl, sl)
    bl = jax.random.uniform(k6, (1,), jnp.float32, -sl, sl)
    return (w1, b1, w2, b2, wl, bl)


if __name__ == "__main__":
    # Small synthetic graph: 512 nodes, 16 feats, 32 hidden, 8 classes.
    N, nfeat, nhid, nclass = 512, 16, 32, 8

    key = jax.random.PRNGKey(0)
    kx, kadj, kp = jax.random.split(key, 3)

    x = jax.random.normal(kx, (N, nfeat), jnp.float32)

    # Symmetric row-normalized adjacency with self-loops (typical GCN input).
    a = (jax.random.uniform(kadj, (N, N)) > 0.9).astype(jnp.float32)
    a = jnp.maximum(a, a.T) + jnp.eye(N, dtype=jnp.float32)
    adj = a / jnp.sum(a, axis=1, keepdims=True)

    params = init_params(kp, nfeat, nhid, nclass)

    # References: one fed the same bf16-quantized adj/x (isolates ordering /
    # accumulation differences) and one full-f32 (includes input quantization).
    adj_q = adj.astype(jnp.bfloat16).astype(jnp.float32)
    x_q = x.astype(jnp.bfloat16).astype(jnp.float32)
    ref_q = gcn_reference(x_q, adj_q, params)
    ref_f = gcn_reference(x, adj, params)

    # --- fused single-call path (default for this size) ---------------------
    out = jax.block_until_ready(jax.jit(gcn_forward)(x, adj, params))
    assert out.shape == (N, 1)
    assert jnp.allclose(out, ref_q, atol=5e-3, rtol=5e-3), \
        "fused: mismatch vs bf16-matched ref"
    assert jnp.allclose(out, ref_f, atol=2e-2, rtol=2e-2), \
        "fused: mismatch vs f32 ref"

    # --- streaming two-pass path (exercised explicitly for coverage) --------
    streaming_fwd = jax.jit(functools.partial(gcn_forward, force_streaming=True))
    out_s = jax.block_until_ready(streaming_fwd(x, adj, params))
    assert out_s.shape == (N, 1)
    assert jnp.allclose(out_s, ref_q, atol=5e-3, rtol=5e-3), \
        "streaming: mismatch vs bf16-matched ref"
    assert jnp.allclose(out_s, ref_f, atol=2e-2, rtol=2e-2), \
        "streaming: mismatch vs f32 ref"

    print("KERNEL_OK")
</pallas_src>

<mosaic_0001>
module attributes {stable_mosaic.version = 11 : i64} {
  func.func @_fused_reassoc_kernel(%arg0: memref<512x512xbf16, #tpu.memory_space<vmem>>, %arg1: memref<512x16xbf16, #tpu.memory_space<vmem>>, %arg2: memref<16x32xf32, #tpu.memory_space<vmem>>, %arg3: memref<1x32xf32, #tpu.memory_space<vmem>>, %arg4: memref<1x32xf32, #tpu.memory_space<vmem>>, %arg5: memref<1x1xf32, #tpu.memory_space<vmem>>, %arg6: memref<512x1xf32, #tpu.memory_space<vmem>>) attributes {dimension_semantics = [], scalar_prefetch = 0 : i64, scratch_operands = 0 : i64, tpu.core_type = #tpu.core_type<tc>} {
    %c0 = arith.constant 0 : index
    %c0_0 = arith.constant 0 : index
    %0 = vector.load %arg0[%c0, %c0_0] : memref<512x512xbf16, #tpu.memory_space<vmem>>, vector<512x512xbf16>
    %c0_1 = arith.constant 0 : index
    %c0_2 = arith.constant 0 : index
    %1 = vector.load %arg1[%c0_1, %c0_2] : memref<512x16xbf16, #tpu.memory_space<vmem>>, vector<512x16xbf16>
    %cst = arith.constant dense<0.000000e+00> : vector<512x16xf32>
    %2 = tpu.matmul %0, %1, %cst {dimension_numbers = #tpu.dot_dimension_numbers<[1], [0], [0], [1], [0, 0, 1, 1], [], []>} : vector<512x512xbf16>, vector<512x16xbf16>, vector<512x16xf32> -> vector<512x16xf32>
    %c0_3 = arith.constant 0 : index
    %c0_4 = arith.constant 0 : index
    %3 = vector.load %arg2[%c0_3, %c0_4] : memref<16x32xf32, #tpu.memory_space<vmem>>, vector<16x32xf32>
    %cst_5 = arith.constant dense<0.000000e+00> : vector<512x32xf32>
    %4 = tpu.matmul %2, %3, %cst_5 {dimension_numbers = #tpu.dot_dimension_numbers<[1], [0], [0], [1], [0, 0, 1, 1], [], []>} : vector<512x16xf32>, vector<16x32xf32>, vector<512x32xf32> -> vector<512x32xf32>
    %c0_6 = arith.constant 0 : index
    %c0_7 = arith.constant 0 : index
    %5 = vector.load %arg3[%c0_6, %c0_7] : memref<1x32xf32, #tpu.memory_space<vmem>>, vector<1x32xf32>
    %6 = vector.broadcast %5 : vector<1x32xf32> to vector<512x32xf32>
    %7 = arith.addf %4, %6 : vector<512x32xf32>
    %cst_8 = arith.constant 0.000000e+00 : f32
    %8 = vector.broadcast %cst_8 : f32 to vector<512x32xf32>
    %9 = arith.maximumf %7, %8 : vector<512x32xf32>
    %c0_9 = arith.constant 0 : index
    %c0_10 = arith.constant 0 : index
    %10 = vector.load %arg4[%c0_9, %c0_10] : memref<1x32xf32, #tpu.memory_space<vmem>>, vector<1x32xf32>
    %11 = vector.broadcast %10 : vector<1x32xf32> to vector<512x32xf32>
    %12 = arith.mulf %9, %11 : vector<512x32xf32>
    %cst_11 = arith.constant dense<0.000000e+00> : vector<512xf32>
    %13 = vector.multi_reduction <add>, %12, %cst_11 [1] : vector<512x32xf32> to vector<512xf32>
    %14 = vector.shape_cast %13 : vector<512xf32> to vector<512x1xf32>
    %15 = arith.truncf %14 : vector<512x1xf32> to vector<512x1xbf16>
    %cst_12 = arith.constant dense<0.000000e+00> : vector<512x1xf32>
    %16 = tpu.matmul %0, %15, %cst_12 {dimension_numbers = #tpu.dot_dimension_numbers<[1], [0], [0], [1], [0, 0, 1, 1], [], []>} : vector<512x512xbf16>, vector<512x1xbf16>, vector<512x1xf32> -> vector<512x1xf32>
    %c0_13 = arith.constant 0 : index
    %c0_14 = arith.constant 0 : index
    %17 = vector.load %arg5[%c0_13, %c0_14] : memref<1x1xf32, #tpu.memory_space<vmem>>, vector<1x1xf32>
    %18 = vector.broadcast %17 : vector<1x1xf32> to vector<512x1xf32>
    %19 = arith.addf %16, %18 : vector<512x1xf32>
    %c0_15 = arith.constant 0 : index
    %c0_16 = arith.constant 0 : index
    %20 = vector.load %arg6[%c0_15, %c0_16] : memref<512x1xf32, #tpu.memory_space<vmem>>, vector<512x1xf32>
    tpu.vector_store %arg6[%c0_15, %c0_16], %19 {strides = array<i32>} : memref<512x1xf32, #tpu.memory_space<vmem>>, vector<512x1xf32>,
    return
  }
}

</mosaic_0001>

<bundles_post_ra>
// kernel: gcn_forward.1
= control target key start
LH: loop header
LB: loop body
LE: loop exit
PB: predicated region body
PF: predicated region fallthrough
CT: control target
= control target key end

     0   :  { %vm1731_vm0 = vcmask 130048   ;;  %vm2265_vm1 = vcmask 261120   ;;  %vm3170_vm2 = vcmask 7168   ;;  %s6387_s1 = inlined_call_operand.vmem [shape: bf16[512,16], index: 1, kind: input, shape index: {}]   ;;  %s6388_s0 = inlined_call_operand.vmem [shape: bf16[512,512], index: 0, kind: input, shape index: {}]   ;;  %s6389_s2 = inlined_call_operand.vmem [shape: f32[16,32], index: 2, kind: input, shape index: {}]   ;;  %s6390_s3 = inlined_call_operand.vmem [shape: f32[1,32], index: 3, kind: input, shape index: {}]   ;;  %s6391_s4 = inlined_call_operand.vmem [shape: f32[1,32], index: 4, kind: input, shape index: {}]   ;;  %s6392_s5 = inlined_call_operand.<no memory space> [shape: f32[1,1], index: 5, kind: input, shape index: {}]   ;;  %s6393_s6 = inlined_call_operand.vmem [shape: f32[512,1], index: 6, kind: output, shape index: {}]  }
   0x1   :  { %v4078_v0 = vld [vmem:[%s6387_s1 + $0x38] sm:$0xff]  ;;  %v4077_v1 = vld [vmem:[%s6387_s1 + $0x30] sm:$0xff]  ;;  %v4076_v2 = vld [vmem:[%s6387_s1 + $0x28] sm:$0xff] }
   0x2   :  { %4103 = vmatpush.bf16.msra.mxu1 %v4078_v0  ;;  %4104 = vmatpush.bf16.msra.mxu2 %v4078_v0  ;;  %v4075_v3 = vld [vmem:[%s6387_s1 + $0x20] sm:$0xff]  ;;  %v4074_v4 = vld [vmem:[%s6387_s1 + $0x18] sm:$0xff]  ;;  %v4073_v5 = vld [vmem:[%s6387_s1 + $0x10] sm:$0xff] }
   0x3   :  { %4105 = vmatpush.bf16.msra.mxu3 %v4078_v0  ;;  %1049 = vmatpush.bf16.msra.mxu0 %v4078_v0  ;;  %v4072_v6 = vld [vmem:[%s6387_s1 + $0x8] sm:$0xff]  ;;  %v4071_v7 = vld [vmem:[%s6387_s1] sm:$0xff]  ;;  %v3977_v9 = vld [vmem:[%s6388_s0 + $0x10c] sm:$0xf0] }
   0x4   :  { %v3369_v8 = vld [vmem:[%s6388_s0 + $0x100] sm:$0xf]  ;;  %v4009_v11 = vld [vmem:[%s6388_s0 + $0x20c] sm:$0xf0]  ;;  %v4086_v53 = vld [vmem:[%s6387_s1 + $0x78] sm:$0xff] }
   0x5   :  { %v3497_v10 = vld [vmem:[%s6388_s0 + $0x200] sm:$0xf]  ;;  %v4041_v13 = vld [vmem:[%s6388_s0 + $0x30c] sm:$0xf0]  ;;  %v4210_v14 = vor.u32 %v3977_v9, %v3369_v8  ;;  %v4094_v54 = vld [vmem:[%s6387_s1 + $0xb8] sm:$0xff] }
   0x6   :  { %4106 = vmatpush.bf16.msra.mxu1 %v4077_v1  ;;  %4107 = vmatpush.bf16.msra.mxu2 %v4077_v1  ;;  %v3625_v12 = vld [vmem:[%s6388_s0 + $0x300] sm:$0xf]  ;;  %v4212_v15 = vor.u32 %v4009_v11, %v3497_v10  ;;  %v3981_v18 = vld [vmem:[%s6388_s0 + $0x12c] sm:$0xf0]  ;;  %v4102_v55 = vld [vmem:[%s6387_s1 + $0xf8] sm:$0xff] }
   0x7   :  { %4108 = vmatpush.bf16.msra.mxu3 %v4077_v1  ;;  %1050 = vmatpush.bf16.msra.mxu0 %v4077_v1  ;;  %6504 = vst [vmem:[#allocation3_spill] sm:$0xff] %v4210_v14  ;;  %v4214_v16 = vor.u32 %v4041_v13, %v3625_v12  ;;  %v3385_v17 = vld [vmem:[%s6388_s0 + $0x120] sm:$0xf]  ;;  %v4013_v20 = vld [vmem:[%s6388_s0 + $0x22c] sm:$0xf0]  ;;  %v4084_v59 = vld [vmem:[%s6387_s1 + $0x68] sm:$0xff] }
   0x8   :  { %6505 = vst [vmem:[#allocation4_spill] sm:$0xff] %v4212_v15  ;;  %v3513_v19 = vld [vmem:[%s6388_s0 + $0x220] sm:$0xf]  ;;  %v4045_v22 = vld [vmem:[%s6388_s0 + $0x32c] sm:$0xf0]  ;;  %v4237_v23 = vor.u32 %v3981_v18, %v3385_v17  ;;  %v4092_v60 = vld [vmem:[%s6387_s1 + $0xa8] sm:$0xff] }
   0x9   :  { %6506 = vst [vmem:[#allocation5_spill] sm:$0xff] %v4214_v16  ;;  %v3641_v21 = vld [vmem:[%s6388_s0 + $0x320] sm:$0xf]  ;;  %v4239_v24 = vor.u32 %v4013_v20, %v3513_v19  ;;  %v3985_v27 = vld [vmem:[%s6388_s0 + $0x14c] sm:$0xf0]  ;;  %v4100_v61 = vld [vmem:[%s6387_s1 + $0xe8] sm:$0xff] }
   0xa   :  { %4109 = vmatpush.bf16.msra.mxu1 %v4076_v2  ;;  %4110 = vmatpush.bf16.msra.mxu2 %v4076_v2  ;;  %6507 = vst [vmem:[#allocation6_spill] sm:$0xff] %v4237_v23  ;;  %v4241_v25 = vor.u32 %v4045_v22, %v3641_v21  ;;  %v3401_v26 = vld [vmem:[%s6388_s0 + $0x140] sm:$0xf]  ;;  %v4017_v29 = vld [vmem:[%s6388_s0 + $0x24c] sm:$0xf0]  ;;  %v4082_v10 = vld [vmem:[%s6387_s1 + $0x58] sm:$0xff] }
   0xb   :  { %4111 = vmatpush.bf16.msra.mxu3 %v4076_v2  ;;  %1051 = vmatpush.bf16.msra.mxu0 %v4076_v2  ;;  %6508 = vst [vmem:[#allocation7_spill] sm:$0xff] %v4239_v24  ;;  %v3529_v28 = vld [vmem:[%s6388_s0 + $0x240] sm:$0xf]  ;;  %v4049_v31 = vld [vmem:[%s6388_s0 + $0x34c] sm:$0xf0]  ;;  %v4264_v32 = vor.u32 %v3985_v27, %v3401_v26  ;;  %v4090_v11 = vld [vmem:[%s6387_s1 + $0x98] sm:$0xff] }
   0xc   :  { %6509 = vst [vmem:[#allocation8_spill] sm:$0xff] %v4241_v25  ;;  %v3657_v30 = vld [vmem:[%s6388_s0 + $0x340] sm:$0xf]  ;;  %v4266_v33 = vor.u32 %v4017_v29, %v3529_v28  ;;  %v3989_v36 = vld [vmem:[%s6388_s0 + $0x16c] sm:$0xf0]  ;;  %v4098_v12 = vld [vmem:[%s6387_s1 + $0xd8] sm:$0xff] }
   0xd   :  { %6510 = vst [vmem:[#allocation9_spill] sm:$0xff] %v4264_v32  ;;  %v4268_v34 = vor.u32 %v4049_v31, %v3657_v30  ;;  %v3417_v35 = vld [vmem:[%s6388_s0 + $0x160] sm:$0xf]  ;;  %v4021_v38 = vld [vmem:[%s6388_s0 + $0x26c] sm:$0xf0]  ;;  %v4080_v22 = vld [vmem:[%s6387_s1 + $0x48] sm:$0xff] }
   0xe   :  { %4112 = vmatpush.bf16.msra.mxu1 %v4075_v3  ;;  %4113 = vmatpush.bf16.msra.mxu2 %v4075_v3  ;;  %6511 = vst [vmem:[#allocation10_spill] sm:$0xff] %v4266_v33  ;;  %v3545_v37 = vld [vmem:[%s6388_s0 + $0x260] sm:$0xf]  ;;  %v4053_v40 = vld [vmem:[%s6388_s0 + $0x36c] sm:$0xf0]  ;;  %v4291_v41 = vor.u32 %v3989_v36, %v3417_v35  ;;  %v4088_v26 = vld [vmem:[%s6387_s1 + $0x88] sm:$0xff] }
   0xf   :  { %4114 = vmatpush.bf16.msra.mxu3 %v4075_v3  ;;  %1052 = vmatpush.bf16.msra.mxu0 %v4075_v3  ;;  %6512 = vst [vmem:[#allocation11_spill] sm:$0xff] %v4268_v34  ;;  %v3673_v39 = vld [vmem:[%s6388_s0 + $0x360] sm:$0xf]  ;;  %v4293_v42 = vor.u32 %v4021_v38, %v3545_v37  ;;  %v3993_v45 = vld [vmem:[%s6388_s0 + $0x18c] sm:$0xf0]  ;;  %v4096_v27 = vld [vmem:[%s6387_s1 + $0xc8] sm:$0xff] }
  0x10   :  { %6513 = vst [vmem:[#allocation12_spill] sm:$0xff] %v4291_v41  ;;  %v4295_v43 = vor.u32 %v4053_v40, %v3673_v39  ;;  %v3433_v44 = vld [vmem:[%s6388_s0 + $0x180] sm:$0xf]  ;;  %v4025_v47 = vld [vmem:[%s6388_s0 + $0x28c] sm:$0xf0] }
  0x11   :  { %6514 = vst [vmem:[#allocation13_spill] sm:$0xff] %v4293_v42  ;;  %v3561_v46 = vld [vmem:[%s6388_s0 + $0x280] sm:$0xf]  ;;  %v4057_v49 = vld [vmem:[%s6388_s0 + $0x38c] sm:$0xf0]  ;;  %v4318_v50 = vor.u32 %v3993_v45, %v3433_v44 }
  0x12   :  { %4115 = vmatpush.bf16.msra.mxu1 %v4074_v4  ;;  %4116 = vmatpush.bf16.msra.mxu2 %v4074_v4  ;;  %6515 = vst [vmem:[#allocation14_spill] sm:$0xff] %v4295_v43  ;;  %v3689_v48 = vld [vmem:[%s6388_s0 + $0x380] sm:$0xf]  ;;  %v4320_v51 = vor.u32 %v4025_v47, %v3561_v46  ;;  %v4085_v56 = vld [vmem:[%s6387_s1 + $0x70] sm:$0xff] }
  0x13   :  { %4117 = vmatpush.bf16.msra.mxu3 %v4074_v4  ;;  %1053 = vmatpush.bf16.msra.mxu0 %v4074_v4  ;;  %6516 = vst [vmem:[#allocation15_spill] sm:$0xff] %v4318_v50  ;;  %v4322_v52 = vor.u32 %v4057_v49, %v3689_v48  ;;  %v4093_v57 = vld [vmem:[%s6387_s1 + $0xb0] sm:$0xff]  ;;  %v3449_v62 = vld [vmem:[%s6388_s0 + $0x1a0] sm:$0xf] }
  0x14   :  { %6517 = vst [vmem:[#allocation16_spill] sm:$0xff] %v4320_v51  ;;  %v4101_v58 = vld [vmem:[%s6387_s1 + $0xf0] sm:$0xff]  ;;  %v3577_v0 = vld [vmem:[%s6388_s0 + $0x2a0] sm:$0xf] }
  0x15   :  { %6518 = vst [vmem:[#allocation17_spill] sm:$0xff] %v4322_v52  ;;  %v3997_v63 = vld [vmem:[%s6388_s0 + $0x1ac] sm:$0xf0]  ;;  %v3705_v2 = vld [vmem:[%s6388_s0 + $0x3a0] sm:$0xf] }
  0x16   :  { %4118 = vmatpush.bf16.msra.mxu1 %v4073_v5  ;;  %4119 = vmatpush.bf16.msra.mxu2 %v4073_v5  ;;  %v4029_v1 = vld [vmem:[%s6388_s0 + $0x2ac] sm:$0xf0]  ;;  %v4083_v4 = vld [vmem:[%s6387_s1 + $0x60] sm:$0xff] }
  0x17   :  { %4120 = vmatpush.bf16.msra.mxu3 %v4073_v5  ;;  %1054 = vmatpush.bf16.msra.mxu0 %v4073_v5  ;;  %v4061_v3 = vld [vmem:[%s6388_s0 + $0x3ac] sm:$0xf0]  ;;  %v4091_v5 = vld [vmem:[%s6387_s1 + $0xa0] sm:$0xff]  ;;  %v4383_v8 = vor.u32 %v4029_v1, %v3577_v0  ;;  %v3946_v0 = vld [vmem:[%s6388_s0 + $0x14] sm:$0xf0] }
  0x18   :  { %v4385_v9 = vor.u32 %v4061_v3, %v3705_v2  ;;  %v4081_v13 = vld [vmem:[%s6387_s1 + $0x50] sm:$0xff]  ;;  %v3241_v19 = vld [vmem:[%s6388_s0] sm:$0xf]  ;;  %v3944_v1 = vld [vmem:[%s6388_s0 + $0xc] sm:$0xf] }
  0x19   :  { %6520 = vst [vmem:[#allocation19_spill] sm:$0xff] %v4383_v8  ;;  %v4089_v17 = vld [vmem:[%s6387_s1 + $0x90] sm:$0xff]  ;;  %v3465_v28 = vld [vmem:[%s6388_s0 + $0x1c0] sm:$0xf]  ;;  %v3251_v2 = vld [vmem:[%s6388_s0 + $0x18] sm:$0xf0] }
  0x1a   :  { %4121 = vmatpush.bf16.msra.mxu1 %v4072_v6  ;;  %4122 = vmatpush.bf16.msra.mxu2 %v4072_v6  ;;  %6521 = vst [vmem:[#allocation20_spill] sm:$0xff] %v4385_v9  ;;  %v4097_v18 = vld [vmem:[%s6387_s1 + $0xd0] sm:$0xff]  ;;  %v3593_v30 = vld [vmem:[%s6388_s0 + $0x2c0] sm:$0xf] }
  0x1b   :  { %4123 = vmatpush.bf16.msra.mxu3 %v4072_v6  ;;  %1055 = vmatpush.bf16.msra.mxu0 %v4072_v6  ;;  %v4099_v6 = vld [vmem:[%s6387_s1 + $0xe0] sm:$0xff]  ;;  %v3945_v20 = vld [vmem:[%s6388_s0 + $0xc] sm:$0xf0] }
  0x1c   :  { %v4414_v21 = vor.u32 %v3945_v20, %v3241_v19  ;;  %v4001_v29 = vld [vmem:[%s6388_s0 + $0x1cc] sm:$0xf0]  ;;  %v3721_v35 = vld [vmem:[%s6388_s0 + $0x3c0] sm:$0xf]  ;;  %v3947_v19 = vld [vmem:[%s6388_s0 + $0x24] sm:$0xf] }
  0x1d   :  { %v4033_v31 = vld [vmem:[%s6388_s0 + $0x2cc] sm:$0xf0]  ;;  %v4444_v37 = vor.u32 %v4001_v29, %v3465_v28  ;;  %v4079_v39 = vld [vmem:[%s6387_s1 + $0x40] sm:$0xff]  ;;  %v3259_v20 = vld [vmem:[%s6388_s0 + $0x30] sm:$0xf0] }
  0x1e   :  { %4124 = vmatpush.bf16.msra.mxu1 %v4071_v7  ;;  %4125 = vmatpush.bf16.msra.mxu2 %v4071_v7  ;;  %6522 = vst [vmem:[#allocation21_spill] sm:$0xff] %v4414_v21  ;;  %v4065_v36 = vld [vmem:[%s6388_s0 + $0x3cc] sm:$0xf0]  ;;  %v4446_v38 = vor.u32 %v4033_v31, %v3593_v30  ;;  %v4087_v40 = vld [vmem:[%s6387_s1 + $0x80] sm:$0xff]  ;;  %v3267_v28 = vld [vmem:[%s6388_s0 + $0x38] sm:$0xf0] }
  0x1f   :  { %4126 = vmatpush.bf16.msra.mxu3 %v4071_v7  ;;  %1056 = vmatpush.bf16.msra.mxu0 %v4071_v7  ;;  %v4381_v7 = vor.u32 %v3997_v63, %v3449_v62  ;;  %6523 = vst [vmem:[#allocation22_spill] sm:$0xff] %v4444_v37  ;;  %v4095_v44 = vld [vmem:[%s6387_s1 + $0xc0] sm:$0xff]  ;;  %v4457_v45 = vor.u32 %v4065_v36, %v3721_v35  ;;  %v4005_v47 = vld [vmem:[%s6388_s0 + $0x1ec] sm:$0xf0]  ;;  %v3243_v62 = vld [vmem:[%s6388_s0 + $0x10] sm:$0xf0] }
  0x20   :  { %6524 = vst [vmem:[#allocation23_spill] sm:$0xff] %v4446_v38  ;;  %v3481_v46 = vld [vmem:[%s6388_s0 + $0x1e0] sm:$0xf]  ;;  %v4037_v49 = vld [vmem:[%s6388_s0 + $0x2ec] sm:$0xf0] }
  0x21   :  { %1097 = vmatmul.bf16.vlgmr.msra.gmra.mxu1 %v4210_v14  ;;  %1137 = vmatmul.bf16.vlgmr.msra.gmra.mxu2 %v4212_v15  ;;  %6519 = vst [vmem:[#allocation18_spill] sm:$0xff] %v4381_v7  ;;  %v3609_v48 = vld [vmem:[%s6388_s0 + $0x2e0] sm:$0xf]  ;;  %v3249_v63 = vld [vmem:[%s6388_s0 + $0x8] sm:$0xf] }
  0x22   :  { %1177 = vmatmul.bf16.vlgmr.msra.gmra.mxu3 %v4214_v16  ;;  %1218 = vmatpush.bf16.msrb.mxu1 %v4086_v53  ;;  %6525 = vst [vmem:[#allocation24_spill] sm:$0xff] %v4457_v45  ;;  %v3737_v53 = vld [vmem:[%s6388_s0 + $0x3e0] sm:$0xf]  ;;  %v3957_v30 = vld [vmem:[%s6388_s0 + $0x6c] sm:$0xf0] }
  0x23   :  { %1387 = vmatpush.bf16.msrb.mxu2 %v4094_v54  ;;  %1556 = vmatpush.bf16.msrb.mxu3 %v4102_v55  ;;  %v4069_v54 = vld [vmem:[%s6388_s0 + $0x3ec] sm:$0xf0]  ;;  %v3257_v55 = vld [vmem:[%s6388_s0 + $0x20] sm:$0xf]  ;;  %v3331_v15 = vld [vmem:[%s6388_s0 + $0xb8] sm:$0xf0] }
  0x24   :  { %1057 = vmatmul.bf16.vlgmr.msra.gmra.mxu0 %v4414_v21  ;;  %v3273_v3 = vld [vmem:[%s6388_s0 + $0x40] sm:$0xf]  ;;  %v3969_v16 = vld [vmem:[%s6388_s0 + $0xcc] sm:$0xf0] }
  0x25   :  { %v3289_v29 = vld [vmem:[%s6388_s0 + $0x60] sm:$0xf] }
  0x26   :  { %1219 = vmatpush.bf16.msrb.mxu1 %v4085_v56  ;;  %v3949_v56 = vld [vmem:[%s6388_s0 + $0x2c] sm:$0xf0]  ;;  %v4568_v35 = vor.u32 %v3957_v30, %v3289_v29  ;;  %v3955_v29 = vld [vmem:[%s6388_s0 + $0x64] sm:$0xf]  ;;  %v3291_v30 = vld [vmem:[%s6388_s0 + $0x70] sm:$0xf0] }
  0x27   :  { %1388 = vmatpush.bf16.msrb.mxu2 %v4093_v57  ;;  %1557 = vmatpush.bf16.msrb.mxu3 %v4101_v58  ;;  %v4486_v57 = vor.u32 %v3949_v56, %v3257_v55  ;;  %v4488_v58 = vor.u32 %v4005_v47, %v3481_v46  ;;  %v3281_v55 = vld [vmem:[%s6388_s0 + $0x48] sm:$0xf]  ;;  %v3954_v56 = vld [vmem:[%s6388_s0 + $0x54] sm:$0xf0] }
  0x28   :  { %6534 = vst [vmem:[#allocation33_spill] sm:$0xff] %v4568_v35 }
  0x29   :  { %6526 = vst [vmem:[#allocation25_spill] sm:$0xff] %v4486_v57 }
  0x2a   :  { %1220 = vmatpush.bf16.msrb.mxu1 %v4084_v59  ;;  %6527 = vst [vmem:[#allocation26_spill] sm:$0xff] %v4488_v58  ;;  %v4490_v59 = vor.u32 %v4037_v49, %v3609_v48 }
  0x2b   :  { %1389 = vmatpush.bf16.msrb.mxu2 %v4092_v60  ;;  %1558 = vmatpush.bf16.msrb.mxu3 %v4100_v61  ;;  %v4492_v60 = vor.u32 %v4069_v54, %v3737_v53  ;;  %v3943_v61 = vld [vmem:[%s6388_s0 + $0x4] sm:$0xf]  ;;  %v3275_v54 = vld [vmem:[%s6388_s0 + $0x50] sm:$0xf0] }
  0x2c   :  { %6528 = vst [vmem:[#allocation27_spill] sm:$0xff] %v4490_v59  ;;  %v3951_v53 = vld [vmem:[%s6388_s0 + $0x44] sm:$0xf] }
  0x2d   :  { %6529 = vst [vmem:[#allocation28_spill] sm:$0xff] %v4492_v60 }
  0x2e   :  { %1221 = vmatpush.bf16.msrb.mxu1 %v4083_v4  ;;  %v3953_v4 = vld [vmem:[%s6388_s0 + $0x4c] sm:$0xf0] }
  0x2f   :  { %1390 = vmatpush.bf16.msrb.mxu2 %v4091_v5  ;;  %1559 = vmatpush.bf16.msrb.mxu3 %v4099_v6  ;;  %v4522_v5 = vor.u32 %v3953_v4, %v3273_v3  ;;  %v4524_v6 = vor.u32 %v3943_v61, %v3243_v62  ;;  %v3952_v61 = vld [vmem:[%s6388_s0 + $0x4c] sm:$0xf]  ;;  %v3283_v62 = vld [vmem:[%s6388_s0 + $0x58] sm:$0xf0]  ;;  %v4620_v4 = vor.u32 %v3951_v53, %v3275_v54  ;;  %v3297_v53 = vld [vmem:[%s6388_s0 + $0x68] sm:$0xf] }
  0x30   :  { %v3958_v54 = vld [vmem:[%s6388_s0 + $0x74] sm:$0xf0] }
  0x31   :  { %1102 = vmatmul.bf16.gmra.mxu1 %v4237_v23  ;;  %1142 = vmatmul.bf16.gmra.mxu2 %v4239_v24  ;;  %6530 = vst [vmem:[#allocation29_spill] sm:$0xff] %v4522_v5 }
  0x32   :  { %1182 = vmatmul.bf16.gmra.mxu3 %v4241_v25  ;;  %1222 = vmatpush.bf16.msrb.mxu1 %v4082_v10  ;;  %6531 = vst [vmem:[#allocation30_spill] sm:$0xff] %v4524_v6  ;;  %v4526_v10 = vor.u32 %v3946_v0, %v3249_v63  ;;  %v3305_v63 = vld [vmem:[%s6388_s0 + $0x80] sm:$0xf]  ;;  %v3961_v0 = vld [vmem:[%s6388_s0 + $0x8c] sm:$0xf0] }
  0x33   :  { %1391 = vmatpush.bf16.msrb.mxu2 %v4090_v11  ;;  %1560 = vmatpush.bf16.msrb.mxu3 %v4098_v12  ;;  %v4530_v12 = vor.u32 %v3944_v1, %v3251_v2  ;;  %v4616_v2 = vor.u32 %v3961_v0, %v3305_v63  ;;  %6539 = vst [vmem:[#allocation38_spill] sm:$0xff] %v4620_v4  ;;  %v3337_v25 = vld [vmem:[%s6388_s0 + $0xc0] sm:$0xf] }
  0x34   :  { %1062 = vmatmul.bf16.gmra.mxu0 %v4486_v57  ;;  %6532 = vst [vmem:[#allocation31_spill] sm:$0xff] %v4526_v10 }
  0x35   :  { %6533 = vst [vmem:[#allocation32_spill] sm:$0xff] %v4530_v12 }
  0x36   :  { %1223 = vmatpush.bf16.msrb.mxu1 %v4081_v13  ;;  %6538 = vst [vmem:[#allocation37_spill] sm:$0xff] %v4616_v2 }
  0x37   :  { %1392 = vmatpush.bf16.msrb.mxu2 %v4089_v17  ;;  %1561 = vmatpush.bf16.msrb.mxu3 %v4097_v18 }
  0x3a   :  { %1224 = vmatpush.bf16.msrb.mxu1 %v4080_v22  ;;  %v3265_v22 = vld [vmem:[%s6388_s0 + $0x28] sm:$0xf] }
  0x3b   :  { %1393 = vmatpush.bf16.msrb.mxu2 %v4088_v26  ;;  %1562 = vmatpush.bf16.msrb.mxu3 %v4096_v27  ;;  %v3950_v26 = vld [vmem:[%s6388_s0 + $0x34] sm:$0xf0]  ;;  %v3948_v27 = vld [vmem:[%s6388_s0 + $0x2c] sm:$0xf] }
  0x3c   :  { %v4578_v46 = vor.u32 %v3948_v27, %v3267_v28 }
  0x3e   :  { %1225 = vmatpush.bf16.msrb.mxu1 %v4079_v39  ;;  %v4572_v39 = vor.u32 %v3947_v19, %v3259_v20  ;;  %6537 = vst [vmem:[#allocation36_spill] sm:$0xff] %v4578_v46  ;;  %v4622_v19 = vor.u32 %v3954_v56, %v3281_v55  ;;  %v3956_v55 = vld [vmem:[%s6388_s0 + $0x6c] sm:$0xf]  ;;  %v3299_v56 = vld [vmem:[%s6388_s0 + $0x78] sm:$0xf0] }
  0x3f   :  { %1394 = vmatpush.bf16.msrb.mxu2 %v4087_v40  ;;  %1563 = vmatpush.bf16.msrb.mxu3 %v4095_v44  ;;  %v4574_v40 = vor.u32 %v3950_v26, %v3265_v22  ;;  %v4626_v22 = vor.u32 %v3952_v61, %v3283_v62  ;;  %v3321_v61 = vld [vmem:[%s6388_s0 + $0xa0] sm:$0xf]  ;;  %v3965_v62 = vld [vmem:[%s6388_s0 + $0xac] sm:$0xf0] }
  0x40   :  { %6535 = vst [vmem:[#allocation34_spill] sm:$0xff] %v4572_v39  ;;  %v4664_v0 = vor.u32 %v3965_v62, %v3321_v61 }
  0x41   :  { %1107 = vmatmul.bf16.gmra.mxu1 %v4264_v32  ;;  %1147 = vmatmul.bf16.gmra.mxu2 %v4266_v33  ;;  %6536 = vst [vmem:[#allocation35_spill] sm:$0xff] %v4574_v40 }
  0x42   :  { %1187 = vmatmul.bf16.gmra.mxu3 %v4268_v34  ;;  %6540 = vst [vmem:[#allocation39_spill] sm:$0xff] %v4622_v19  ;;  %v3315_v34 = vld [vmem:[%s6388_s0 + $0x98] sm:$0xf0] }
  0x43   :  { %6541 = vst [vmem:[#allocation40_spill] sm:$0xff] %v4626_v22 }
  0x44   :  { %1067 = vmatmul.bf16.gmra.mxu0 %v4522_v5  ;;  %6542 = vst [vmem:[#allocation41_spill] sm:$0xff] %v4664_v0 }
  0x51   :  { %1112 = vmatmul.bf16.gmra.mxu1 %v4291_v41  ;;  %1152 = vmatmul.bf16.gmra.mxu2 %v4293_v42 }
  0x52   :  { %1192 = vmatmul.bf16.gmra.mxu3 %v4295_v43  ;;  %v4674_v43 = vor.u32 %v3956_v55, %v3299_v56  ;;  %v3962_v55 = vld [vmem:[%s6388_s0 + $0x94] sm:$0xf0]  ;;  %v3960_v56 = vld [vmem:[%s6388_s0 + $0x8c] sm:$0xf] }
  0x53   :  { %v4722_v24 = vor.u32 %v3960_v56, %v3315_v34  ;;  %v3323_v34 = vld [vmem:[%s6388_s0 + $0xb0] sm:$0xf0]  ;;  %v3964_v56 = vld [vmem:[%s6388_s0 + $0xac] sm:$0xf] }
  0x54   :  { %1072 = vmatmul.bf16.gmra.mxu0 %v4568_v35  ;;  %6545 = vst [vmem:[#allocation44_spill] sm:$0xff] %v4674_v43 }
  0x55   :  { %6549 = vst [vmem:[#allocation48_spill] sm:$0xff] %v4722_v24 }
  0x61   :  { %1117 = vmatmul.bf16.gmra.mxu1 %v4318_v50  ;;  %1157 = vmatmul.bf16.gmra.mxu2 %v4320_v51 }
  0x62   :  { %1197 = vmatmul.bf16.gmra.mxu3 %v4322_v52 }
  0x64   :  { %1077 = vmatmul.bf16.gmra.mxu0 %v4616_v2 }
  0x71   :  { %1122 = vmatmul.bf16.gmra.mxu1 %v4381_v7  ;;  %1162 = vmatmul.bf16.gmra.mxu2 %v4383_v8 }
  0x72   :  { %1202 = vmatmul.bf16.gmra.mxu3 %v4385_v9  ;;  %v4670_v9 = vor.u32 %v3958_v54, %v3297_v53  ;;  %v3307_v53 = vld [vmem:[%s6388_s0 + $0x90] sm:$0xf0]  ;;  %v3313_v54 = vld [vmem:[%s6388_s0 + $0x88] sm:$0xf] }
  0x73   :  { %v4718_v42 = vor.u32 %v3962_v55, %v3313_v54  ;;  %v3329_v54 = vld [vmem:[%s6388_s0 + $0xa8] sm:$0xf]  ;;  %v3966_v55 = vld [vmem:[%s6388_s0 + $0xb4] sm:$0xf0] }
  0x74   :  { %6544 = vst [vmem:[#allocation43_spill] sm:$0xff] %v4670_v9  ;;  %1082 = vmatmul.bf16.gmra.mxu0 %v4664_v0  ;;  %v4766_v23 = vor.u32 %v3966_v55, %v3329_v54  ;;  %v3345_v54 = vld [vmem:[%s6388_s0 + $0xc8] sm:$0xf]  ;;  %v3970_v55 = vld [vmem:[%s6388_s0 + $0xd4] sm:$0xf0] }
  0x75   :  { %6548 = vst [vmem:[#allocation47_spill] sm:$0xff] %v4718_v42 }
  0x76   :  { %6552 = vst [vmem:[#allocation51_spill] sm:$0xff] %v4766_v23 }
  0x81   :  { %1127 = vmatmul.bf16.gmra.mxu1 %v4444_v37  ;;  %1167 = vmatmul.bf16.gmra.mxu2 %v4446_v38  ;;  %v4712_v38 = vor.u32 %v3969_v16, %v3337_v25  ;;  %v3973_v37 = vld [vmem:[%s6388_s0 + $0xec] sm:$0xf0] }
  0x82   :  { %1207 = vmatmul.bf16.gmra.mxu3 %v4457_v45  ;;  %v4668_v45 = vor.u32 %v3955_v29, %v3291_v30  ;;  %v3959_v30 = vld [vmem:[%s6388_s0 + $0x84] sm:$0xf] }
  0x83   :  { %6546 = vst [vmem:[#allocation45_spill] sm:$0xff] %v4712_v38  ;;  %v4716_v51 = vor.u32 %v3959_v30, %v3307_v53  ;;  %v3963_v53 = vld [vmem:[%s6388_s0 + $0xa4] sm:$0xf] }
  0x84   :  { %6543 = vst [vmem:[#allocation42_spill] sm:$0xff] %v4668_v45  ;;  %1087 = vmatmul.bf16.gmra.mxu0 %v4712_v38  ;;  %v4764_v32 = vor.u32 %v3963_v53, %v3323_v34  ;;  %v4770_v38 = vor.u32 %v3964_v56, %v3331_v15  ;;  %v3967_v34 = vld [vmem:[%s6388_s0 + $0xc4] sm:$0xf]  ;;  %v3339_v15 = vld [vmem:[%s6388_s0 + $0xd0] sm:$0xf0] }
  0x85   :  { %6547 = vst [vmem:[#allocation46_spill] sm:$0xff] %v4716_v51  ;;  %v3968_v56 = vld [vmem:[%s6388_s0 + $0xcc] sm:$0xf] }
  0x86   :  { %6551 = vst [vmem:[#allocation50_spill] sm:$0xff] %v4764_v32 }
  0x87   :  { %6553 = vst [vmem:[#allocation52_spill] sm:$0xff] %v4770_v38 }
  0x91   :  { %1132 = vmatmul.bf16.gmra.mxu1 %v4488_v58  ;;  %1172 = vmatmul.bf16.gmra.mxu2 %v4490_v59  ;;  %v3353_v58 = vld [vmem:[%s6388_s0 + $0xe0] sm:$0xf] }
  0x92   :  { %1212 = vmatmul.bf16.gmra.mxu3 %v4492_v60  ;;  %v4760_v50 = vor.u32 %v3973_v37, %v3353_v58 }
  0x94   :  { %6550 = vst [vmem:[#allocation49_spill] sm:$0xff] %v4760_v50  ;;  %1092 = vmatmul.bf16.gmra.mxu0 %v4760_v50  ;;  %v3347_v50 = vld [vmem:[%s6388_s0 + $0xd8] sm:$0xf0] }
  0x9e   :  { %v4528_v11 = vpop.f32.mrf.mxu1 }
  0xa1   :  { %1226 = vmatmul.bf16.vlgmr.msrb.gmra.mxu1 %v4524_v6  ;;  %1395 = vmatmul.bf16.vlgmr.msrb.gmra.mxu2 %v4526_v10 }
  0xa2   :  { %1564 = vmatmul.bf16.vlgmr.msrb.gmra.mxu3 %v4530_v12 }
  0xa4   :  { %v4536_v13 = vpop.f32.mrf.mxu2 }
  0xa5   :  { %v4538_v17 = vpop.f32.mrf.mxu3 }
  0xa6   :  { %v4540_v18 = vpop.f32.mrf.mxu1 }
  0xac   :  { %v4566_v31 = vpop.f32.mrf.mxu2 }
  0xad   :  { %v4570_v36 = vpop.f32.mrf.mxu3 }
  0xae   :  { %v4576_v44 = vpop.f32.mrf.mxu1 }
  0xb1   :  { %1231 = vmatmul.bf16.gmra.mxu1 %v4572_v39  ;;  %1400 = vmatmul.bf16.gmra.mxu2 %v4574_v40 }
  0xb2   :  { %1569 = vmatmul.bf16.gmra.mxu3 %v4578_v46 }
  0xb4   :  { %v4584_v47 = vpop.f32.mrf.mxu2 }
  0xb5   :  { %v4586_v48 = vpop.f32.mrf.mxu3 }
  0xb6   :  { %v4588_v49 = vpop.f32.mrf.mxu1 }
  0xbc   :  { %v4614_v1 = vpop.f32.mrf.mxu2 }
  0xbd   :  { %v4618_v3 = vpop.f32.mrf.mxu3 }
  0xbe   :  { %v4624_v20 = vpop.f32.mrf.mxu1 }
  0xc1   :  { %1236 = vmatmul.bf16.gmra.mxu1 %v4620_v4  ;;  %1405 = vmatmul.bf16.gmra.mxu2 %v4622_v19 }
  0xc2   :  { %1574 = vmatmul.bf16.gmra.mxu3 %v4626_v22 }
  0xc4   :  { %v4632_v26 = vpop.f32.mrf.mxu2 }
  0xc5   :  { %v4634_v27 = vpop.f32.mrf.mxu3 }
  0xc6   :  { %v4636_v28 = vpop.f32.mrf.mxu1 }
  0xcc   :  { %v4662_v63 = vpop.f32.mrf.mxu2 }
  0xcd   :  { %v4666_v60 = vpop.f32.mrf.mxu3 }
  0xce   :  { %v4672_v52 = vpop.f32.mrf.mxu1 }
  0xd1   :  { %1241 = vmatmul.bf16.gmra.mxu1 %v4668_v45  ;;  %1410 = vmatmul.bf16.gmra.mxu2 %v4670_v9 }
  0xd2   :  { %1579 = vmatmul.bf16.gmra.mxu3 %v4674_v43  ;;  %v4810_v43 = vor.u32 %v3968_v56, %v3347_v50  ;;  %v1725_v50 = vld [vmem:[%s6389_s2] sm:$0xff]  ;;  %v3974_v56 = vld [vmem:[%s6388_s0 + $0xf4] sm:$0xf0] }
  0xd4   :  { %v4680_v61 = vpop.f32.mrf.mxu2  ;;  %6556 = vst [vmem:[#allocation55_spill] sm:$0xff] %v4810_v43 }
  0xd5   :  { %v4682_v62 = vpop.f32.mrf.mxu3 }
  0xd6   :  { %v4684_v29 = vpop.f32.mrf.mxu1 }
  0xdc   :  { %v4710_v59 = vpop.f32.mrf.mxu2 }
  0xdd   :  { %v4714_v8 = vpop.f32.mrf.mxu3 }
  0xde   :  { %v4720_v33 = vpop.f32.mrf.mxu1 }
  0xe1   :  { %1246 = vmatmul.bf16.gmra.mxu1 %v4716_v51  ;;  %1415 = vmatmul.bf16.gmra.mxu2 %v4718_v42  ;;  %v1058_v51 = vpop.f32.mrf.mxu0 }
  0xe2   :  { %1584 = vmatmul.bf16.gmra.mxu3 %v4722_v24  ;;  %v4804_v24 = vor.u32 %v3967_v34, %v3339_v15  ;;  %v1726_v34 = vld [vmem:[%s6389_s2 + $0x8] sm:$0xff]  ;;  %v3971_v15 = vld [vmem:[%s6388_s0 + $0xe4] sm:$0xf] }
  0xe3   :  { %1938 = vmatpush.msrb.mxu0 %v1726_v34  ;;  %v3972_v34 = vld [vmem:[%s6388_s0 + $0xec] sm:$0xf] }
  0xe4   :  { %v4728_v16 = vpop.f32.mrf.mxu2  ;;  %6554 = vst [vmem:[#allocation53_spill] sm:$0xff] %v4804_v24 }
  0xe5   :  { %v4730_v25 = vpop.f32.mrf.mxu3  ;;  %1939 = vmatpush.msrb.mxu0 %v1725_v50  ;;  %v3363_v50 = vld [vmem:[%s6388_s0 + $0xf8] sm:$0xf0] }
  0xe6   :  { %v4732_v30 = vpop.f32.mrf.mxu1  ;;  %v4855_v5 = vor.u32 %v3972_v34, %v3363_v50  ;;  %v3978_v34 = vld [vmem:[%s6388_s0 + $0x114] sm:$0xf0]  ;;  %v3976_v50 = vld [vmem:[%s6388_s0 + $0x10c] sm:$0xf] }
  0xe8   :  { %6561 = vst [vmem:[#allocation60_spill] sm:$0xff] %v4855_v5 }
  0xe9   :  { %v1060_v46 = vpop.f32.mrf.mxu0 }
  0xec   :  { %v4758_v7 = vpop.f32.mrf.mxu2 }
  0xed   :  { %v4762_v41 = vpop.f32.mrf.mxu3 }
  0xee   :  { %v4768_v14 = vpop.f32.mrf.mxu1 }
  0xf1   :  { %1251 = vmatmul.bf16.gmra.mxu1 %v4764_v32  ;;  %1420 = vmatmul.bf16.gmra.mxu2 %v4766_v23  ;;  %v4806_v32 = vor.u32 %v3970_v55, %v3345_v54  ;;  %v3355_v54 = vld [vmem:[%s6388_s0 + $0xf0] sm:$0xf0]  ;;  %v3361_v55 = vld [vmem:[%s6388_s0 + $0xe8] sm:$0xf] }
  0xf2   :  { %1589 = vmatmul.bf16.gmra.mxu3 %v4770_v38  ;;  %v4851_v42 = vor.u32 %v3974_v56, %v3361_v55  ;;  %v3371_v55 = vld [vmem:[%s6388_s0 + $0x110] sm:$0xf0]  ;;  %v3377_v56 = vld [vmem:[%s6388_s0 + $0x108] sm:$0xf] }
  0xf3   :  { %6555 = vst [vmem:[#allocation54_spill] sm:$0xff] %v4806_v32  ;;  %v4890_v19 = vor.u32 %v3978_v34, %v3377_v56 }
  0xf4   :  { %v4776_v37 = vpop.f32.mrf.mxu2  ;;  %6560 = vst [vmem:[#allocation59_spill] sm:$0xff] %v4851_v42 }
  0xf5   :  { %v4778_v58 = vpop.f32.mrf.mxu3  ;;  %6565 = vst [vmem:[#allocation64_spill] sm:$0xff] %v4890_v19 }
  0xf6   :  { %v4780_v53 = vpop.f32.mrf.mxu1 }
  0xfc   :  { %v4800_v38 = vpop.f32.mrf.mxu2 }
  0xfd   :  { %v4802_v0 = vpop.f32.mrf.mxu3 }
  0xfe   :  { %v4808_v2 = vpop.f32.mrf.mxu1 }
 0x101   :  { %1256 = vmatmul.bf16.gmra.mxu1 %v4804_v24  ;;  %1425 = vmatmul.bf16.gmra.mxu2 %v4806_v32  ;;  %v4849_v32 = vor.u32 %v3971_v15, %v3355_v54  ;;  %v1063_v15 = vpop.f32.mrf.mxu0  ;;  %v3975_v54 = vld [vmem:[%s6388_s0 + $0x104] sm:$0xf] }
 0x102   :  { %1594 = vmatmul.bf16.gmra.mxu3 %v4810_v43  ;;  %v4888_v12 = vor.u32 %v3975_v54, %v3371_v55 }
 0x103   :  { %6559 = vst [vmem:[#allocation58_spill] sm:$0xff] %v4849_v32 }
 0x104   :  { %v4815_v23 = vpop.f32.mrf.mxu2  ;;  %6564 = vst [vmem:[#allocation63_spill] sm:$0xff] %v4888_v12 }
 0x105   :  { %v4817_v35 = vpop.f32.mrf.mxu3 }
 0x106   :  { %6557 = vst [vmem:[#allocation56_spill] sm:$0xff] %v4817_v35  ;;  %v4819_v22 = vpop.f32.mrf.mxu1 }
 0x109   :  { %v1065_v6 = vpop.f32.mrf.mxu0 }
 0x10c   :  { %v4845_v43 = vpop.f32.mrf.mxu2 }
 0x10d   :  { %v4847_v24 = vpop.f32.mrf.mxu3 }
 0x10e   :  { %6558 = vst [vmem:[#allocation57_spill] sm:$0xff] %v4847_v24  ;;  %v4853_v45 = vpop.f32.mrf.mxu1 }
 0x111   :  { %1261 = vmatmul.bf16.gmra.mxu1 %v4849_v32  ;;  %1430 = vmatmul.bf16.gmra.mxu2 %v4851_v42  ;;  %v1068_v56 = vpop.f32.mrf.mxu0 }
 0x112   :  { %1599 = vmatmul.bf16.gmra.mxu3 %v4855_v5  ;;  %v3379_v5 = vld [vmem:[%s6388_s0 + $0x118] sm:$0xf0] }
 0x113   :  { %v4892_v21 = vor.u32 %v3976_v50, %v3379_v5  ;;  %v3979_v5 = vld [vmem:[%s6388_s0 + $0x124] sm:$0xf] }
 0x114   :  { %v4860_v9 = vpop.f32.mrf.mxu2 }
 0x115   :  { %v4862_v4 = vpop.f32.mrf.mxu3  ;;  %6566 = vst [vmem:[#allocation65_spill] sm:$0xff] %v4892_v21 }
 0x116   :  { %6562 = vst [vmem:[#allocation61_spill] sm:$0xff] %v4862_v4  ;;  %v4864_v57 = vpop.f32.mrf.mxu1 }
 0x11c   :  { %v4884_v32 = vpop.f32.mrf.mxu2 }
 0x11d   :  { %v4886_v42 = vpop.f32.mrf.mxu3 }
 0x11e   :  { %6563 = vst [vmem:[#allocation62_spill] sm:$0xff] %v4886_v42  ;;  %v1227_v39 = vpop.f32.mrf.mxu1 }
 0x11f   :  { %v1228_v40 = vadd.f32 %v1227_v39, %v1058_v51  ;;  %v3387_v51 = vld [vmem:[%s6388_s0 + $0x130] sm:$0xf0]  ;;  %v3393_v39 = vld [vmem:[%s6388_s0 + $0x128] sm:$0xf] }
 0x121   :  { %1266 = vmatmul.bf16.gmra.mxu1 %v4888_v12  ;;  %1435 = vmatmul.bf16.gmra.mxu2 %v4890_v19 }
 0x122   :  { %1604 = vmatmul.bf16.gmra.mxu3 %v4892_v21 }
 0x124   :  { %v1396_v10 = vpop.f32.mrf.mxu2 }
 0x125   :  { %v1397_v4 = vadd.f32 %v1396_v10, %v1228_v40  ;;  %v1565_v24 = vpop.f32.mrf.mxu3  ;;  %v3982_v10 = vld [vmem:[%s6388_s0 + $0x134] sm:$0xf0] }
 0x126   :  { %v1229_v35 = vpop.f32.mrf.mxu1  ;;  %v4918_v21 = vor.u32 %v3982_v10, %v3393_v39  ;;  %v3983_v10 = vld [vmem:[%s6388_s0 + $0x144] sm:$0xf] }
 0x127   :  { %v1566_v54 = vadd.f32 %v1565_v24, %v1397_v4  ;;  %v1230_v40 = vadd.f32 %v1229_v35, %v1060_v46  ;;  %v3980_v24 = vld [vmem:[%s6388_s0 + $0x12c] sm:$0xf]  ;;  %v3395_v4 = vld [vmem:[%s6388_s0 + $0x138] sm:$0xf0] }
 0x128   :  { %6568 = vst [vmem:[#allocation67_spill] sm:$0xff] %v4918_v21  ;;  %v4920_v19 = vor.u32 %v3980_v24, %v3395_v4  ;;  %v3984_v4 = vld [vmem:[%s6388_s0 + $0x14c] sm:$0xf] }
 0x129   :  { %3879 = vmatmul.msk.f32.vlgmr.msrb.gmra.mxu0 %vm1731_vm0, %v1566_v54  ;;  %v4916_v54 = vor.u32 %v3979_v5, %v3387_v51  ;;  %v1070_v51 = vpop.f32.mrf.mxu0 }
 0x12a   :  { %6569 = vst [vmem:[#allocation68_spill] sm:$0xff] %v4920_v19 }
 0x12b   :  { %6567 = vst [vmem:[#allocation66_spill] sm:$0xff] %v4916_v54 }
 0x12c   :  { %v1398_v55 = vpop.f32.mrf.mxu2 }
 0x12d   :  { %v1399_v34 = vadd.f32 %v1398_v55, %v1230_v40  ;;  %v1567_v50 = vpop.f32.mrf.mxu3 }
 0x12e   :  { %v1232_v12 = vpop.f32.mrf.mxu1 }
 0x12f   :  { %v1568_v35 = vadd.f32 %v1567_v50, %v1399_v34  ;;  %v1233_v46 = vadd.f32 %v1232_v12, %v1063_v15  ;;  %v3403_v12 = vld [vmem:[%s6388_s0 + $0x150] sm:$0xf0]  ;;  %v3409_v15 = vld [vmem:[%s6388_s0 + $0x148] sm:$0xf]  ;;  %v3411_v34 = vld [vmem:[%s6388_s0 + $0x158] sm:$0xf0] }
 0x131   :  { %1271 = vmatmul.bf16.gmra.mxu1 %v4916_v54  ;;  %1440 = vmatmul.bf16.gmra.mxu2 %v4918_v21 }
 0x132   :  { %1609 = vmatmul.bf16.gmra.mxu3 %v4920_v19  ;;  %3880 = vmatmul.msk.f32.gmra.mxu0 %vm1731_vm0, %v1568_v35  ;;  %v4949_v19 = vor.u32 %v3984_v4, %v3411_v34  ;;  %v3425_v4 = vld [vmem:[%s6388_s0 + $0x168] sm:$0xf] }
 0x134   :  { %v1401_v42 = vpop.f32.mrf.mxu2  ;;  %6572 = vst [vmem:[#allocation71_spill] sm:$0xff] %v4949_v19 }
 0x135   :  { %v1402_v40 = vadd.f32 %v1401_v42, %v1233_v46  ;;  %v1570_v55 = vpop.f32.mrf.mxu3  ;;  %v3986_v42 = vld [vmem:[%s6388_s0 + $0x154] sm:$0xf0] }
 0x136   :  { %v1234_v5 = vpop.f32.mrf.mxu1 }
 0x137   :  { %v1571_v39 = vadd.f32 %v1570_v55, %v1402_v40  ;;  %v1235_v24 = vadd.f32 %v1234_v5, %v1065_v6  ;;  %v4945_v40 = vor.u32 %v3983_v10, %v3403_v12  ;;  %v4947_v55 = vor.u32 %v3986_v42, %v3409_v15  ;;  %v1073_v6 = vpop.f32.mrf.mxu0  ;;  %v3987_v42 = vld [vmem:[%s6388_s0 + $0x164] sm:$0xf] }
 0x139   :  { %6570 = vst [vmem:[#allocation69_spill] sm:$0xff] %v4945_v40 }
 0x13a   :  { %3881 = vmatmul.msk.f32.gmra.mxu0 %vm1731_vm0, %v1571_v39  ;;  %6571 = vst [vmem:[#allocation70_spill] sm:$0xff] %v4947_v55 }
 0x13c   :  { %v1403_v50 = vpop.f32.mrf.mxu2 }
 0x13d   :  { %v1404_v35 = vadd.f32 %v1403_v50, %v1235_v24  ;;  %v1572_v46 = vpop.f32.mrf.mxu3 }
 0x13e   :  { %v1237_v39 = vpop.f32.mrf.mxu1 }
 0x13f   :  { %v1573_v54 = vadd.f32 %v1572_v46, %v1404_v35  ;;  %v1238_v5 = vadd.f32 %v1237_v39, %v1068_v56  ;;  %v3419_v56 = vld [vmem:[%s6388_s0 + $0x170] sm:$0xf0]  ;;  %v1075_v34 = vpop.f32.mrf.mxu0  ;;  %v3988_v46 = vld [vmem:[%s6388_s0 + $0x16c] sm:$0xf]  ;;  %v3427_v39 = vld [vmem:[%s6388_s0 + $0x178] sm:$0xf0] }
 0x141   :  { %1276 = vmatmul.bf16.gmra.mxu1 %v4945_v40  ;;  %1445 = vmatmul.bf16.gmra.mxu2 %v4947_v55  ;;  %v4978_v40 = vor.u32 %v3988_v46, %v3427_v39  ;;  %v3992_v39 = vld [vmem:[%s6388_s0 + $0x18c] sm:$0xf] }
 0x142   :  { %1614 = vmatmul.bf16.gmra.mxu3 %v4949_v19  ;;  %3882 = vmatmul.msk.f32.gmra.mxu0 %vm1731_vm0, %v1573_v54  ;;  %v3990_v54 = vld [vmem:[%s6388_s0 + $0x174] sm:$0xf0] }
 0x143   :  { %6575 = vst [vmem:[#allocation74_spill] sm:$0xff] %v4978_v40 }
 0x144   :  { %v1406_v24 = vpop.f32.mrf.mxu2 }
 0x145   :  { %v1407_v50 = vadd.f32 %v1406_v24, %v1238_v5  ;;  %v1575_v10 = vpop.f32.mrf.mxu3 }
 0x146   :  { %v1239_v12 = vpop.f32.mrf.mxu1 }
 0x147   :  { %v1576_v15 = vadd.f32 %v1575_v10, %v1407_v50  ;;  %v1240_v35 = vadd.f32 %v1239_v12, %v1070_v51  ;;  %v4974_v10 = vor.u32 %v3987_v42, %v3419_v56 }
 0x149   :  { %6573 = vst [vmem:[#allocation72_spill] sm:$0xff] %v4974_v10 }
 0x14a   :  { %3883 = vmatmul.msk.f32.gmra.mxu0 %vm1731_vm0, %v1576_v15  ;;  %v4976_v15 = vor.u32 %v3990_v54, %v3425_v4  ;;  %v3991_v54 = vld [vmem:[%s6388_s0 + $0x184] sm:$0xf] }
 0x14c   :  { %v1408_v5 = vpop.f32.mrf.mxu2  ;;  %6574 = vst [vmem:[#allocation73_spill] sm:$0xff] %v4976_v15 }
 0x14d   :  { %v1409_v24 = vadd.f32 %v1408_v5, %v1240_v35  ;;  %v1577_v50 = vpop.f32.mrf.mxu3  ;;  %v1078_v35 = vpop.f32.mrf.mxu0 }
 0x14e   :  { %v1242_v19 = vpop.f32.mrf.mxu1 }
 0x14f   :  { %v1578_v55 = vadd.f32 %v1577_v50, %v1409_v24  ;;  %v1243_v51 = vadd.f32 %v1242_v19, %v1073_v6  ;;  %v3435_v19 = vld [vmem:[%s6388_s0 + $0x190] sm:$0xf0]  ;;  %v3994_v6 = vld [vmem:[%s6388_s0 + $0x194] sm:$0xf0]  ;;  %v3443_v24 = vld [vmem:[%s6388_s0 + $0x198] sm:$0xf0] }
 0x151   :  { %1281 = vmatmul.bf16.gmra.mxu1 %v4974_v10  ;;  %1450 = vmatmul.bf16.gmra.mxu2 %v4976_v15 }
 0x152   :  { %1619 = vmatmul.bf16.gmra.mxu3 %v4978_v40  ;;  %3884 = vmatmul.msk.f32.gmra.mxu0 %vm1731_vm0, %v1578_v55  ;;  %v3441_v55 = vld [vmem:[%s6388_s0 + $0x188] sm:$0xf]  ;;  %v5007_v40 = vor.u32 %v3992_v39, %v3443_v24  ;;  %v3995_v39 = vld [vmem:[%s6388_s0 + $0x1a4] sm:$0xf] }
 0x153   :  { %v3457_v24 = vld [vmem:[%s6388_s0 + $0x1a8] sm:$0xf] }
 0x154   :  { %v1411_v12 = vpop.f32.mrf.mxu2  ;;  %6578 = vst [vmem:[#allocation77_spill] sm:$0xff] %v5007_v40 }
 0x155   :  { %v1412_v5 = vadd.f32 %v1411_v12, %v1243_v51  ;;  %v1580_v42 = vpop.f32.mrf.mxu3  ;;  %v1080_v10 = vpop.f32.mrf.mxu0 }
 0x156   :  { %v1244_v56 = vpop.f32.mrf.mxu1 }
 0x157   :  { %v1581_v4 = vadd.f32 %v1580_v42, %v1412_v5  ;;  %v1245_v46 = vadd.f32 %v1244_v56, %v1075_v34  ;;  %v5003_v5 = vor.u32 %v3991_v54, %v3435_v19  ;;  %v5005_v42 = vor.u32 %v3994_v6, %v3441_v55 }
 0x159   :  { %6576 = vst [vmem:[#allocation75_spill] sm:$0xff] %v5003_v5 }
 0x15a   :  { %3885 = vmatmul.msk.f32.gmra.mxu0 %vm1731_vm0, %v1581_v4  ;;  %6577 = vst [vmem:[#allocation76_spill] sm:$0xff] %v5005_v42 }
 0x15c   :  { %v1413_v50 = vpop.f32.mrf.mxu2 }
 0x15d   :  { %v1414_v51 = vadd.f32 %v1413_v50, %v1245_v46  ;;  %v1582_v12 = vpop.f32.mrf.mxu3  ;;  %v1083_v6 = vpop.f32.mrf.mxu0 }
 0x15e   :  { %v1247_v4 = vpop.f32.mrf.mxu1 }
 0x15f   :  { %v1583_v34 = vadd.f32 %v1582_v12, %v1414_v51  ;;  %v1248_v56 = vadd.f32 %v1247_v4, %v1078_v35  ;;  %v3451_v35 = vld [vmem:[%s6388_s0 + $0x1b0] sm:$0xf0]  ;;  %v3998_v51 = vld [vmem:[%s6388_s0 + $0x1b4] sm:$0xf0]  ;;  %v3996_v4 = vld [vmem:[%s6388_s0 + $0x1ac] sm:$0xf] }
 0x161   :  { %1286 = vmatmul.bf16.gmra.mxu1 %v5003_v5  ;;  %1455 = vmatmul.bf16.gmra.mxu2 %v5005_v42 }
 0x162   :  { %1624 = vmatmul.bf16.gmra.mxu3 %v5007_v40  ;;  %3886 = vmatmul.msk.f32.gmra.mxu0 %vm1731_vm0, %v1583_v34  ;;  %v3459_v34 = vld [vmem:[%s6388_s0 + $0x1b8] sm:$0xf0] }
 0x163   :  { %v5036_v5 = vor.u32 %v3996_v4, %v3459_v34  ;;  %v4000_v34 = vld [vmem:[%s6388_s0 + $0x1cc] sm:$0xf] }
 0x164   :  { %v1416_v46 = vpop.f32.mrf.mxu2 }
 0x165   :  { %v1417_v50 = vadd.f32 %v1416_v46, %v1248_v56  ;;  %v1585_v54 = vpop.f32.mrf.mxu3  ;;  %6581 = vst [vmem:[#allocation80_spill] sm:$0xff] %v5036_v5 }
 0x166   :  { %v1249_v19 = vpop.f32.mrf.mxu1 }
 0x167   :  { %v1586_v55 = vadd.f32 %v1585_v54, %v1417_v50  ;;  %v1250_v12 = vadd.f32 %v1249_v19, %v1080_v10  ;;  %v5032_v54 = vor.u32 %v3995_v39, %v3451_v35  ;;  %v1085_v19 = vpop.f32.mrf.mxu0 }
 0x169   :  { %6579 = vst [vmem:[#allocation78_spill] sm:$0xff] %v5032_v54 }
 0x16a   :  { %3887 = vmatmul.msk.f32.gmra.mxu0 %vm1731_vm0, %v1586_v55  ;;  %v5034_v55 = vor.u32 %v3998_v51, %v3457_v24  ;;  %v3999_v51 = vld [vmem:[%s6388_s0 + $0x1c4] sm:$0xf] }
 0x16c   :  { %v1418_v56 = vpop.f32.mrf.mxu2  ;;  %6580 = vst [vmem:[#allocation79_spill] sm:$0xff] %v5034_v55 }
 0x16d   :  { %v1419_v46 = vadd.f32 %v1418_v56, %v1250_v12  ;;  %v1587_v50 = vpop.f32.mrf.mxu3 }
 0x16e   :  { %v1252_v40 = vpop.f32.mrf.mxu1 }
 0x16f   :  { %v1588_v42 = vadd.f32 %v1587_v50, %v1419_v46  ;;  %v1253_v10 = vadd.f32 %v1252_v40, %v1083_v6  ;;  %v3467_v40 = vld [vmem:[%s6388_s0 + $0x1d0] sm:$0xf0]  ;;  %v4002_v6 = vld [vmem:[%s6388_s0 + $0x1d4] sm:$0xf0]  ;;  %v3475_v46 = vld [vmem:[%s6388_s0 + $0x1d8] sm:$0xf0]  ;;  %v1088_v50 = vpop.f32.mrf.mxu0 }
 0x171   :  { %1291 = vmatmul.bf16.gmra.mxu1 %v5032_v54  ;;  %1460 = vmatmul.bf16.gmra.mxu2 %v5034_v55  ;;  %v5065_v54 = vor.u32 %v4000_v34, %v3475_v46  ;;  %v3489_v34 = vld [vmem:[%s6388_s0 + $0x1e8] sm:$0xf] }
 0x172   :  { %1629 = vmatmul.bf16.gmra.mxu3 %v5036_v5  ;;  %3888 = vmatmul.msk.f32.gmra.mxu0 %vm1731_vm0, %v1588_v42  ;;  %v3473_v42 = vld [vmem:[%s6388_s0 + $0x1c8] sm:$0xf] }
 0x173   :  { %6584 = vst [vmem:[#allocation83_spill] sm:$0xff] %v5065_v54 }
 0x174   :  { %v1421_v12 = vpop.f32.mrf.mxu2 }
 0x175   :  { %v1422_v56 = vadd.f32 %v1421_v12, %v1253_v10  ;;  %v1590_v39 = vpop.f32.mrf.mxu3 }
 0x176   :  { %v1254_v35 = vpop.f32.mrf.mxu1 }
 0x177   :  { %v1591_v24 = vadd.f32 %v1590_v39, %v1422_v56  ;;  %v1255_v4 = vadd.f32 %v1254_v35, %v1085_v19  ;;  %v5061_v39 = vor.u32 %v3999_v51, %v3467_v40  ;;  %v1090_v51 = vpop.f32.mrf.mxu0 }
 0x179   :  { %6582 = vst [vmem:[#allocation81_spill] sm:$0xff] %v5061_v39 }
 0x17a   :  { %3889 = vmatmul.msk.f32.gmra.mxu0 %vm1731_vm0, %v1591_v24  ;;  %v5063_v24 = vor.u32 %v4002_v6, %v3473_v42  ;;  %v4003_v6 = vld [vmem:[%s6388_s0 + $0x1e4] sm:$0xf] }
 0x17c   :  { %v1423_v10 = vpop.f32.mrf.mxu2  ;;  %6583 = vst [vmem:[#allocation82_spill] sm:$0xff] %v5063_v24 }
 0x17d   :  { %v1424_v12 = vadd.f32 %v1423_v10, %v1255_v4  ;;  %v1592_v56 = vpop.f32.mrf.mxu3 }
 0x17e   :  { %v1257_v5 = vpop.f32.mrf.mxu1 }
 0x17f   :  { %v1593_v19 = vadd.f32 %v1592_v56, %v1424_v12  ;;  %v1258_v35 = vadd.f32 %v1257_v5, %v1088_v50  ;;  %v3483_v5 = vld [vmem:[%s6388_s0 + $0x1f0] sm:$0xf0]  ;;  %v4004_v50 = vld [vmem:[%s6388_s0 + $0x1ec] sm:$0xf]  ;;  %v3491_v12 = vld [vmem:[%s6388_s0 + $0x1f8] sm:$0xf0] }
 0x181   :  { %1296 = vmatmul.bf16.gmra.mxu1 %v5061_v39  ;;  %1465 = vmatmul.bf16.gmra.mxu2 %v5063_v24 }
 0x182   :  { %1634 = vmatmul.bf16.gmra.mxu3 %v5065_v54  ;;  %3890 = vmatmul.msk.f32.gmra.mxu0 %vm1731_vm0, %v1593_v19  ;;  %v5094_v54 = vor.u32 %v4004_v50, %v3491_v12  ;;  %v3499_v12 = vld [vmem:[%s6388_s0 + $0x210] sm:$0xf0] }
 0x184   :  { %v1426_v55 = vpop.f32.mrf.mxu2  ;;  %6587 = vst [vmem:[#allocation86_spill] sm:$0xff] %v5094_v54 }
 0x185   :  { %v1427_v4 = vadd.f32 %v1426_v55, %v1258_v35  ;;  %v1595_v10 = vpop.f32.mrf.mxu3  ;;  %v4006_v55 = vld [vmem:[%s6388_s0 + $0x1f4] sm:$0xf0] }
 0x186   :  { %v1259_v40 = vpop.f32.mrf.mxu1 }
 0x187   :  { %v1596_v42 = vadd.f32 %v1595_v10, %v1427_v4  ;;  %v1260_v46 = vadd.f32 %v1259_v40, %v1090_v51  ;;  %v5090_v4 = vor.u32 %v4003_v6, %v3483_v5  ;;  %v5092_v10 = vor.u32 %v4006_v55, %v3489_v34  ;;  %v1093_v51 = vpop.f32.mrf.mxu0  ;;  %v4007_v55 = vld [vmem:[%s6388_s0 + $0x204] sm:$0xf] }
 0x189   :  { %6585 = vst [vmem:[#allocation84_spill] sm:$0xff] %v5090_v4 }
 0x18a   :  { %3891 = vmatmul.msk.f32.gmra.mxu0 %vm1731_vm0, %v1596_v42  ;;  %6586 = vst [vmem:[#allocation85_spill] sm:$0xff] %v5092_v10 }
 0x18c   :  { %v1428_v56 = vpop.f32.mrf.mxu2 }
 0x18d   :  { %v1429_v19 = vadd.f32 %v1428_v56, %v1260_v46  ;;  %v1597_v35 = vpop.f32.mrf.mxu3 }
 0x18e   :  { %v1262_v42 = vpop.f32.mrf.mxu1 }
 0x18f   :  { %v1598_v39 = vadd.f32 %v1597_v35, %v1429_v19  ;;  %v1263_v40 = vadd.f32 %v1262_v42, %v1093_v51  ;;  %v1095_v50 = vpop.f32.mrf.mxu0  ;;  %v4010_v19 = vld [vmem:[%s6388_s0 + $0x214] sm:$0xf0]  ;;  %v4008_v42 = vld [vmem:[%s6388_s0 + $0x20c] sm:$0xf]  ;;  %v3507_v51 = vld [vmem:[%s6388_s0 + $0x218] sm:$0xf0] }
 0x191   :  { %1301 = vmatmul.bf16.gmra.mxu1 %v5090_v4  ;;  %1470 = vmatmul.bf16.gmra.mxu2 %v5092_v10  ;;  %v5123_v4 = vor.u32 %v4008_v42, %v3507_v51  ;;  %v4011_v42 = vld [vmem:[%s6388_s0 + $0x224] sm:$0xf]  ;;  %v3515_v51 = vld [vmem:[%s6388_s0 + $0x230] sm:$0xf0] }
 0x192   :  { %1639 = vmatmul.bf16.gmra.mxu3 %v5094_v54  ;;  %3892 = vmatmul.msk.f32.gmra.mxu0 %vm1731_vm0, %v1598_v39  ;;  %v3505_v39 = vld [vmem:[%s6388_s0 + $0x208] sm:$0xf] }
 0x193   :  { %6590 = vst [vmem:[#allocation89_spill] sm:$0xff] %v5123_v4 }
 0x194   :  { %v1431_v46 = vpop.f32.mrf.mxu2 }
 0x195   :  { %v1432_v56 = vadd.f32 %v1431_v46, %v1263_v40  ;;  %v1600_v6 = vpop.f32.mrf.mxu3 }
 0x196   :  { %v1264_v5 = vpop.f32.mrf.mxu1 }
 0x197   :  { %v1601_v34 = vadd.f32 %v1600_v6, %v1432_v56  ;;  %v1265_v35 = vadd.f32 %v1264_v5, %v1095_v50  ;;  %v5119_v6 = vor.u32 %v4007_v55, %v3499_v12 }
 0x199   :  { %6588 = vst [vmem:[#allocation87_spill] sm:$0xff] %v5119_v6 }
 0x19a   :  { %3893 = vmatmul.msk.f32.gmra.mxu0 %vm1731_vm0, %v1601_v34  ;;  %v5121_v34 = vor.u32 %v4010_v19, %v3505_v39 }
 0x19c   :  { %v1433_v40 = vpop.f32.mrf.mxu2  ;;  %6589 = vst [vmem:[#allocation88_spill] sm:$0xff] %v5121_v34 }
 0x19d   :  { %v1434_v46 = vadd.f32 %v1433_v40, %v1265_v35  ;;  %v1602_v56 = vpop.f32.mrf.mxu3  ;;  %v4012_v40 = vld [vmem:[%s6388_s0 + $0x22c] sm:$0xf] }
 0x19e   :  { %v1267_v54 = vpop.f32.mrf.mxu1 }
 0x19f   :  { %v1603_v10 = vadd.f32 %v1602_v56, %v1434_v46  ;;  %v1268_v5 = vadd.f32 %v1267_v54, %v4528_v11  ;;  %v3521_v11 = vld [vmem:[%s6388_s0 + $0x228] sm:$0xf]  ;;  %v4014_v54 = vld [vmem:[%s6388_s0 + $0x234] sm:$0xf0]  ;;  %v3523_v46 = vld [vmem:[%s6388_s0 + $0x238] sm:$0xf0] }
 0x1a1   :  { %1306 = vmatmul.bf16.gmra.mxu1 %v5119_v6  ;;  %1475 = vmatmul.bf16.gmra.mxu2 %v5121_v34 }
 0x1a2   :  { %1644 = vmatmul.bf16.gmra.mxu3 %v5123_v4  ;;  %3894 = vmatmul.msk.f32.gmra.mxu0 %vm1731_vm0, %v1603_v10  ;;  %v5156_v4 = vor.u32 %v4012_v40, %v3523_v46 }
 0x1a4   :  { %v1436_v50 = vpop.f32.mrf.mxu2  ;;  %6593 = vst [vmem:[#allocation92_spill] sm:$0xff] %v5156_v4 }
 0x1a5   :  { %v1437_v35 = vadd.f32 %v1436_v50, %v1268_v5  ;;  %v1605_v55 = vpop.f32.mrf.mxu3 }
 0x1a6   :  { %v1269_v12 = vpop.f32.mrf.mxu1  ;;  %v5130_v39 = vpop.f32.mrf.mxu0 }
 0x1a7   :  { %v1606_v19 = vadd.f32 %v1605_v55, %v1437_v35  ;;  %v1270_v10 = vadd.f32 %v1269_v12, %v4540_v18  ;;  %v5152_v35 = vor.u32 %v4011_v42, %v3515_v51  ;;  %v5154_v55 = vor.u32 %v4014_v54, %v3521_v11  ;;  %v5168_v54 = vld [vmem:[%s6390_s3] ss:$0 sm:$0xff] }
 0x1a9   :  { %6591 = vst [vmem:[#allocation90_spill] sm:$0xff] %v5152_v35 }
 0x1aa   :  { %3895 = vmatmul.msk.f32.gmra.mxu0 %vm1731_vm0, %v1606_v19  ;;  %6592 = vst [vmem:[#allocation91_spill] sm:$0xff] %v5154_v55 }
 0x1ac   :  { %v1438_v56 = vpop.f32.mrf.mxu2 }
 0x1ad   :  { %v1439_v5 = vadd.f32 %v1438_v56, %v1270_v10  ;;  %v1607_v50 = vpop.f32.mrf.mxu3 }
 0x1ae   :  { %v1272_v19 = vpop.f32.mrf.mxu1 }
 0x1af   :  { %v1608_v6 = vadd.f32 %v1607_v50, %v1439_v5  ;;  %v5158_v18 = vpop.f32.mrf.mxu0  ;;  %v1273_v12 = vadd.f32 %v1272_v19, %v4576_v44  ;;  %v5174_v5 = vld [vmem:[%s6391_s4] ss:$0 sm:$0xff]  ;;  %v4015_v44 = vld [vmem:[%s6388_s0 + $0x244] sm:$0xf]  ;;  %v3537_v19 = vld [vmem:[%s6388_s0 + $0x248] sm:$0xf] }
 0x1b1   :  { %1311 = vmatmul.bf16.gmra.mxu1 %v5152_v35  ;;  %1480 = vmatmul.bf16.gmra.mxu2 %v5154_v55 }
 0x1b2   :  { %1649 = vmatmul.bf16.gmra.mxu3 %v5156_v4  ;;  %3896 = vmatmul.msk.f32.gmra.mxu0 %vm1731_vm0, %v1608_v6  ;;  %v3531_v6 = vld [vmem:[%s6388_s0 + $0x250] sm:$0xf0] }
 0x1b3   :  { %v5197_v35 = vor.u32 %v4015_v44, %v3531_v6 }
 0x1b4   :  { %v1441_v42 = vpop.f32.mrf.mxu2 }
 0x1b5   :  { %v1442_v51 = vadd.f32 %v1441_v42, %v1273_v12  ;;  %v1610_v11 = vpop.f32.mrf.mxu3  ;;  %v4018_v12 = vld [vmem:[%s6388_s0 + $0x254] sm:$0xf0] }
 0x1b6   :  { %v1274_v10 = vpop.f32.mrf.mxu1  ;;  %v5199_v55 = vor.u32 %v4018_v12, %v3537_v19 }
 0x1b7   :  { %v1611_v40 = vadd.f32 %v1610_v11, %v1442_v51  ;;  %v1947_v46 = vpop.f32.mrf.mxu0  ;;  %v1275_v42 = vadd.f32 %v1274_v10, %v4588_v49  ;;  %v4016_v51 = vld [vmem:[%s6388_s0 + $0x24c] sm:$0xf]  ;;  %v3539_v11 = vld [vmem:[%s6388_s0 + $0x258] sm:$0xf0] }
 0x1b8   :  { %v1948_v56 = vadd.f32 %v5168_v54, %v1947_v46  ;;  %v5202_v10 = vor.u32 %v4016_v51, %v3539_v11 }
 0x1ba   :  { %v2135_v50 = vmax.f32 %v1948_v56, 0.0  ;;  %3897 = vmatmul.msk.f32.gmra.mxu0 %vm1731_vm0, %v1611_v40  ;;  %6594 = vst [vmem:[#allocation93_spill] sm:$0xff] %v5202_v10 }
 0x1bc   :  { %v1443_v46 = vpop.f32.mrf.mxu2  ;;  %v2203_v40 = vmul.f32 %v5174_v5, %v2135_v50 }
 0x1bd   :  { %v1444_v56 = vadd.f32 %v1443_v46, %v1275_v42  ;;  %v1612_v4 = vpop.f32.mrf.mxu3 }
 0x1be   :  { %v1277_v34 = vpop.f32.mrf.mxu1  ;;  %v2272_v49 = vsel %vm2265_vm1, %v2203_v40, 0.0  ;;  %v4022_v40 = vld [vmem:[%s6388_s0 + $0x274] sm:$0xf0] }
 0x1bf   :  { %v1613_v24 = vadd.f32 %v1612_v4, %v1444_v56  ;;  %v1950_v15 = vpop.f32.mrf.mxu0  ;;  %2273 = vadd.xlane.f32.xlu2 %v2272_v49  ;;  %v1278_v44 = vadd.f32 %v1277_v34, %v4624_v20  ;;  %v3547_v20 = vld [vmem:[%s6388_s0 + $0x270] sm:$0xf0]  ;;  %v3553_v34 = vld [vmem:[%s6388_s0 + $0x268] sm:$0xf]  ;;  %v4020_v49 = vld [vmem:[%s6388_s0 + $0x26c] sm:$0xf] }
 0x1c0   :  { %v1951_v21 = vadd.f32 %v5168_v54, %v1950_v15 }
 0x1c1   :  { %1316 = vmatmul.bf16.gmra.mxu1 %v5197_v35  ;;  %1485 = vmatmul.bf16.gmra.mxu2 %v5199_v55 }
 0x1c2   :  { %v2136_v50 = vmax.f32 %v1951_v21, 0.0  ;;  %1654 = vmatmul.bf16.gmra.mxu3 %v5202_v10  ;;  %3898 = vmatmul.msk.f32.gmra.mxu0 %vm1731_vm0, %v1613_v24  ;;  %v4019_v21 = vld [vmem:[%s6388_s0 + $0x264] sm:$0xf] }
 0x1c4   :  { %v1446_v6 = vpop.f32.mrf.mxu2  ;;  %v2204_v19 = vmul.f32 %v5174_v5, %v2136_v50  ;;  %v3555_v50 = vld [vmem:[%s6388_s0 + $0x278] sm:$0xf0] }
 0x1c5   :  { %v1447_v12 = vadd.f32 %v1446_v6, %v1278_v44  ;;  %v1615_v4 = vpop.f32.mrf.mxu3 }
 0x1c6   :  { %v1279_v42 = vpop.f32.mrf.mxu1  ;;  %v2275_v51 = vsel %vm2265_vm1, %v2204_v19, 0.0 }
 0x1c7   :  { %v1616_v15 = vadd.f32 %v1615_v4, %v1447_v12  ;;  %v1953_v11 = vpop.f32.mrf.mxu0  ;;  %2276 = vadd.xlane.f32.xlu0 %v2275_v51  ;;  %v1280_v56 = vadd.f32 %v1279_v42, %v4636_v28  ;;  %v5234_v4 = vor.u32 %v4019_v21, %v3547_v20  ;;  %v5236_v51 = vor.u32 %v4022_v40, %v3553_v34 }
 0x1c8   :  { %v1954_v46 = vadd.f32 %v5168_v54, %v1953_v11  ;;  %v5239_v42 = vor.u32 %v4020_v49, %v3555_v50 }
 0x1ca   :  { %v2137_v24 = vmax.f32 %v1954_v46, 0.0  ;;  %3899 = vmatmul.msk.f32.gmra.mxu0 %vm1731_vm0, %v1616_v15  ;;  %6595 = vst [vmem:[#allocation94_spill] sm:$0xff] %v5239_v42 }
 0x1cc   :  { %v1448_v44 = vpop.f32.mrf.mxu2  ;;  %v2205_v6 = vmul.f32 %v5174_v5, %v2137_v24 }
 0x1cd   :  { %v1449_v19 = vadd.f32 %v1448_v44, %v1280_v56  ;;  %v1617_v12 = vpop.f32.mrf.mxu3 }
 0x1ce   :  { %v1282_v15 = vpop.f32.mrf.mxu1  ;;  %v2278_v28 = vsel %vm2265_vm1, %v2205_v6, 0.0 }
 0x1cf   :  { %v1618_v11 = vadd.f32 %v1617_v12, %v1449_v19  ;;  %v1956_v46 = vpop.f32.mrf.mxu0  ;;  %2279 = vadd.xlane.f32.xlu0 %v2278_v28  ;;  %v1283_v21 = vadd.f32 %v1282_v15, %v4672_v52  ;;  %v3563_v52 = vld [vmem:[%s6388_s0 + $0x290] sm:$0xf0]  ;;  %v3569_v15 = vld [vmem:[%s6388_s0 + $0x288] sm:$0xf]  ;;  %v4026_v28 = vld [vmem:[%s6388_s0 + $0x294] sm:$0xf0] }
 0x1d0   :  { %v1957_v10 = vadd.f32 %v5168_v54, %v1956_v46  ;;  %v4024_v46 = vld [vmem:[%s6388_s0 + $0x28c] sm:$0xf] }
 0x1d1   :  { %1321 = vmatmul.bf16.gmra.mxu1 %v5234_v4  ;;  %1490 = vmatmul.bf16.gmra.mxu2 %v5236_v51 }
 0x1d2   :  { %v2138_v24 = vmax.f32 %v1957_v10, 0.0  ;;  %1659 = vmatmul.bf16.gmra.mxu3 %v5239_v42  ;;  %3900 = vmatmul.msk.f32.gmra.mxu0 %vm1731_vm0, %v1618_v11  ;;  %v4023_v10 = vld [vmem:[%s6388_s0 + $0x284] sm:$0xf] }
 0x1d4   :  { %v1451_v20 = vpop.f32.mrf.mxu2  ;;  %v2206_v34 = vmul.f32 %v5174_v5, %v2138_v24  ;;  %v3571_v24 = vld [vmem:[%s6388_s0 + $0x298] sm:$0xf0] }
 0x1d5   :  { %v1452_v40 = vadd.f32 %v1451_v20, %v1283_v21  ;;  %v1620_v56 = vpop.f32.mrf.mxu3 }
 0x1d6   :  { %v1284_v49 = vpop.f32.mrf.mxu1  ;;  %v2281_v50 = vsel %vm2265_vm1, %v2206_v34, 0.0 }
 0x1d7   :  { %v1621_v44 = vadd.f32 %v1620_v56, %v1452_v40  ;;  %v1959_v6 = vpop.f32.mrf.mxu0  ;;  %2282 = vadd.xlane.f32.xlu1 %v2281_v50  ;;  %v1285_v11 = vadd.f32 %v1284_v49, %v4684_v29  ;;  %v5271_v56 = vor.u32 %v4023_v10, %v3563_v52  ;;  %v5273_v50 = vor.u32 %v4026_v28, %v3569_v15 }
 0x1d8   :  { %v1960_v19 = vadd.f32 %v5168_v54, %v1959_v6  ;;  %v5276_v49 = vor.u32 %v4024_v46, %v3571_v24 }
 0x1da   :  { %v2139_v12 = vmax.f32 %v1960_v19, 0.0  ;;  %3901 = vmatmul.msk.f32.gmra.mxu0 %vm1731_vm0, %v1621_v44  ;;  %6596 = vst [vmem:[#allocation95_spill] sm:$0xff] %v5276_v49 }
 0x1dc   :  { %v1453_v21 = vpop.f32.mrf.mxu2  ;;  %v2207_v20 = vmul.f32 %v5174_v5, %v2139_v12 }
 0x1dd   :  { %v1454_v34 = vadd.f32 %v1453_v21, %v1285_v11  ;;  %v1622_v40 = vpop.f32.mrf.mxu3 }
 0x1de   :  { %v1287_v44 = vpop.f32.mrf.mxu1  ;;  %v2284_v29 = vsel %vm2265_vm1, %v2207_v20, 0.0 }
 0x1df   :  { %v1623_v6 = vadd.f32 %v1622_v40, %v1454_v34  ;;  %v1962_v19 = vpop.f32.mrf.mxu0  ;;  %2285 = vadd.xlane.f32.xlu1 %v2284_v29  ;;  %v1288_v10 = vadd.f32 %v1287_v44, %v4720_v33  ;;  %v3579_v33 = vld [vmem:[%s6388_s0 + $0x2b0] sm:$0xf0]  ;;  %v3585_v44 = vld [vmem:[%s6388_s0 + $0x2a8] sm:$0xf]  ;;  %v4030_v29 = vld [vmem:[%s6388_s0 + $0x2b4] sm:$0xf0] }
 0x1e0   :  { %v1963_v42 = vadd.f32 %v5168_v54, %v1962_v19  ;;  %v4028_v19 = vld [vmem:[%s6388_s0 + $0x2ac] sm:$0xf] }
 0x1e1   :  { %1326 = vmatmul.bf16.gmra.mxu1 %v5271_v56  ;;  %1495 = vmatmul.bf16.gmra.mxu2 %v5273_v50 }
 0x1e2   :  { %v2140_v12 = vmax.f32 %v1963_v42, 0.0  ;;  %1664 = vmatmul.bf16.gmra.mxu3 %v5276_v49  ;;  %3902 = vmatmul.msk.f32.gmra.mxu0 %vm1731_vm0, %v1623_v6  ;;  %v4027_v42 = vld [vmem:[%s6388_s0 + $0x2a4] sm:$0xf] }
 0x1e4   :  { %v1456_v52 = vpop.f32.mrf.mxu2  ;;  %v2208_v15 = vmul.f32 %v5174_v5, %v2140_v12  ;;  %v3587_v12 = vld [vmem:[%s6388_s0 + $0x2b8] sm:$0xf0] }
 0x1e5   :  { %v1457_v28 = vadd.f32 %v1456_v52, %v1288_v10  ;;  %v1625_v11 = vpop.f32.mrf.mxu3 }
 0x1e6   :  { %v1289_v46 = vpop.f32.mrf.mxu1  ;;  %v2287_v24 = vsel %vm2265_vm1, %v2208_v15, 0.0 }
 0x1e7   :  { %v1626_v21 = vadd.f32 %v1625_v11, %v1457_v28  ;;  %v1965_v20 = vpop.f32.mrf.mxu0  ;;  %2288 = vadd.xlane.f32.xlu2 %v2287_v24  ;;  %v1290_v6 = vadd.f32 %v1289_v46, %v4732_v30  ;;  %v5308_v11 = vor.u32 %v4027_v42, %v3579_v33  ;;  %v5310_v24 = vor.u32 %v4030_v29, %v3585_v44 }
 0x1e8   :  { %v1966_v34 = vadd.f32 %v5168_v54, %v1965_v20  ;;  %v5313_v46 = vor.u32 %v4028_v19, %v3587_v12 }
 0x1ea   :  { %v2141_v40 = vmax.f32 %v1966_v34, 0.0  ;;  %3903 = vmatmul.msk.f32.gmra.mxu0 %vm1731_vm0, %v1626_v21  ;;  %6597 = vst [vmem:[#allocation96_spill] sm:$0xff] %v5313_v46 }
 0x1ec   :  { %v1458_v10 = vpop.f32.mrf.mxu2  ;;  %v2209_v52 = vmul.f32 %v5174_v5, %v2141_v40 }
 0x1ed   :  { %v1459_v15 = vadd.f32 %v1458_v10, %v1290_v6  ;;  %v1627_v28 = vpop.f32.mrf.mxu3 }
 0x1ee   :  { %v1292_v21 = vpop.f32.mrf.mxu1  ;;  %v2290_v30 = vsel %vm2265_vm1, %v2209_v52, 0.0 }
 0x1ef   :  { %v1628_v20 = vadd.f32 %v1627_v28, %v1459_v15  ;;  %v1968_v34 = vpop.f32.mrf.mxu0  ;;  %2291 = vadd.xlane.f32.xlu2 %v2290_v30  ;;  %v1293_v42 = vadd.f32 %v1292_v21, %v4768_v14  ;;  %v3595_v14 = vld [vmem:[%s6388_s0 + $0x2d0] sm:$0xf0]  ;;  %v3601_v21 = vld [vmem:[%s6388_s0 + $0x2c8] sm:$0xf]  ;;  %v4034_v30 = vld [vmem:[%s6388_s0 + $0x2d4] sm:$0xf0] }
 0x1f0   :  { %v1969_v49 = vadd.f32 %v5168_v54, %v1968_v34  ;;  %v4032_v34 = vld [vmem:[%s6388_s0 + $0x2cc] sm:$0xf] }
 0x1f1   :  { %1331 = vmatmul.bf16.gmra.mxu1 %v5308_v11  ;;  %1500 = vmatmul.bf16.gmra.mxu2 %v5310_v24 }
 0x1f2   :  { %v2142_v40 = vmax.f32 %v1969_v49, 0.0  ;;  %1669 = vmatmul.bf16.gmra.mxu3 %v5313_v46  ;;  %3904 = vmatmul.msk.f32.gmra.mxu0 %vm1731_vm0, %v1628_v20  ;;  %v4031_v49 = vld [vmem:[%s6388_s0 + $0x2c4] sm:$0xf] }
 0x1f4   :  { %v1461_v33 = vpop.f32.mrf.mxu2  ;;  %v2210_v44 = vmul.f32 %v5174_v5, %v2142_v40  ;;  %v3603_v40 = vld [vmem:[%s6388_s0 + $0x2d8] sm:$0xf0] }
 0x1f5   :  { %v1462_v29 = vadd.f32 %v1461_v33, %v1293_v42  ;;  %v1630_v6 = vpop.f32.mrf.mxu3 }
 0x1f6   :  { %v1294_v19 = vpop.f32.mrf.mxu1  ;;  %v2293_v12 = vsel %vm2265_vm1, %v2210_v44, 0.0 }
 0x1f7   :  { %v1631_v10 = vadd.f32 %v1630_v6, %v1462_v29  ;;  %v1971_v52 = vpop.f32.mrf.mxu0  ;;  %2294 = vadd.xlane.f32.xlu0 %v2293_v12  ;;  %v1295_v20 = vadd.f32 %v1294_v19, %v4780_v53  ;;  %v5345_v6 = vor.u32 %v4031_v49, %v3595_v14  ;;  %v5347_v12 = vor.u32 %v4034_v30, %v3601_v21 }
 0x1f8   :  { %v1972_v15 = vadd.f32 %v5168_v54, %v1971_v52  ;;  %v5350_v19 = vor.u32 %v4032_v34, %v3603_v40 }
 0x1fa   :  { %v2143_v28 = vmax.f32 %v1972_v15, 0.0  ;;  %3905 = vmatmul.msk.f32.gmra.mxu0 %vm1731_vm0, %v1631_v10  ;;  %6598 = vst [vmem:[#allocation97_spill] sm:$0xff] %v5350_v19 }
 0x1fc   :  { %v1463_v42 = vpop.f32.mrf.mxu2  ;;  %v2211_v33 = vmul.f32 %v5174_v5, %v2143_v28 }
 0x1fd   :  { %v1464_v44 = vadd.f32 %v1463_v42, %v1295_v20  ;;  %v1632_v29 = vpop.f32.mrf.mxu3 }
 0x1fe   :  { %v1297_v10 = vpop.f32.mrf.mxu1  ;;  %v2296_v53 = vsel %vm2265_vm1, %v2211_v33, 0.0 }
 0x1ff   :  { %v1633_v52 = vadd.f32 %v1632_v29, %v1464_v44  ;;  %v1974_v15 = vpop.f32.mrf.mxu0  ;;  %2297 = vadd.xlane.f32.xlu0 %v2296_v53  ;;  %v1298_v49 = vadd.f32 %v1297_v10, %v4808_v2  ;;  %v3611_v2 = vld [vmem:[%s6388_s0 + $0x2f0] sm:$0xf0]  ;;  %v3617_v10 = vld [vmem:[%s6388_s0 + $0x2e8] sm:$0xf]  ;;  %v4038_v53 = vld [vmem:[%s6388_s0 + $0x2f4] sm:$0xf0] }
 0x200   :  { %v1975_v46 = vadd.f32 %v5168_v54, %v1974_v15  ;;  %v4036_v15 = vld [vmem:[%s6388_s0 + $0x2ec] sm:$0xf] }
 0x201   :  { %1336 = vmatmul.bf16.gmra.mxu1 %v5345_v6  ;;  %1505 = vmatmul.bf16.gmra.mxu2 %v5347_v12 }
 0x202   :  { %v2144_v28 = vmax.f32 %v1975_v46, 0.0  ;;  %1674 = vmatmul.bf16.gmra.mxu3 %v5350_v19  ;;  %3906 = vmatmul.msk.f32.gmra.mxu0 %vm1731_vm0, %v1633_v52  ;;  %v4035_v46 = vld [vmem:[%s6388_s0 + $0x2e4] sm:$0xf] }
 0x204   :  { %v1466_v14 = vpop.f32.mrf.mxu2  ;;  %v2212_v21 = vmul.f32 %v5174_v5, %v2144_v28  ;;  %v3619_v28 = vld [vmem:[%s6388_s0 + $0x2f8] sm:$0xf0] }
 0x205   :  { %v1467_v30 = vadd.f32 %v1466_v14, %v1298_v49  ;;  %v1635_v20 = vpop.f32.mrf.mxu3 }
 0x206   :  { %v1299_v34 = vpop.f32.mrf.mxu1  ;;  %v2299_v40 = vsel %vm2265_vm1, %v2212_v21, 0.0 }
 0x207   :  { %v1636_v42 = vadd.f32 %v1635_v20, %v1467_v30  ;;  %v1977_v33 = vpop.f32.mrf.mxu0  ;;  %2300 = vadd.xlane.f32.xlu1 %v2299_v40  ;;  %v1300_v52 = vadd.f32 %v1299_v34, %v4819_v22  ;;  %v5382_v20 = vor.u32 %v4035_v46, %v3611_v2  ;;  %v5384_v40 = vor.u32 %v4038_v53, %v3617_v10 }
 0x208   :  { %v1978_v44 = vadd.f32 %v5168_v54, %v1977_v33  ;;  %v5387_v34 = vor.u32 %v4036_v15, %v3619_v28 }
 0x20a   :  { %v2145_v29 = vmax.f32 %v1978_v44, 0.0  ;;  %3907 = vmatmul.msk.f32.gmra.mxu0 %vm1731_vm0, %v1636_v42  ;;  %6599 = vst [vmem:[#allocation98_spill] sm:$0xff] %v5387_v34 }
 0x20c   :  { %v1468_v49 = vpop.f32.mrf.mxu2  ;;  %v2213_v14 = vmul.f32 %v5174_v5, %v2145_v29 }
 0x20d   :  { %v1469_v21 = vadd.f32 %v1468_v49, %v1300_v52  ;;  %v1637_v30 = vpop.f32.mrf.mxu3 }
 0x20e   :  { %v1302_v42 = vpop.f32.mrf.mxu1  ;;  %v2302_v22 = vsel %vm2265_vm1, %v2213_v14, 0.0 }
 0x20f   :  { %v1638_v33 = vadd.f32 %v1637_v30, %v1469_v21  ;;  %v1980_v44 = vpop.f32.mrf.mxu0  ;;  %2303 = vadd.xlane.f32.xlu1 %v2302_v22  ;;  %v1303_v46 = vadd.f32 %v1302_v42, %v4853_v45  ;;  %v3627_v45 = vld [vmem:[%s6388_s0 + $0x310] sm:$0xf0]  ;;  %v3633_v42 = vld [vmem:[%s6388_s0 + $0x308] sm:$0xf]  ;;  %v4042_v22 = vld [vmem:[%s6388_s0 + $0x314] sm:$0xf0] }
 0x210   :  { %v1981_v19 = vadd.f32 %v5168_v54, %v1980_v44  ;;  %v4040_v44 = vld [vmem:[%s6388_s0 + $0x30c] sm:$0xf] }
 0x211   :  { %1341 = vmatmul.bf16.gmra.mxu1 %v5382_v20  ;;  %1510 = vmatmul.bf16.gmra.mxu2 %v5384_v40 }
 0x212   :  { %v2146_v29 = vmax.f32 %v1981_v19, 0.0  ;;  %1679 = vmatmul.bf16.gmra.mxu3 %v5387_v34  ;;  %3908 = vmatmul.msk.f32.gmra.mxu0 %vm1731_vm0, %v1638_v33  ;;  %v4039_v19 = vld [vmem:[%s6388_s0 + $0x304] sm:$0xf] }
 0x214   :  { %v1471_v2 = vpop.f32.mrf.mxu2  ;;  %v2214_v10 = vmul.f32 %v5174_v5, %v2146_v29  ;;  %v3635_v29 = vld [vmem:[%s6388_s0 + $0x318] sm:$0xf0] }
 0x215   :  { %v1472_v53 = vadd.f32 %v1471_v2, %v1303_v46  ;;  %v1640_v52 = vpop.f32.mrf.mxu3 }
 0x216   :  { %v1304_v15 = vpop.f32.mrf.mxu1  ;;  %v2305_v28 = vsel %vm2265_vm1, %v2214_v10, 0.0 }
 0x217   :  { %v1641_v49 = vadd.f32 %v1640_v52, %v1472_v53  ;;  %v1983_v14 = vpop.f32.mrf.mxu0  ;;  %2306 = vadd.xlane.f32.xlu2 %v2305_v28  ;;  %v1305_v33 = vadd.f32 %v1304_v15, %v4864_v57  ;;  %v5419_v52 = vor.u32 %v4039_v19, %v3627_v45  ;;  %v5421_v28 = vor.u32 %v4042_v22, %v3633_v42 }
 0x218   :  { %v1984_v21 = vadd.f32 %v5168_v54, %v1983_v14  ;;  %v5424_v15 = vor.u32 %v4040_v44, %v3635_v29 }
 0x21a   :  { %v2147_v30 = vmax.f32 %v1984_v21, 0.0  ;;  %3909 = vmatmul.msk.f32.gmra.mxu0 %vm1731_vm0, %v1641_v49  ;;  %6600 = vst [vmem:[#allocation99_spill] sm:$0xff] %v5424_v15 }
 0x21c   :  { %v1473_v46 = vpop.f32.mrf.mxu2  ;;  %v2215_v2 = vmul.f32 %v5174_v5, %v2147_v30 }
 0x21d   :  { %v1474_v10 = vadd.f32 %v1473_v46, %v1305_v33  ;;  %v1642_v53 = vpop.f32.mrf.mxu3 }
 0x21e   :  { %v1307_v49 = vpop.f32.mrf.mxu1  ;;  %v2308_v57 = vsel %vm2265_vm1, %v2215_v2, 0.0 }
 0x21f   :  { %v1643_v14 = vadd.f32 %v1642_v53, %v1474_v10  ;;  %v1986_v21 = vpop.f32.mrf.mxu0  ;;  %2309 = vadd.xlane.f32.xlu2 %v2308_v57  ;;  %v1308_v19 = vadd.f32 %v1307_v49, %v4536_v13  ;;  %v3643_v13 = vld [vmem:[%s6388_s0 + $0x330] sm:$0xf0]  ;;  %v3649_v49 = vld [vmem:[%s6388_s0 + $0x328] sm:$0xf]  ;;  %v4046_v57 = vld [vmem:[%s6388_s0 + $0x334] sm:$0xf0] }
 0x220   :  { %v1987_v34 = vadd.f32 %v5168_v54, %v1986_v21  ;;  %v4044_v21 = vld [vmem:[%s6388_s0 + $0x32c] sm:$0xf] }
 0x221   :  { %1346 = vmatmul.bf16.gmra.mxu1 %v5419_v52  ;;  %1515 = vmatmul.bf16.gmra.mxu2 %v5421_v28 }
 0x222   :  { %v2148_v30 = vmax.f32 %v1987_v34, 0.0  ;;  %1684 = vmatmul.bf16.gmra.mxu3 %v5424_v15  ;;  %3910 = vmatmul.msk.f32.gmra.mxu0 %vm1731_vm0, %v1643_v14  ;;  %v4043_v34 = vld [vmem:[%s6388_s0 + $0x324] sm:$0xf] }
 0x224   :  { %v1476_v45 = vpop.f32.mrf.mxu2  ;;  %v2216_v42 = vmul.f32 %v5174_v5, %v2148_v30  ;;  %v3651_v30 = vld [vmem:[%s6388_s0 + $0x338] sm:$0xf0] }
 0x225   :  { %v1477_v22 = vadd.f32 %v1476_v45, %v1308_v19  ;;  %v1645_v33 = vpop.f32.mrf.mxu3 }
 0x226   :  { %v1309_v44 = vpop.f32.mrf.mxu1  ;;  %v2311_v29 = vsel %vm2265_vm1, %v2216_v42, 0.0 }
 0x227   :  { %v1646_v46 = vadd.f32 %v1645_v33, %v1477_v22  ;;  %v1989_v2 = vpop.f32.mrf.mxu0  ;;  %2312 = vadd.xlane.f32.xlu2 %v2311_v29  ;;  %v1310_v14 = vadd.f32 %v1309_v44, %v4566_v31  ;;  %v5456_v33 = vor.u32 %v4043_v34, %v3643_v13  ;;  %v5458_v29 = vor.u32 %v4046_v57, %v3649_v49 }
 0x228   :  { %v1990_v10 = vadd.f32 %v5168_v54, %v1989_v2  ;;  %v5461_v44 = vor.u32 %v4044_v21, %v3651_v30 }
 0x229   :  { %6601 = vst [vmem:[#allocation100_spill] sm:$0xff] %v5456_v33 }
 0x22a   :  { %v2149_v53 = vmax.f32 %v1990_v10, 0.0  ;;  %3911 = vmatmul.msk.f32.gmra.mxu0 %vm1731_vm0, %v1646_v46  ;;  %6602 = vst [vmem:[#allocation101_spill] sm:$0xff] %v5461_v44 }
 0x22c   :  { %v1478_v19 = vpop.f32.mrf.mxu2  ;;  %v2217_v45 = vmul.f32 %v5174_v5, %v2149_v53 }
 0x22d   :  { %v1479_v42 = vadd.f32 %v1478_v19, %v1310_v14  ;;  %v1647_v22 = vpop.f32.mrf.mxu3  ;;  %v4047_v19 = vld [vmem:[%s6388_s0 + $0x344] sm:$0xf] }
 0x22e   :  { %v1312_v46 = vpop.f32.mrf.mxu1  ;;  %v2314_v31 = vsel %vm2265_vm1, %v2217_v45, 0.0  ;;  %v3659_v45 = vld [vmem:[%s6388_s0 + $0x350] sm:$0xf0] }
 0x22f   :  { %v1648_v2 = vadd.f32 %v1647_v22, %v1479_v42  ;;  %v5463_v10 = vpop.f32.mrf.mxu0  ;;  %2315 = vadd.xlane.f32.xlu1 %v2314_v31  ;;  %v1313_v34 = vadd.f32 %v1312_v46, %v4584_v47  ;;  %v3665_v47 = vld [vmem:[%s6388_s0 + $0x348] sm:$0xf]  ;;  %v4050_v22 = vld [vmem:[%s6388_s0 + $0x354] sm:$0xf0]  ;;  %v4048_v31 = vld [vmem:[%s6388_s0 + $0x34c] sm:$0xf] }
 0x231   :  { %1351 = vmatmul.bf16.gmra.mxu1 %v5456_v33  ;;  %1520 = vmatmul.bf16.gmra.mxu2 %v5458_v29 }
 0x232   :  { %1689 = vmatmul.bf16.gmra.mxu3 %v5461_v44  ;;  %3912 = vmatmul.msk.f32.gmra.mxu0 %vm1731_vm0, %v1648_v2  ;;  %v3667_v2 = vld [vmem:[%s6388_s0 + $0x358] sm:$0xf0] }
 0x234   :  { %v1481_v13 = vpop.f32.mrf.mxu2 }
 0x235   :  { %v1482_v53 = vadd.f32 %v1481_v13, %v1313_v34  ;;  %v1650_v49 = vpop.f32.mrf.mxu3 }
 0x236   :  { %v1314_v57 = vpop.f32.mrf.mxu1 }
 0x237   :  { %v1651_v14 = vadd.f32 %v1650_v49, %v1482_v53  ;;  %v1995_v21 = vpop.f32.mrf.mxu0  ;;  %v1315_v46 = vadd.f32 %v1314_v57, %v4614_v1  ;;  %v5497_v57 = vor.u32 %v4048_v31, %v3667_v2 }
 0x238   :  { %v1996_v30 = vadd.f32 %v5168_v54, %v1995_v21  ;;  %v5494_v21 = vor.u32 %v4050_v22, %v3665_v47 }
 0x239   :  { %6603 = vst [vmem:[#allocation102_spill] sm:$0xff] %v5497_v57 }
 0x23a   :  { %v2151_v42 = vmax.f32 %v1996_v30, 0.0  ;;  %3913 = vmatmul.msk.f32.gmra.mxu0 %vm1731_vm0, %v1651_v14  ;;  %v5492_v14 = vor.u32 %v4047_v19, %v3659_v45 }
 0x23c   :  { %v1483_v34 = vpop.f32.mrf.mxu2  ;;  %v2219_v13 = vmul.f32 %v5174_v5, %v2151_v42 }
 0x23d   :  { %v1484_v53 = vadd.f32 %v1483_v34, %v1315_v46  ;;  %v1652_v49 = vpop.f32.mrf.mxu3 }
 0x23e   :  { %v1317_v30 = vpop.f32.mrf.mxu1  ;;  %v2320_v1 = vsel %vm2265_vm1, %v2219_v13, 0.0 }
 0x23f   :  { %v1653_v44 = vadd.f32 %v1652_v49, %v1484_v53  ;;  %v1998_v15 = vpop.f32.mrf.mxu0  ;;  %2321 = vadd.xlane.f32.xlu2 %v2320_v1  ;;  %v1318_v19 = vadd.f32 %v1317_v30, %v4632_v26  ;;  %v3675_v26 = vld [vmem:[%s6388_s0 + $0x370] sm:$0xf0]  ;;  %v3681_v53 = vld [vmem:[%s6388_s0 + $0x368] sm:$0xf]  ;;  %v4054_v49 = vld [vmem:[%s6388_s0 + $0x374] sm:$0xf0] }
 0x240   :  { %v1999_v33 = vadd.f32 %v5168_v54, %v1998_v15  ;;  %v4052_v1 = vld [vmem:[%s6388_s0 + $0x36c] sm:$0xf] }
 0x241   :  { %1356 = vmatmul.bf16.gmra.mxu1 %v5492_v14  ;;  %1525 = vmatmul.bf16.gmra.mxu2 %v5494_v21 }
 0x242   :  { %v2152_v42 = vmax.f32 %v1999_v33, 0.0  ;;  %1694 = vmatmul.bf16.gmra.mxu3 %v5497_v57  ;;  %3914 = vmatmul.msk.f32.gmra.mxu0 %vm1731_vm0, %v1653_v44  ;;  %v4051_v33 = vld [vmem:[%s6388_s0 + $0x364] sm:$0xf] }
 0x244   :  { %v1486_v45 = vpop.f32.mrf.mxu2  ;;  %v2220_v47 = vmul.f32 %v5174_v5, %v2152_v42  ;;  %v3683_v42 = vld [vmem:[%s6388_s0 + $0x378] sm:$0xf0] }
 0x245   :  { %v1487_v22 = vadd.f32 %v1486_v45, %v1318_v19  ;;  %v1655_v46 = vpop.f32.mrf.mxu3 }
 0x246   :  { %v1319_v31 = vpop.f32.mrf.mxu1  ;;  %v2323_v2 = vsel %vm2265_vm1, %v2220_v47, 0.0 }
 0x247   :  { %v1656_v15 = vadd.f32 %v1655_v46, %v1487_v22  ;;  %v2001_v34 = vpop.f32.mrf.mxu0  ;;  %2324 = vadd.xlane.f32.xlu0 %v2323_v2  ;;  %v1320_v30 = vadd.f32 %v1319_v31, %v4662_v63  ;;  %v5529_v46 = vor.u32 %v4051_v33, %v3675_v26  ;;  %v5531_v2 = vor.u32 %v4054_v49, %v3681_v53 }
 0x248   :  { %v2002_v13 = vadd.f32 %v5168_v54, %v2001_v34  ;;  %v5534_v31 = vor.u32 %v4052_v1, %v3683_v42 }
 0x249   :  { %6604 = vst [vmem:[#allocation103_spill] sm:$0xff] %v5529_v46 }
 0x24a   :  { %v2153_v44 = vmax.f32 %v2002_v13, 0.0  ;;  %3915 = vmatmul.msk.f32.gmra.mxu0 %vm1731_vm0, %v1656_v15  ;;  %6605 = vst [vmem:[#allocation104_spill] sm:$0xff] %v5534_v31 }
 0x24c   :  { %v1488_v19 = vpop.f32.mrf.mxu2  ;;  %v2221_v45 = vmul.f32 %v5174_v5, %v2153_v44 }
 0x24d   :  { %v1489_v47 = vadd.f32 %v1488_v19, %v1320_v30  ;;  %v1657_v22 = vpop.f32.mrf.mxu3 }
 0x24e   :  { %v1322_v15 = vpop.f32.mrf.mxu1  ;;  %v2326_v63 = vsel %vm2265_vm1, %v2221_v45, 0.0 }
 0x24f   :  { %v1658_v34 = vadd.f32 %v1657_v22, %v1489_v47  ;;  %v2004_v13 = vpop.f32.mrf.mxu0  ;;  %2327 = vadd.xlane.f32.xlu0 %v2326_v63  ;;  %v1323_v33 = vadd.f32 %v1322_v15, %v4680_v61  ;;  %v3691_v61 = vld [vmem:[%s6388_s0 + $0x390] sm:$0xf0]  ;;  %v3697_v15 = vld [vmem:[%s6388_s0 + $0x388] sm:$0xf]  ;;  %v4058_v63 = vld [vmem:[%s6388_s0 + $0x394] sm:$0xf0] }
 0x250   :  { %v2005_v57 = vadd.f32 %v5168_v54, %v2004_v13  ;;  %v4056_v13 = vld [vmem:[%s6388_s0 + $0x38c] sm:$0xf] }
 0x251   :  { %1361 = vmatmul.bf16.gmra.mxu1 %v5529_v46  ;;  %1530 = vmatmul.bf16.gmra.mxu2 %v5531_v2 }
 0x252   :  { %v2154_v44 = vmax.f32 %v2005_v57, 0.0  ;;  %1699 = vmatmul.bf16.gmra.mxu3 %v5534_v31  ;;  %3916 = vmatmul.msk.f32.gmra.mxu0 %vm1731_vm0, %v1658_v34  ;;  %v4055_v57 = vld [vmem:[%s6388_s0 + $0x384] sm:$0xf] }
 0x254   :  { %v1491_v26 = vpop.f32.mrf.mxu2  ;;  %v2222_v53 = vmul.f32 %v5174_v5, %v2154_v44  ;;  %v3699_v44 = vld [vmem:[%s6388_s0 + $0x398] sm:$0xf0] }
 0x255   :  { %v1492_v49 = vadd.f32 %v1491_v26, %v1323_v33  ;;  %v1660_v30 = vpop.f32.mrf.mxu3 }
 0x256   :  { %v1324_v1 = vpop.f32.mrf.mxu1  ;;  %v2329_v42 = vsel %vm2265_vm1, %v2222_v53, 0.0 }
 0x257   :  { %v1661_v19 = vadd.f32 %v1660_v30, %v1492_v49  ;;  %v2007_v45 = vpop.f32.mrf.mxu0  ;;  %2330 = vadd.xlane.f32.xlu1 %v2329_v42  ;;  %v1325_v34 = vadd.f32 %v1324_v1, %v4710_v59  ;;  %v5566_v30 = vor.u32 %v4055_v57, %v3691_v61  ;;  %v5568_v42 = vor.u32 %v4058_v63, %v3697_v15 }
 0x258   :  { %v2008_v47 = vadd.f32 %v5168_v54, %v2007_v45  ;;  %v5571_v1 = vor.u32 %v4056_v13, %v3699_v44 }
 0x259   :  { %6606 = vst [vmem:[#allocation105_spill] sm:$0xff] %v5566_v30 }
 0x25a   :  { %v2155_v22 = vmax.f32 %v2008_v47, 0.0  ;;  %3917 = vmatmul.msk.f32.gmra.mxu0 %vm1731_vm0, %v1661_v19  ;;  %6607 = vst [vmem:[#allocation106_spill] sm:$0xff] %v5568_v42 }
 0x25b   :  { %6608 = vst [vmem:[#allocation107_spill] sm:$0xff] %v5571_v1 }
 0x25c   :  { %v1493_v33 = vpop.f32.mrf.mxu2  ;;  %v2223_v26 = vmul.f32 %v5174_v5, %v2155_v22 }
 0x25d   :  { %v1494_v53 = vadd.f32 %v1493_v33, %v1325_v34  ;;  %v1662_v49 = vpop.f32.mrf.mxu3 }
 0x25e   :  { %v1327_v19 = vpop.f32.mrf.mxu1  ;;  %v2332_v59 = vsel %vm2265_vm1, %v2223_v26, 0.0 }
 0x25f   :  { %v1663_v45 = vadd.f32 %v1662_v49, %v1494_v53  ;;  %v2010_v47 = vpop.f32.mrf.mxu0  ;;  %2333 = vadd.xlane.f32.xlu1 %v2332_v59  ;;  %v1328_v57 = vadd.f32 %v1327_v19, %v4728_v16  ;;  %v3707_v16 = vld [vmem:[%s6388_s0 + $0x3b0] sm:$0xf0]  ;;  %v3713_v19 = vld [vmem:[%s6388_s0 + $0x3a8] sm:$0xf]  ;;  %v4062_v59 = vld [vmem:[%s6388_s0 + $0x3b4] sm:$0xf0] }
 0x260   :  { %v2011_v31 = vadd.f32 %v5168_v54, %v2010_v47  ;;  %v4060_v47 = vld [vmem:[%s6388_s0 + $0x3ac] sm:$0xf] }
 0x261   :  { %1366 = vmatmul.bf16.gmra.mxu1 %v5566_v30  ;;  %1535 = vmatmul.bf16.gmra.mxu2 %v5568_v42 }
 0x262   :  { %v2156_v22 = vmax.f32 %v2011_v31, 0.0  ;;  %1704 = vmatmul.bf16.gmra.mxu3 %v5571_v1  ;;  %3918 = vmatmul.msk.f32.gmra.mxu0 %vm1731_vm0, %v1663_v45  ;;  %v4059_v31 = vld [vmem:[%s6388_s0 + $0x3a4] sm:$0xf]  ;;  %v5610_v1 = vpop.xlane.xlu2 %2273 }
 0x264   :  { %v1496_v61 = vpop.f32.mrf.mxu2  ;;  %v2224_v15 = vmul.f32 %v5174_v5, %v2156_v22  ;;  %v3715_v22 = vld [vmem:[%s6388_s0 + $0x3b8] sm:$0xf0] }
 0x265   :  { %v1497_v63 = vadd.f32 %v1496_v61, %v1328_v57  ;;  %v1665_v34 = vpop.f32.mrf.mxu3 }
 0x266   :  { %v1329_v13 = vpop.f32.mrf.mxu1  ;;  %v2335_v44 = vsel %vm2265_vm1, %v2224_v15, 0.0 }
 0x267   :  { %v1666_v33 = vadd.f32 %v1665_v34, %v1497_v63  ;;  %v2013_v26 = vpop.f32.mrf.mxu0  ;;  %2336 = vadd.xlane.f32.xlu2 %v2335_v44  ;;  %v1330_v45 = vadd.f32 %v1329_v13, %v4758_v7  ;;  %v5603_v34 = vor.u32 %v4059_v31, %v3707_v16  ;;  %v5605_v44 = vor.u32 %v4062_v59, %v3713_v19 }
 0x268   :  { %v2014_v53 = vadd.f32 %v5168_v54, %v2013_v26  ;;  %v5608_v13 = vor.u32 %v4060_v47, %v3715_v22 }
 0x269   :  { %6609 = vst [vmem:[#allocation108_spill] sm:$0xff] %v5603_v34 }
 0x26a   :  { %v2157_v49 = vmax.f32 %v2014_v53, 0.0  ;;  %3919 = vmatmul.msk.f32.gmra.mxu0 %vm1731_vm0, %v1666_v33  ;;  %6610 = vst [vmem:[#allocation109_spill] sm:$0xff] %v5605_v44 }
 0x26b   :  { %6611 = vst [vmem:[#allocation110_spill] sm:$0xff] %v5608_v13 }
 0x26c   :  { %v1498_v57 = vpop.f32.mrf.mxu2  ;;  %v2225_v61 = vmul.f32 %v5174_v5, %v2157_v49 }
 0x26d   :  { %v1499_v15 = vadd.f32 %v1498_v57, %v1330_v45  ;;  %v1667_v63 = vpop.f32.mrf.mxu3 }
 0x26e   :  { %v1332_v33 = vpop.f32.mrf.mxu1  ;;  %v2338_v7 = vsel %vm2265_vm1, %v2225_v61, 0.0 }
 0x26f   :  { %v1668_v26 = vadd.f32 %v1667_v63, %v1499_v15  ;;  %v2016_v53 = vpop.f32.mrf.mxu0  ;;  %2339 = vadd.xlane.f32.xlu2 %v2338_v7  ;;  %v1333_v16 = vadd.f32 %v1332_v33, %v4776_v37  ;;  %v5620_v15 = vpop.xlane.xlu2 %2288  ;;  %v4063_v63 = vld [vmem:[%s6388_s0 + $0x3c4] sm:$0xf]  ;;  %v3723_v37 = vld [vmem:[%s6388_s0 + $0x3d0] sm:$0xf0]  ;;  %v3729_v7 = vld [vmem:[%s6388_s0 + $0x3c8] sm:$0xf] }
 0x270   :  { %v2017_v30 = vadd.f32 %v5168_v54, %v2016_v53 }
 0x271   :  { %1371 = vmatmul.bf16.gmra.mxu1 %v5603_v34  ;;  %1540 = vmatmul.bf16.gmra.mxu2 %v5605_v44 }
 0x272   :  { %v2158_v31 = vmax.f32 %v2017_v30, 0.0  ;;  %1709 = vmatmul.bf16.gmra.mxu3 %v5608_v13  ;;  %3920 = vmatmul.msk.f32.gmra.mxu0 %vm1731_vm0, %v1668_v26  ;;  %v4066_v26 = vld [vmem:[%s6388_s0 + $0x3d4] sm:$0xf0] }
 0x274   :  { %v1501_v49 = vpop.f32.mrf.mxu2  ;;  %v2226_v19 = vmul.f32 %v5174_v5, %v2158_v31  ;;  %v4064_v31 = vld [vmem:[%s6388_s0 + $0x3cc] sm:$0xf] }
 0x275   :  { %v1502_v59 = vadd.f32 %v1501_v49, %v1333_v16  ;;  %v1670_v45 = vpop.f32.mrf.mxu3  ;;  %v3731_v16 = vld [vmem:[%s6388_s0 + $0x3d8] sm:$0xf0] }
 0x276   :  { %v1334_v47 = vpop.f32.mrf.mxu1  ;;  %v2341_v22 = vsel %vm2265_vm1, %v2226_v19, 0.0 }
 0x277   :  { %v1671_v57 = vadd.f32 %v1670_v45, %v1502_v59  ;;  %v2019_v61 = vpop.f32.mrf.mxu0  ;;  %2342 = vadd.xlane.f32.xlu0 %v2341_v22  ;;  %v1335_v53 = vadd.f32 %v1334_v47, %v4800_v38  ;;  %v5644_v22 = vor.u32 %v4063_v63, %v3723_v37  ;;  %v5649_v47 = vor.u32 %v4064_v31, %v3731_v16  ;;  %v5656_v63 = vpop.xlane.xlu2 %2291 }
 0x278   :  { %v2020_v30 = vadd.f32 %v5168_v54, %v2019_v61  ;;  %v5662_v16 = vpop.xlane.xlu0 %2276 }
 0x279   :  { %6612 = vst [vmem:[#allocation111_spill] sm:$0xff] %v5644_v22 }
 0x27a   :  { %v2159_v33 = vmax.f32 %v2020_v30, 0.0  ;;  %3921 = vmatmul.msk.f32.gmra.mxu0 %vm1731_vm0, %v1671_v57  ;;  %v5646_v57 = vor.u32 %v4066_v26, %v3729_v7  ;;  %6614 = vst [vmem:[#allocation113_spill] sm:$0xff] %v5649_v47 }
 0x27c   :  { %v1503_v49 = vpop.f32.mrf.mxu2  ;;  %v2227_v19 = vmul.f32 %v5174_v5, %v2159_v33  ;;  %6613 = vst [vmem:[#allocation112_spill] sm:$0xff] %v5646_v57  ;;  %v5654_v33 = vpop.xlane.xlu1 %2282 }
 0x27d   :  { %v1504_v59 = vadd.f32 %v1503_v49, %v1335_v53  ;;  %v1672_v45 = vpop.f32.mrf.mxu3 }
 0x27e   :  { %v1337_v61 = vpop.f32.mrf.mxu1  ;;  %v2344_v38 = vsel %vm2265_vm1, %v2227_v19, 0.0 }
 0x27f   :  { %v1673_v30 = vadd.f32 %v1672_v45, %v1504_v59  ;;  %v2022_v13 = vpop.f32.mrf.mxu0  ;;  %2345 = vadd.xlane.f32.xlu0 %v2344_v38  ;;  %v1338_v7 = vadd.f32 %v1337_v61, %v4815_v23  ;;  %v4067_v38 = vld [vmem:[%s6388_s0 + $0x3e4] sm:$0xf]  ;;  %v3739_v23 = vld [vmem:[%s6388_s0 + $0x3f0] sm:$0xf0] }
 0x280   :  { %v2023_v34 = vadd.f32 %v5168_v54, %v2022_v13  ;;  %v5696_v42 = vpop.xlane.xlu0 %2279 }
 0x281   :  { %1376 = vmatmul.bf16.gmra.mxu1 %v5644_v22  ;;  %1545 = vmatmul.bf16.gmra.mxu2 %v5646_v57 }
 0x282   :  { %v2160_v37 = vmax.f32 %v2023_v34, 0.0  ;;  %1714 = vmatmul.bf16.gmra.mxu3 %v5649_v47  ;;  %3922 = vmatmul.msk.f32.gmra.mxu0 %vm1731_vm0, %v1673_v30 }
 0x284   :  { %v1506_v26 = vpop.f32.mrf.mxu2  ;;  %v2228_v53 = vmul.f32 %v5174_v5, %v2160_v37  ;;  %v3745_v37 = vld [vmem:[%s6388_s0 + $0x3e8] sm:$0xf] }
 0x285   :  { %v1507_v31 = vadd.f32 %v1506_v26, %v1338_v7  ;;  %v1675_v13 = vpop.f32.mrf.mxu3  ;;  %v4068_v26 = vld [vmem:[%s6388_s0 + $0x3ec] sm:$0xf] }
 0x286   :  { %v1339_v49 = vpop.f32.mrf.mxu1  ;;  %v2347_v19 = vsel %vm2265_vm1, %v2228_v53, 0.0  ;;  %v3747_v53 = vld [vmem:[%s6388_s0 + $0x3f8] sm:$0xf0] }
 0x287   :  { %v1676_v59 = vadd.f32 %v1675_v13, %v1507_v31  ;;  %v2025_v45 = vpop.f32.mrf.mxu0  ;;  %2348 = vadd.xlane.f32.xlu1 %v2347_v19  ;;  %v1340_v7 = vadd.f32 %v1339_v49, %v4845_v43  ;;  %v5686_v31 = vpop.xlane.xlu1 %2285  ;;  %v5694_v22 = vor.u32 %v4068_v26, %v3747_v53  ;;  %v5712_v26 = vld [vmem:[%s6391_s4] ss:$0 sm:$0xff] }
 0x288   :  { %v2026_v34 = vadd.f32 %v5168_v54, %v2025_v45  ;;  %v4070_v54 = vld [vmem:[%s6388_s0 + $0x3f4] sm:$0xf0] }
 0x289   :  { %v5691_v47 = vor.u32 %v4070_v54, %v3745_v37  ;;  %6617 = vst [vmem:[#allocation116_spill] sm:$0xff] %v5694_v22 }
 0x28a   :  { %v2161_v61 = vmax.f32 %v2026_v34, 0.0  ;;  %3923 = vmatmul.msk.f32.gmra.mxu0 %vm1731_vm0, %v1676_v59  ;;  %v2307_v30 = vpop.xlane.xlu2 %2306  ;;  %v5689_v34 = vor.u32 %v4067_v38, %v3739_v23 }
 0x28b   :  { %6616 = vst [vmem:[#allocation115_spill] sm:$0xff] %v5691_v47 }
 0x28c   :  { %v1508_v13 = vpop.f32.mrf.mxu2  ;;  %v2229_v19 = vmul.f32 %v5174_v5, %v2161_v61  ;;  %6615 = vst [vmem:[#allocation114_spill] sm:$0xff] %v5689_v34  ;;  %v5701_v5 = vld [vmem:[%s6390_s3] ss:$0 sm:$0xff] }
 0x28d   :  { %v1509_v59 = vadd.f32 %v1508_v13, %v1340_v7  ;;  %v1677_v45 = vpop.f32.mrf.mxu3 }
 0x28e   :  { %v1342_v43 = vpop.f32.mrf.mxu1  ;;  %v2350_v49 = vsel %vm2265_vm1, %v2229_v19, 0.0 }
 0x28f   :  { %v1678_v57 = vadd.f32 %v1677_v45, %v1509_v59  ;;  %v2028_v44 = vpop.f32.mrf.mxu0  ;;  %2351 = vadd.xlane.f32.xlu0 %v2350_v49  ;;  %v1343_v37 = vadd.f32 %v1342_v43, %v4860_v9  ;;  %v2301_v54 = vpop.xlane.xlu1 %2300 }
 0x290   :  { %v2029_v38 = vadd.f32 %v5701_v5, %v2028_v44 }
 0x291   :  { %1381 = vmatmul.bf16.gmra.mxu1 %v5689_v34  ;;  %1550 = vmatmul.bf16.gmra.mxu2 %v5691_v47 }
 0x292   :  { %v2162_v23 = vmax.f32 %v2029_v38, 0.0  ;;  %1719 = vmatmul.bf16.gmra.mxu3 %v5694_v22  ;;  %3924 = vmatmul.msk.f32.gmra.mxu0 %vm1731_vm0, %v1678_v57  ;;  %v2310_v61 = vpop.xlane.xlu2 %2309  ;;  %v2295_v57 = vpop.xlane.xlu0 %2294 }
 0x294   :  { %v1511_v7 = vpop.f32.mrf.mxu2  ;;  %v2230_v44 = vmul.f32 %v5712_v26, %v2162_v23 }
 0x295   :  { %v1512_v53 = vadd.f32 %v1511_v7, %v1343_v37  ;;  %v1680_v13 = vpop.f32.mrf.mxu3 }
 0x296   :  { %v1344_v19 = vpop.f32.mrf.mxu1  ;;  %v2353_v59 = vsel %vm2265_vm1, %v2230_v44, 0.0 }
 0x297   :  { %v1681_v45 = vadd.f32 %v1680_v13, %v1512_v53  ;;  %v2031_v49 = vpop.f32.mrf.mxu0  ;;  %2354 = vadd.xlane.f32.xlu1 %v2353_v59  ;;  %v1345_v22 = vadd.f32 %v1344_v19, %v4884_v32  ;;  %v2304_v44 = vpop.xlane.xlu1 %2303 }
 0x298   :  { %v2032_v9 = vadd.f32 %v5701_v5, %v2031_v49  ;;  %v2464_v59 = vpack.c.bf16 %v2307_v30, %v2304_v44 }
 0x29a   :  { %v2163_v43 = vmax.f32 %v2032_v9, 0.0  ;;  %3925 = vmatmul.msk.f32.gmra.mxu0 %vm1731_vm0, %v1681_v45  ;;  %v2313_v38 = vpop.xlane.xlu2 %2312  ;;  %v2298_v9 = vpop.xlane.xlu0 %2297 }
 0x29b   :  { %v2465_v34 = vpack.c.bf16 %v2313_v38, %v2310_v61  ;;  %v2463_v61 = vpack.c.bf16 %v2301_v54, %v2298_v9 }
 0x29c   :  { %v1513_v47 = vpop.f32.mrf.mxu2  ;;  %v2231_v23 = vmul.f32 %v5712_v26, %v2163_v43 }
 0x29d   :  { %v1514_v37 = vadd.f32 %v1513_v47, %v1345_v22  ;;  %v1682_v7 = vpop.f32.mrf.mxu3  ;;  %2494 = vmatpush.bf16.msra.mxu1 %v2465_v34 }
 0x29e   :  { %v1347_v53 = vpop.f32.mrf.mxu1  ;;  %v2356_v13 = vsel %vm2265_vm1, %v2231_v23, 0.0  ;;  %v2462_v23 = vpack.c.bf16 %v2295_v57, %v5656_v63  ;;  %v2460_v63 = vpack.c.bf16 %v5654_v33, %v5696_v42 }
 0x29f   :  { %v1683_v46 = vadd.f32 %v1682_v7, %v1514_v37  ;;  %v2034_v49 = vpop.f32.mrf.mxu0  ;;  %2357 = vadd.xlane.f32.xlu0 %v2356_v13  ;;  %v1348_v22 = vadd.f32 %v1347_v53, %v4538_v17  ;;  %v2461_v17 = vpack.c.bf16 %v5620_v15, %v5686_v31 }
 0x2a0   :  { %v2035_v45 = vadd.f32 %v5701_v5, %v2034_v49  ;;  %v2459_v49 = vpack.c.bf16 %v5662_v16, %v5610_v1 }
 0x2a1   :  { %2495 = vmatpush.bf16.msra.mxu1 %v2464_v59 }
 0x2a2   :  { %v2164_v32 = vmax.f32 %v2035_v45, 0.0  ;;  %3926 = vmatmul.msk.f32.gmra.mxu0 %vm1731_vm0, %v1683_v46 }
 0x2a4   :  { %v1516_v47 = vpop.f32.mrf.mxu2  ;;  %v2232_v34 = vmul.f32 %v5712_v26, %v2164_v32 }
 0x2a5   :  { %v1517_v19 = vadd.f32 %v1516_v47, %v1348_v22  ;;  %v1685_v43 = vpop.f32.mrf.mxu3  ;;  %2496 = vmatpush.bf16.msra.mxu1 %v2463_v61 }
 0x2a6   :  { %v1349_v30 = vpop.f32.mrf.mxu1  ;;  %v2359_v38 = vsel %vm2265_vm1, %v2232_v34, 0.0 }
 0x2a7   :  { %v1686_v37 = vadd.f32 %v1685_v43, %v1517_v19  ;;  %v5727_v7 = vpop.f32.mrf.mxu0  ;;  %2360 = vadd.xlane.f32.xlu0 %v2359_v38  ;;  %v1350_v46 = vadd.f32 %v1349_v30, %v4570_v36 }
 0x2a9   :  { %2497 = vmatpush.bf16.msra.mxu1 %v2462_v23 }
 0x2aa   :  { %3927 = vmatmul.msk.f32.gmra.mxu0 %vm1731_vm0, %v1686_v37 }
 0x2ac   :  { %v1518_v54 = vpop.f32.mrf.mxu2 }
 0x2ad   :  { %v1519_v44 = vadd.f32 %v1518_v54, %v1350_v46  ;;  %v1687_v53 = vpop.f32.mrf.mxu3  ;;  %2498 = vmatpush.bf16.msra.mxu1 %v2461_v17 }
 0x2ae   :  { %v1352_v13 = vpop.f32.mrf.mxu1 }
 0x2af   :  { %v1688_v57 = vadd.f32 %v1687_v53, %v1519_v44  ;;  %v5735_v59 = vpop.f32.mrf.mxu0  ;;  %v1353_v15 = vadd.f32 %v1352_v13, %v4586_v48 }
 0x2b1   :  { %2499 = vmatpush.bf16.msra.mxu1 %v2460_v63 }
 0x2b2   :  { %3928 = vmatmul.msk.f32.gmra.mxu0 %vm1731_vm0, %v1688_v57 }
 0x2b4   :  { %v1521_v36 = vpop.f32.mrf.mxu2 }
 0x2b5   :  { %v1522_v31 = vadd.f32 %v1521_v36, %v1353_v15  ;;  %v1690_v45 = vpop.f32.mrf.mxu3  ;;  %2500 = vmatpush.bf16.msra.mxu1 %v2459_v49 }
 0x2b6   :  { %v1354_v9 = vpop.f32.mrf.mxu1 }
 0x2b7   :  { %v1691_v32 = vadd.f32 %v1690_v45, %v1522_v31  ;;  %v2043_v61 = vpop.f32.mrf.mxu0  ;;  %v1355_v22 = vadd.f32 %v1354_v9, %v4618_v3 }
 0x2b8   :  { %v2044_v42 = vadd.f32 %v5701_v5, %v2043_v61 }
 0x2ba   :  { %v2167_v33 = vmax.f32 %v2044_v42, 0.0  ;;  %3929 = vmatmul.msk.f32.gmra.mxu0 %vm1731_vm0, %v1691_v32 }
 0x2bc   :  { %v1523_v47 = vpop.f32.mrf.mxu2  ;;  %v2235_v34 = vmul.f32 %v5712_v26, %v2167_v33 }
 0x2bd   :  { %v1524_v1 = vadd.f32 %v1523_v47, %v1355_v22  ;;  %v1692_v16 = vpop.f32.mrf.mxu3 }
 0x2be   :  { %v1357_v48 = vpop.f32.mrf.mxu1  ;;  %v2368_v19 = vsel %vm2265_vm1, %v2235_v34, 0.0 }
 0x2bf   :  { %v1693_v43 = vadd.f32 %v1692_v16, %v1524_v1  ;;  %v2046_v30 = vpop.f32.mrf.mxu0  ;;  %2369 = vadd.xlane.f32.xlu1 %v2368_v19  ;;  %v1358_v37 = vadd.f32 %v1357_v48, %v4634_v27 }
 0x2c0   :  { %v2047_v38 = vadd.f32 %v5701_v5, %v2046_v30 }
 0x2c2   :  { %v2168_v23 = vmax.f32 %v2047_v38, 0.0  ;;  %3930 = vmatmul.msk.f32.gmra.mxu0 %vm1731_vm0, %v1693_v43 }
 0x2c4   :  { %v1526_v17 = vpop.f32.mrf.mxu2  ;;  %v2236_v3 = vmul.f32 %v5712_v26, %v2168_v23 }
 0x2c5   :  { %v1527_v46 = vadd.f32 %v1526_v17, %v1358_v37  ;;  %v1695_v54 = vpop.f32.mrf.mxu3 }
 0x2c6   :  { %v1359_v44 = vpop.f32.mrf.mxu1  ;;  %v2371_v53 = vsel %vm2265_vm1, %v2236_v3, 0.0 }
 0x2c7   :  { %v1696_v13 = vadd.f32 %v1695_v54, %v1527_v46  ;;  %v2049_v63 = vpop.f32.mrf.mxu0  ;;  %2372 = vadd.xlane.f32.xlu2 %v2371_v53  ;;  %v1360_v15 = vadd.f32 %v1359_v44, %v4666_v60 }
 0x2c8   :  { %v2050_v57 = vadd.f32 %v5701_v5, %v2049_v63 }
 0x2ca   :  { %v2169_v49 = vmax.f32 %v2050_v57, 0.0  ;;  %3931 = vmatmul.msk.f32.gmra.mxu0 %vm1731_vm0, %v1696_v13 }
 0x2cc   :  { %v1528_v36 = vpop.f32.mrf.mxu2  ;;  %v2237_v27 = vmul.f32 %v5712_v26, %v2169_v49 }
 0x2cd   :  { %v1529_v31 = vadd.f32 %v1528_v36, %v1360_v15  ;;  %v1697_v45 = vpop.f32.mrf.mxu3 }
 0x2ce   :  { %v1362_v9 = vpop.f32.mrf.mxu1  ;;  %v2374_v32 = vsel %vm2265_vm1, %v2237_v27, 0.0 }
 0x2cf   :  { %v1698_v61 = vadd.f32 %v1697_v45, %v1529_v31  ;;  %v2052_v42 = vpop.f32.mrf.mxu0  ;;  %2375 = vadd.xlane.f32.xlu2 %v2374_v32  ;;  %v1363_v47 = vadd.f32 %v1362_v9, %v4682_v62  ;;  %v5770_v31 = vpop.xlane.xlu0 %2324 }
 0x2d0   :  { %v2053_v33 = vadd.f32 %v5701_v5, %v2052_v42 }
 0x2d2   :  { %v2170_v22 = vmax.f32 %v2053_v33, 0.0  ;;  %3932 = vmatmul.msk.f32.gmra.mxu0 %vm1731_vm0, %v1698_v61 }
 0x2d4   :  { %v1531_v34 = vpop.f32.mrf.mxu2  ;;  %v2238_v60 = vmul.f32 %v5712_v26, %v2170_v22 }
 0x2d5   :  { %v1532_v1 = vadd.f32 %v1531_v34, %v1363_v47  ;;  %v1700_v16 = vpop.f32.mrf.mxu3 }
 0x2d6   :  { %v1364_v48 = vpop.f32.mrf.mxu1  ;;  %v2377_v19 = vsel %vm2265_vm1, %v2238_v60, 0.0 }
 0x2d7   :  { %v1701_v43 = vadd.f32 %v1700_v16, %v1532_v1  ;;  %v2055_v30 = vpop.f32.mrf.mxu0  ;;  %2378 = vadd.xlane.f32.xlu0 %v2377_v19  ;;  %v1365_v37 = vadd.f32 %v1364_v48, %v4714_v8 }
 0x2d8   :  { %v2056_v38 = vadd.f32 %v5701_v5, %v2055_v30 }
 0x2da   :  { %v2171_v23 = vmax.f32 %v2056_v38, 0.0  ;;  %3933 = vmatmul.msk.f32.gmra.mxu0 %vm1731_vm0, %v1701_v43  ;;  %v5778_v43 = vpop.xlane.xlu0 %2327 }
 0x2dc   :  { %v1533_v17 = vpop.f32.mrf.mxu2  ;;  %v2239_v62 = vmul.f32 %v5712_v26, %v2171_v23 }
 0x2dd   :  { %v1534_v3 = vadd.f32 %v1533_v17, %v1365_v37  ;;  %v1702_v46 = vpop.f32.mrf.mxu3 }
 0x2de   :  { %v1367_v54 = vpop.f32.mrf.mxu1  ;;  %v2380_v44 = vsel %vm2265_vm1, %v2239_v62, 0.0 }
 0x2df   :  { %v1703_v53 = vadd.f32 %v1702_v46, %v1534_v3  ;;  %v2058_v13 = vpop.f32.mrf.mxu0  ;;  %2381 = vadd.xlane.f32.xlu0 %v2380_v44  ;;  %v1368_v49 = vadd.f32 %v1367_v54, %v4730_v25 }
 0x2e0   :  { %v2059_v63 = vadd.f32 %v5701_v5, %v2058_v13 }
 0x2e2   :  { %v2172_v57 = vmax.f32 %v2059_v63, 0.0  ;;  %3934 = vmatmul.msk.f32.gmra.mxu0 %vm1731_vm0, %v1703_v53  ;;  %v5788_v63 = vpop.xlane.xlu1 %2315 }
 0x2e4   :  { %v1536_v15 = vpop.f32.mrf.mxu2  ;;  %v2240_v8 = vmul.f32 %v5712_v26, %v2172_v57 }
 0x2e5   :  { %v1537_v36 = vadd.f32 %v1536_v15, %v1368_v49  ;;  %v1705_v27 = vpop.f32.mrf.mxu3 }
 0x2e6   :  { %v1369_v45 = vpop.f32.mrf.mxu1  ;;  %v2383_v9 = vsel %vm2265_vm1, %v2240_v8, 0.0 }
 0x2e7   :  { %v1706_v32 = vadd.f32 %v1705_v27, %v1537_v36  ;;  %v2061_v61 = vpop.f32.mrf.mxu0  ;;  %2384 = vadd.xlane.f32.xlu1 %v2383_v9  ;;  %v1370_v25 = vadd.f32 %v1369_v45, %v4762_v41 }
 0x2e8   :  { %v2062_v42 = vadd.f32 %v5701_v5, %v2061_v61 }
 0x2ea   :  { %v2173_v33 = vmax.f32 %v2062_v42, 0.0  ;;  %3935 = vmatmul.msk.f32.gmra.mxu0 %vm1731_vm0, %v1706_v32  ;;  %v5785_v53 = vpop.xlane.xlu0 %2342  ;;  %v5795_v42 = vpop.xlane.xlu1 %2330 }
 0x2ec   :  { %v1538_v22 = vpop.f32.mrf.mxu2  ;;  %v2241_v47 = vmul.f32 %v5712_v26, %v2173_v33 }
 0x2ed   :  { %v1539_v34 = vadd.f32 %v1538_v22, %v1370_v25  ;;  %v1707_v60 = vpop.f32.mrf.mxu3 }
 0x2ee   :  { %v1372_v1 = vpop.f32.mrf.mxu1  ;;  %v2386_v16 = vsel %vm2265_vm1, %v2241_v47, 0.0 }
 0x2ef   :  { %v1708_v48 = vadd.f32 %v1707_v60, %v1539_v34  ;;  %v2064_v19 = vpop.f32.mrf.mxu0  ;;  %2387 = vadd.xlane.f32.xlu1 %v2386_v16  ;;  %v1373_v41 = vadd.f32 %v1372_v1, %v4778_v58 }
 0x2f0   :  { %v2065_v30 = vadd.f32 %v5701_v5, %v2064_v19 }
 0x2f2   :  { %v2174_v38 = vmax.f32 %v2065_v30, 0.0  ;;  %3936 = vmatmul.msk.f32.gmra.mxu0 %vm1731_vm0, %v1708_v48  ;;  %v5797_v33 = vpop.xlane.xlu0 %2345 }
 0x2f4   :  { %v1541_v23 = vpop.f32.mrf.mxu2  ;;  %v2242_v37 = vmul.f32 %v5712_v26, %v2174_v38 }
 0x2f5   :  { %v1542_v17 = vadd.f32 %v1541_v23, %v1373_v41  ;;  %v1710_v62 = vpop.f32.mrf.mxu3 }
 0x2f6   :  { %v1374_v3 = vpop.f32.mrf.mxu1  ;;  %v2389_v46 = vsel %vm2265_vm1, %v2242_v37, 0.0  ;;  %v6619_v37 = vld [vmem:[#allocation57_spill] sm:$0xff] }
 0x2f7   :  { %v1711_v54 = vadd.f32 %v1710_v62, %v1542_v17  ;;  %v2067_v44 = vpop.f32.mrf.mxu0  ;;  %2390 = vadd.xlane.f32.xlu2 %v2389_v46  ;;  %v1375_v58 = vadd.f32 %v1374_v3, %v4802_v0  ;;  %v6618_v0 = vld [vmem:[#allocation56_spill] sm:$0xff]  ;;  %v2334_v62 = vpop.xlane.xlu1 %2333 }
 0x2f8   :  { %v2068_v13 = vadd.f32 %v5701_v5, %v2067_v44 }
 0x2fa   :  { %v2175_v57 = vmax.f32 %v2068_v13, 0.0  ;;  %3937 = vmatmul.msk.f32.gmra.mxu0 %vm1731_vm0, %v1711_v54 }
 0x2fc   :  { %v1543_v49 = vpop.f32.mrf.mxu2  ;;  %v2243_v15 = vmul.f32 %v5712_v26, %v2175_v57 }
 0x2fd   :  { %v1544_v8 = vadd.f32 %v1543_v49, %v1375_v58  ;;  %v1712_v36 = vpop.f32.mrf.mxu3 }
 0x2fe   :  { %v1377_v27 = vpop.f32.mrf.mxu1  ;;  %v2392_v45 = vsel %vm2265_vm1, %v2243_v15, 0.0 }
 0x2ff   :  { %v1713_v9 = vadd.f32 %v1712_v36, %v1544_v8  ;;  %v2070_v32 = vpop.f32.mrf.mxu0  ;;  %2393 = vadd.xlane.f32.xlu2 %v2392_v45  ;;  %v1378_v22 = vadd.f32 %v1377_v27, %v6618_v0  ;;  %v2322_v27 = vpop.xlane.xlu2 %2321  ;;  %v6620_v45 = vld [vmem:[#allocation61_spill] sm:$0xff] }
 0x300   :  { %v2071_v61 = vadd.f32 %v5701_v5, %v2070_v32  ;;  %v2349_v32 = vpop.xlane.xlu1 %2348 }
 0x302   :  { %v2176_v25 = vmax.f32 %v2071_v61, 0.0  ;;  %3938 = vmatmul.msk.f32.gmra.mxu0 %vm1731_vm0, %v1713_v9  ;;  %v2352_v41 = vpop.xlane.xlu0 %2351 }
 0x304   :  { %v1546_v47 = vpop.f32.mrf.mxu2  ;;  %v2244_v34 = vmul.f32 %v5712_v26, %v2176_v25 }
 0x305   :  { %v1547_v60 = vadd.f32 %v1546_v47, %v1378_v22  ;;  %v1715_v1 = vpop.f32.mrf.mxu3 }
 0x306   :  { %v1379_v16 = vpop.f32.mrf.mxu1  ;;  %v2395_v48 = vsel %vm2265_vm1, %v2244_v34, 0.0 }
 0x307   :  { %v1716_v19 = vadd.f32 %v1715_v1, %v1547_v60  ;;  %v2073_v30 = vpop.f32.mrf.mxu0  ;;  %2396 = vadd.xlane.f32.xlu0 %v2395_v48  ;;  %v1380_v17 = vadd.f32 %v1379_v16, %v6619_v37 }
 0x308   :  { %v2074_v38 = vadd.f32 %v5701_v5, %v2073_v30  ;;  %v2337_v30 = vpop.xlane.xlu2 %2336 }
 0x30a   :  { %v2177_v23 = vmax.f32 %v2074_v38, 0.0  ;;  %3939 = vmatmul.msk.f32.gmra.mxu0 %vm1731_vm0, %v1716_v19  ;;  %v6621_v38 = vld [vmem:[#allocation62_spill] sm:$0xff] }
 0x30c   :  { %v1548_v3 = vpop.f32.mrf.mxu2  ;;  %v2245_v46 = vmul.f32 %v5712_v26, %v2177_v23 }
 0x30d   :  { %v1549_v54 = vadd.f32 %v1548_v3, %v1380_v17  ;;  %v1717_v44 = vpop.f32.mrf.mxu3  ;;  %v2355_v17 = vpop.xlane.xlu1 %2354 }
 0x30e   :  { %v1382_v13 = vpop.f32.mrf.mxu1  ;;  %v2398_v57 = vsel %vm2265_vm1, %v2245_v46, 0.0 }
 0x30f   :  { %v1718_v58 = vadd.f32 %v1717_v44, %v1549_v54  ;;  %v2076_v49 = vpop.f32.mrf.mxu0  ;;  %2399 = vadd.xlane.f32.xlu2 %v2398_v57  ;;  %v1383_v9 = vadd.f32 %v1382_v13, %v6620_v45  ;;  %v2472_v57 = vpack.c.bf16 %v2355_v17, %v2352_v41 }
 0x310   :  { %v2077_v15 = vadd.f32 %v5701_v5, %v2076_v49 }
 0x312   :  { %v2178_v8 = vmax.f32 %v2077_v15, 0.0  ;;  %3940 = vmatmul.msk.f32.gmra.mxu0 %vm1731_vm0, %v1718_v58  ;;  %v2358_v36 = vpop.xlane.xlu0 %2357 }
 0x314   :  { %v1551_v61 = vpop.f32.mrf.mxu2  ;;  %v2246_v25 = vmul.f32 %v5712_v26, %v2178_v8 }
 0x315   :  { %v1552_v0 = vadd.f32 %v1551_v61, %v1383_v9  ;;  %v1720_v22 = vpop.f32.mrf.mxu3  ;;  %v2340_v9 = vpop.xlane.xlu2 %2339 }
 0x316   :  { %v2401_v47 = vsel %vm2265_vm1, %v2246_v25, 0.0  ;;  %v1384_v1 = vpop.f32.mrf.mxu1  ;;  %v2470_v25 = vpack.c.bf16 %v5785_v53, %v2340_v9 }
 0x317   :  { %v1721_v34 = vadd.f32 %v1720_v22, %v1552_v0  ;;  %v2079_v60 = vpop.f32.mrf.mxu0  ;;  %2402 = vadd.xlane.f32.xlu0 %v2401_v47  ;;  %v1385_v23 = vadd.f32 %v1384_v1, %v6621_v38  ;;  %v2469_v0 = vpack.c.bf16 %v2337_v30, %v2334_v62  ;;  %v2468_v22 = vpack.c.bf16 %v5795_v42, %v5778_v43 }
 0x318   :  { %v2080_v16 = vadd.f32 %v5701_v5, %v2079_v60 }
 0x31a   :  { %v2179_v48 = vmax.f32 %v2080_v16, 0.0  ;;  %3941 = vmatmul.msk.f32.gmra.mxu0 %vm1731_vm0, %v1721_v34  ;;  %v2361_v19 = vpop.xlane.xlu0 %2360 }
 0x31b   :  { %v2473_v37 = vpack.c.bf16 %v2361_v19, %v2358_v36  ;;  %v2471_v36 = vpack.c.bf16 %v2349_v32, %v5797_v33  ;;  %v2467_v33 = vpack.c.bf16 %v5770_v31, %v2322_v27 }
 0x31c   :  { %v1553_v3 = vpop.f32.mrf.mxu2  ;;  %v2247_v46 = vmul.f32 %v5712_v26, %v2179_v48 }
 0x31d   :  { %v1554_v54 = vadd.f32 %v1553_v3, %v1385_v23  ;;  %2663 = vmatpush.bf16.msra.mxu2 %v2473_v37  ;;  %v1722_v44 = vpop.f32.mrf.mxu3 }
 0x31e   :  { %v2404_v13 = vsel %vm2265_vm1, %v2247_v46, 0.0 }
 0x31f   :  { %v1723_v58 = vadd.f32 %v1722_v44, %v1554_v54  ;;  %v2082_v49 = vpop.f32.mrf.mxu0  ;;  %2405 = vadd.xlane.f32.xlu1 %v2404_v13 }
 0x320   :  { %v2083_v15 = vadd.f32 %v5701_v5, %v2082_v49 }
 0x321   :  { %2664 = vmatpush.bf16.msra.mxu2 %v2472_v57 }
 0x322   :  { %v2180_v8 = vmax.f32 %v2083_v15, 0.0  ;;  %3942 = vmatmul.msk.f32.gmra.mxu0 %vm1731_vm0, %v1723_v58 }
 0x324   :  { %v2248_v45 = vmul.f32 %v5712_v26, %v2180_v8 }
 0x325   :  { %2665 = vmatpush.bf16.msra.mxu2 %v2471_v36 }
 0x326   :  { %v2407_v61 = vsel %vm2265_vm1, %v2248_v45, 0.0 }
 0x327   :  { %v5824_v41 = vpop.f32.mrf.mxu0  ;;  %2408 = vadd.xlane.f32.xlu1 %v2407_v61 }
 0x329   :  { %2666 = vmatpush.bf16.msra.mxu2 %v2470_v25 }
 0x32d   :  { %2667 = vmatpush.bf16.msra.mxu2 %v2469_v0 }
 0x32f   :  { %v5828_v47 = vpop.f32.mrf.mxu0 }
 0x331   :  { %2668 = vmatpush.bf16.msra.mxu2 %v2468_v22 }
 0x332   :  { %v5849_v49 = vpop.xlane.xlu1 %2369 }
 0x335   :  { %2669 = vmatpush.bf16.msra.mxu2 %v2467_v33 }
 0x337   :  { %v5831_v32 = vpop.f32.mrf.mxu0 }
 0x33a   :  { %v5852_v8 = vpop.xlane.xlu2 %2372 }
 0x33f   :  { %v5833_v34 = vpop.f32.mrf.mxu0 }
 0x347   :  { %v5835_v53 = vpop.f32.mrf.mxu0 }
 0x34a   :  { %v5859_v22 = vpop.xlane.xlu0 %2378 }
 0x34f   :  { %v2100_v60 = vpop.f32.mrf.mxu0 }
 0x357   :  { %v2103_v1 = vpop.f32.mrf.mxu0 }
 0x358   :  { %v2104_v62 = vadd.f32 %v5701_v5, %v2103_v1  ;;  %v5861_v1 = vpop.xlane.xlu2 %2375 }
 0x35a   :  { %v2187_v16 = vmax.f32 %v2104_v62, 0.0  ;;  %v5856_v25 = vpop.xlane.xlu1 %2384 }
 0x35c   :  { %v2255_v48 = vmul.f32 %v5712_v26, %v2187_v16 }
 0x35e   :  { %v2428_v43 = vsel %vm2265_vm1, %v2255_v48, 0.0 }
 0x35f   :  { %v2106_v42 = vpop.f32.mrf.mxu0  ;;  %2429 = vadd.xlane.f32.xlu0 %v2428_v43 }
 0x360   :  { %v2107_v31 = vadd.f32 %v5701_v5, %v2106_v42  ;;  %v2038_v42 = vadd.f32 %v5701_v5, %v5727_v7 }
 0x362   :  { %v2188_v27 = vmax.f32 %v2107_v31, 0.0  ;;  %v5868_v31 = vpop.xlane.xlu1 %2387 }
 0x364   :  { %v2256_v19 = vmul.f32 %v5712_v26, %v2188_v27 }
 0x366   :  { %v2431_v30 = vsel %vm2265_vm1, %v2256_v19, 0.0  ;;  %v5870_v19 = vpop.xlane.xlu0 %2381 }
 0x367   :  { %v2109_v38 = vpop.f32.mrf.mxu0  ;;  %2432 = vadd.xlane.f32.xlu1 %v2431_v30 }
 0x368   :  { %v2110_v23 = vadd.f32 %v5701_v5, %v2109_v38 }
 0x36a   :  { %v2189_v37 = vmax.f32 %v2110_v23, 0.0  ;;  %v2391_v30 = vpop.xlane.xlu2 %2390  ;;  %v2165_v23 = vmax.f32 %v2038_v42, 0.0 }
 0x36c   :  { %v2257_v17 = vmul.f32 %v5712_v26, %v2189_v37  ;;  %v2233_v7 = vmul.f32 %v5712_v26, %v2165_v23 }
 0x36e   :  { %v2434_v3 = vsel %vm2265_vm1, %v2257_v17, 0.0 }
 0x36f   :  { %v2112_v46 = vpop.f32.mrf.mxu0  ;;  %2435 = vadd.xlane.f32.xlu1 %v2434_v3 }
 0x370   :  { %v2113_v54 = vadd.f32 %v5701_v5, %v2112_v46  ;;  %v2101_v46 = vadd.f32 %v5701_v5, %v2100_v60  ;;  %v2041_v60 = vadd.f32 %v5701_v5, %v5735_v59 }
 0x372   :  { %v2190_v44 = vmax.f32 %v2113_v54, 0.0 }
 0x374   :  { %v2258_v13 = vmul.f32 %v5712_v26, %v2190_v44 }
 0x376   :  { %v2437_v57 = vsel %vm2265_vm1, %v2258_v13, 0.0 }
 0x377   :  { %v2115_v58 = vpop.f32.mrf.mxu0  ;;  %2438 = vadd.xlane.f32.xlu2 %v2437_v57 }
 0x378   :  { %v2116_v15 = vadd.f32 %v5701_v5, %v2115_v58  ;;  %v2186_v58 = vmax.f32 %v2101_v46, 0.0  ;;  %v1942_v46 = vadd.f32 %v5701_v5, %v5130_v39 }
 0x37a   :  { %v2191_v36 = vmax.f32 %v2116_v15, 0.0  ;;  %v2397_v13 = vpop.xlane.xlu0 %2396  ;;  %v2394_v15 = vpop.xlane.xlu2 %2393 }
 0x37c   :  { %v2259_v45 = vmul.f32 %v5712_v26, %v2191_v36 }
 0x37e   :  { %v2440_v9 = vsel %vm2265_vm1, %v2259_v45, 0.0  ;;  %v2362_v45 = vsel %vm2265_vm1, %v2233_v7, 0.0 }
 0x37f   :  { %v2118_v61 = vpop.f32.mrf.mxu0  ;;  %2441 = vadd.xlane.f32.xlu2 %v2440_v9 }
 0x380   :  { %v2119_v0 = vadd.f32 %v5701_v5, %v2118_v61 }
 0x382   :  { %v2192_v33 = vmax.f32 %v2119_v0, 0.0  ;;  %v2092_v0 = vadd.f32 %v5701_v5, %v5831_v32  ;;  %v2400_v23 = vpop.xlane.xlu2 %2399 }
 0x384   :  { %v2260_v62 = vmul.f32 %v5712_v26, %v2192_v33 }
 0x386   :  { %v2443_v16 = vsel %vm2265_vm1, %v2260_v62, 0.0 }
 0x387   :  { %v2121_v48 = vpop.f32.mrf.mxu0  ;;  %2444 = vadd.xlane.f32.xlu0 %v2443_v16  ;;  %v2254_v16 = vmul.f32 %v5712_v26, %v2186_v58  ;;  %v1993_v58 = vadd.f32 %v5701_v5, %v5463_v10  ;;  %v2095_v10 = vadd.f32 %v5701_v5, %v5833_v34  ;;  %v2476_v34 = vpack.c.bf16 %v5859_v22, %v5861_v1 }
 0x388   :  { %v2122_v43 = vadd.f32 %v5701_v5, %v2121_v48 }
 0x38a   :  { %v2193_v27 = vmax.f32 %v2122_v43, 0.0  ;;  %v2403_v43 = vpop.xlane.xlu0 %2402 }
 0x38b   :  { %v2480_v59 = vpack.c.bf16 %v2403_v43, %v2400_v23 }
 0x38c   :  { %v2261_v38 = vmul.f32 %v5712_v26, %v2193_v27  ;;  %v2166_v27 = vmax.f32 %v2041_v60, 0.0 }
 0x38e   :  { %v2446_v37 = vsel %vm2265_vm1, %v2261_v38, 0.0  ;;  %v2183_v38 = vmax.f32 %v2092_v0, 0.0  ;;  %v2234_v7 = vmul.f32 %v5712_v26, %v2166_v27  ;;  %v2150_v0 = vmax.f32 %v1993_v58, 0.0 }
 0x38f   :  { %v2124_v17 = vpop.f32.mrf.mxu0  ;;  %2447 = vadd.xlane.f32.xlu0 %v2446_v37 }
 0x390   :  { %v2125_v3 = vadd.f32 %v5701_v5, %v2124_v17  ;;  %v2425_v17 = vsel %vm2265_vm1, %v2254_v16, 0.0  ;;  %v2365_v39 = vsel %vm2265_vm1, %v2234_v7, 0.0  ;;  %v2477_v16 = vpack.c.bf16 %v5856_v25, %v5870_v19 }
 0x391   :  { %v1945_v25 = vadd.f32 %v5701_v5, %v5158_v18  ;;  %v2475_v19 = vpack.c.bf16 %v5852_v8, %v5849_v49 }
 0x392   :  { %v2194_v54 = vmax.f32 %v2125_v3, 0.0  ;;  %v2406_v44 = vpop.xlane.xlu1 %2405 }
 0x393   :  { %v2134_v22 = vmax.f32 %v1945_v25, 0.0 }
 0x394   :  { %v2262_v57 = vmul.f32 %v5712_v26, %v2194_v54  ;;  %v2089_v54 = vadd.f32 %v5701_v5, %v5828_v47 }
 0x396   :  { %v2449_v36 = vsel %vm2265_vm1, %v2262_v57, 0.0  ;;  %v2251_v57 = vmul.f32 %v5712_v26, %v2183_v38 }
 0x397   :  { %v2127_v9 = vpop.f32.mrf.mxu0  ;;  %2450 = vadd.xlane.f32.xlu1 %v2449_v36  ;;  %2363 = vadd.xlane.f32.xlu0 %v2362_v45  ;;  %v2479_v36 = vpack.c.bf16 %v2397_v13, %v2394_v15 }
 0x398   :  { %v2128_v61 = vadd.f32 %v5701_v5, %v2127_v9  ;;  %v2133_v9 = vmax.f32 %v1942_v46, 0.0  ;;  %v2416_v60 = vsel %vm2265_vm1, %v2251_v57, 0.0 }
 0x39a   :  { %v2195_v33 = vmax.f32 %v2128_v61, 0.0  ;;  %v2409_v62 = vpop.xlane.xlu1 %2408  ;;  %v2182_v61 = vmax.f32 %v2089_v54, 0.0  ;;  %v2201_v15 = vmul.f32 %v5712_v26, %v2133_v9 }
 0x39b   :  { %v2481_v48 = vpack.c.bf16 %v2409_v62, %v2406_v44  ;;  %v2098_v62 = vadd.f32 %v5701_v5, %v5835_v53 }
 0x39c   :  { %v2263_v42 = vmul.f32 %v5712_v26, %v2195_v33  ;;  %v2478_v33 = vpack.c.bf16 %v2391_v30, %v5868_v31  ;;  %v2250_v13 = vmul.f32 %v5712_v26, %v2182_v61  ;;  %v2184_v31 = vmax.f32 %v2095_v10, 0.0 }
 0x39d   :  { %2832 = vmatpush.bf16.msra.mxu3 %v2481_v48  ;;  %v2218_v48 = vmul.f32 %v5712_v26, %v2150_v0  ;;  %v2266_v43 = vsel %vm2265_vm1, %v2201_v15, 0.0  ;;  %v6623_v15 = vld [vmem:[#allocation30_spill] sm:$0xff] }
 0x39e   :  { %v2452_v37 = vsel %vm2265_vm1, %v2263_v42, 0.0  ;;  %v2413_v30 = vsel %vm2265_vm1, %v2250_v13, 0.0  ;;  %v2185_v42 = vmax.f32 %v2098_v62, 0.0  ;;  %v2252_v53 = vmul.f32 %v5712_v26, %v2184_v31  ;;  %v6624_v31 = vld [vmem:[#allocation35_spill] sm:$0xff] }
 0x39f   :  { %v2130_v3 = vpop.f32.mrf.mxu0  ;;  %2453 = vadd.xlane.f32.xlu1 %v2452_v37  ;;  %2426 = vadd.xlane.f32.xlu0 %v2425_v17  ;;  %v2317_v27 = vsel %vm2265_vm1, %v2218_v48, 0.0  ;;  %v2086_v37 = vadd.f32 %v5701_v5, %v5824_v41  ;;  %v2202_v17 = vmul.f32 %v5712_v26, %v2134_v22  ;;  %v6628_v22 = vld [vmem:[#allocation32_spill] sm:$0xff] }
 0x3a0   :  { %v2131_v32 = vadd.f32 %v5701_v5, %v2130_v3  ;;  %v2253_v38 = vmul.f32 %v5712_v26, %v2185_v42  ;;  %v2419_v23 = vsel %vm2265_vm1, %v2252_v53, 0.0  ;;  %v6626_v53 = vld [vmem:[#allocation34_spill] sm:$0xff] }
 0x3a1   :  { %2833 = vmatpush.bf16.msra.mxu3 %v2480_v59  ;;  %v2181_v59 = vmax.f32 %v2086_v37, 0.0  ;;  %v2269_v18 = vsel %vm2265_vm1, %v2202_v17, 0.0  ;;  %v6630_v37 = vld [vmem:[#allocation38_spill] sm:$0xff]  ;;  %v6631_v17 = vld [vmem:[#allocation43_spill] sm:$0xff] }
 0x3a2   :  { %v2196_v44 = vmax.f32 %v2131_v32, 0.0  ;;  %v2422_v1 = vsel %vm2265_vm1, %v2253_v38, 0.0 }
 0x3a3   :  { %v2249_v49 = vmul.f32 %v5712_v26, %v2181_v59  ;;  %v6632_v59 = vld [vmem:[#allocation36_spill] sm:$0xff] }
 0x3a4   :  { %v2264_v45 = vmul.f32 %v5712_v26, %v2196_v44 }
 0x3a5   :  { %2834 = vmatpush.bf16.msra.mxu3 %v2479_v36  ;;  %v2410_v8 = vsel %vm2265_vm1, %v2249_v49, 0.0  ;;  %v6634_v49 = vld [vmem:[#allocation42_spill] sm:$0xff] }
 0x3a6   :  { %v2455_v47 = vsel %vm2265_vm1, %v2264_v45, 0.0 }
 0x3a7   :  { %2366 = vadd.xlane.f32.xlu1 %v2365_v39  ;;  %2417 = vadd.xlane.f32.xlu0 %v2416_v60  ;;  %v6622_v39 = vld [vmem:[#allocation31_spill] sm:$0xff] }
 0x3a8   :  { %2456 = vadd.xlane.f32.xlu2 %v2455_v47 }
 0x3a9   :  { %2835 = vmatpush.bf16.msra.mxu3 %v2478_v33 }
 0x3ad   :  { %2836 = vmatpush.bf16.msra.mxu3 %v2477_v16 }
 0x3af   :  { %2414 = vadd.xlane.f32.xlu0 %v2413_v30  ;;  %2267 = vadd.xlane.f32.xlu1 %v2266_v43 }
 0x3b0   :  { %2318 = vadd.xlane.f32.xlu2 %v2317_v27  ;;  %v6625_v27 = vld [vmem:[#allocation21_spill] sm:$0xff] }
 0x3b1   :  { %2837 = vmatpush.bf16.msra.mxu3 %v2476_v34 }
 0x3b5   :  { %2838 = vmatpush.bf16.msra.mxu3 %v2475_v19 }
 0x3b7   :  { %2420 = vadd.xlane.f32.xlu1 %v2419_v23  ;;  %v6627_v23 = vld [vmem:[#allocation39_spill] sm:$0xff] }
 0x3b8   :  { %2423 = vadd.xlane.f32.xlu2 %v2422_v1  ;;  %v6629_v1 = vld [vmem:[#allocation25_spill] sm:$0xff] }
 0x3c0   :  { %2270 = vadd.xlane.f32.xlu2 %v2269_v18  ;;  %v6633_v18 = vld [vmem:[#allocation29_spill] sm:$0xff] }
 0x3c8   :  { %2411 = vadd.xlane.f32.xlu2 %v2410_v8  ;;  %v6635_v8 = vld [vmem:[#allocation47_spill] sm:$0xff] }
 0x3d2   :  { %v2430_v32 = vpop.xlane.xlu0 %2429 }
 0x3da   :  { %v2433_v3 = vpop.xlane.xlu1 %2432 }
 0x3db   :  { %v2485_v16 = vpack.c.bf16 %v2433_v3, %v2430_v32  ;;  %v6636_v3 = vld [vmem:[#allocation40_spill] sm:$0xff]  ;;  %v6637_v32 = vld [vmem:[#allocation33_spill] sm:$0xff] }
 0x3e2   :  { %v2436_v46 = vpop.xlane.xlu1 %2435 }
 0x3ea   :  { %v2439_v44 = vpop.xlane.xlu2 %2438 }
 0x3eb   :  { %v2486_v13 = vpack.c.bf16 %v2439_v44, %v2436_v46  ;;  %v6638_v46 = vld [vmem:[#allocation46_spill] sm:$0xff]  ;;  %v6640_v44 = vld [vmem:[#allocation44_spill] sm:$0xff] }
 0x3f2   :  { %v2442_v5 = vpop.xlane.xlu2 %2441 }
 0x3fa   :  { %v2445_v54 = vpop.xlane.xlu0 %2444 }
 0x3fb   :  { %v2487_v47 = vpack.c.bf16 %v2445_v54, %v2442_v5  ;;  %v6639_v54 = vld [vmem:[#allocation51_spill] sm:$0xff]  ;;  %v6644_v5 = vld [vmem:[#allocation48_spill] sm:$0xff] }
 0x402   :  { %v2448_v57 = vpop.xlane.xlu0 %2447 }
 0x40a   :  { %v2451_v7 = vpop.xlane.xlu1 %2450  ;;  %v2364_v41 = vpop.xlane.xlu0 %2363 }
 0x40b   :  { %v2488_v26 = vpack.c.bf16 %v2451_v7, %v2448_v57  ;;  %v6641_v7 = vld [vmem:[#allocation37_spill] sm:$0xff]  ;;  %v6642_v57 = vld [vmem:[#allocation50_spill] sm:$0xff] }
 0x412   :  { %v2454_v58 = vpop.xlane.xlu1 %2453  ;;  %v2427_v33 = vpop.xlane.xlu0 %2426 }
 0x41a   :  { %v2367_v36 = vpop.xlane.xlu1 %2366  ;;  %v2418_v30 = vpop.xlane.xlu0 %2417 }
 0x41b   :  { %v2474_v45 = vpack.c.bf16 %v2367_v36, %v2364_v41  ;;  %v2457_v9 = vpop.xlane.xlu2 %2456  ;;  %v6645_v41 = vld [vmem:[#allocation41_spill] sm:$0xff] }
 0x41c   :  { %v2489_v61 = vpack.c.bf16 %v2457_v9, %v2454_v58  ;;  %v6643_v58 = vld [vmem:[#allocation54_spill] sm:$0xff]  ;;  %v6646_v36 = vld [vmem:[#allocation53_spill] sm:$0xff]  ;;  %v6647_v9 = vld [vmem:[#allocation59_spill] sm:$0xff] }
 0x41d   :  { %2839 = vmatpush.bf16.msra.mxu3 %v2474_v45  ;;  %v11_v45 = vstv %s6392_s5 }
 0x41e   :  { %3001 = vmatpush.bf16.msra.mxu0 %v2489_v61  ;;  %12 = vst [vmem:[#allocation2] sm:$0x1] %v11_v45  ;;  %v6648_v61 = vld [vmem:[#allocation52_spill] sm:$0xff] }
 0x420   :  { %2840 = vmatmul.bf16.vlgmr.msra.gmra.mxu3 %v6622_v39  ;;  %v6650_v39 = vld [vmem:[#allocation58_spill] sm:$0xff] }
 0x422   :  { %3002 = vmatpush.bf16.msra.mxu0 %v2488_v26  ;;  %v2268_v10 = vpop.xlane.xlu1 %2267  ;;  %v2415_v25 = vpop.xlane.xlu0 %2414  ;;  %v6649_v26 = vld [vmem:[#allocation45_spill] sm:$0xff] }
 0x423   :  { %v2319_v60 = vpop.xlane.xlu2 %2318 }
 0x424   :  { %v2466_v0 = vpack.c.bf16 %v2319_v60, %v5788_v63  ;;  %v6651_v60 = vld [vmem:[#allocation64_spill] sm:$0xff] }
 0x426   :  { %2670 = vmatpush.bf16.msra.mxu2 %v2466_v0  ;;  %3003 = vmatpush.bf16.msra.mxu0 %v2487_v47  ;;  %v6652_v47 = vld [vmem:[#allocation55_spill] sm:$0xff] }
 0x429   :  { %2671 = vmatmul.bf16.vlgmr.msra.gmra.mxu2 %v6623_v15 }
 0x42a   :  { %3004 = vmatpush.bf16.msra.mxu0 %v2486_v13  ;;  %v2421_v43 = vpop.xlane.xlu1 %2420 }
 0x42b   :  { %v2424_v62 = vpop.xlane.xlu2 %2423  ;;  %v2483_v34 = vpack.c.bf16 %v2421_v43, %v2418_v30 }
 0x42c   :  { %v2484_v48 = vpack.c.bf16 %v2427_v33, %v2424_v62  ;;  %v6653_v33 = vld [vmem:[#allocation49_spill] sm:$0xff]  ;;  %v6655_v62 = vld [vmem:[#allocation67_spill] sm:$0xff] }
 0x42e   :  { %3005 = vmatpush.bf16.msra.mxu0 %v2485_v16  ;;  %v6656_v16 = vld [vmem:[#allocation60_spill] sm:$0xff] }
 0x430   :  { %2845 = vmatmul.bf16.gmra.mxu3 %v6624_v31 }
 0x432   :  { %3006 = vmatpush.bf16.msra.mxu0 %v2484_v48  ;;  %v5970_v48 = vld [vmem:[#allocation2] ss:$0 sm:$0xff] }
 0x433   :  { %v2271_v42 = vpop.xlane.xlu2 %2270 }
 0x434   :  { %v2458_v63 = vpack.c.bf16 %v2271_v42, %v2268_v10  ;;  %v6654_v10 = vld [vmem:[#allocation63_spill] sm:$0xff] }
 0x436   :  { %2501 = vmatpush.bf16.msra.mxu1 %v2458_v63  ;;  %3007 = vmatpush.bf16.msra.mxu0 %v2483_v34  ;;  %v6657_v63 = vld [vmem:[#allocation3_spill] sm:$0xff] }
 0x439   :  { %2502 = vmatmul.bf16.vlgmr.msra.gmra.mxu1 %v6625_v27  ;;  %2676 = vmatmul.bf16.gmra.mxu2 %v6626_v53  ;;  %v6658_v27 = vld [vmem:[#allocation66_spill] sm:$0xff] }
 0x43b   :  { %v2412_v19 = vpop.xlane.xlu2 %2411 }
 0x43c   :  { %v2482_v38 = vpack.c.bf16 %v2415_v25, %v2412_v19 }
 0x43e   :  { %3008 = vmatpush.bf16.msra.mxu0 %v2482_v38 }
 0x440   :  { %2850 = vmatmul.bf16.gmra.mxu3 %v6627_v23 }
 0x441   :  { %3009 = vmatmul.bf16.vlgmr.msra.gmra.mxu0 %v6628_v22 }
 0x449   :  { %2507 = vmatmul.bf16.gmra.mxu1 %v6629_v1  ;;  %2681 = vmatmul.bf16.gmra.mxu2 %v6630_v37  ;;  %v6659_v37 = vld [vmem:[#allocation70_spill] sm:$0xff] }
 0x450   :  { %2855 = vmatmul.bf16.gmra.mxu3 %v6631_v17  ;;  %v6660_v17 = vld [vmem:[#allocation65_spill] sm:$0xff] }
 0x451   :  { %3014 = vmatmul.bf16.gmra.mxu0 %v6632_v59 }
 0x459   :  { %2512 = vmatmul.bf16.gmra.mxu1 %v6633_v18  ;;  %2686 = vmatmul.bf16.gmra.mxu2 %v6634_v49 }
 0x460   :  { %2860 = vmatmul.bf16.gmra.mxu3 %v6635_v8 }
 0x461   :  { %3019 = vmatmul.bf16.gmra.mxu0 %v6636_v3 }
 0x469   :  { %2517 = vmatmul.bf16.gmra.mxu1 %v6637_v32  ;;  %2691 = vmatmul.bf16.gmra.mxu2 %v6638_v46 }
 0x470   :  { %2865 = vmatmul.bf16.gmra.mxu3 %v6639_v54 }
 0x471   :  { %3024 = vmatmul.bf16.gmra.mxu0 %v6640_v44 }
 0x479   :  { %2522 = vmatmul.bf16.gmra.mxu1 %v6641_v7  ;;  %2696 = vmatmul.bf16.gmra.mxu2 %v6642_v57  ;;  %v6661_v7 = vld [vmem:[#allocation6_spill] sm:$0xff]  ;;  %v6662_v57 = vld [vmem:[#allocation69_spill] sm:$0xff] }
 0x480   :  { %2870 = vmatmul.bf16.gmra.mxu3 %v6643_v58 }
 0x481   :  { %3029 = vmatmul.bf16.gmra.mxu0 %v6644_v5 }
 0x489   :  { %2527 = vmatmul.bf16.gmra.mxu1 %v6645_v41  ;;  %2701 = vmatmul.bf16.gmra.mxu2 %v6646_v36 }
 0x490   :  { %2875 = vmatmul.bf16.gmra.mxu3 %v6647_v9 }
 0x491   :  { %3034 = vmatmul.bf16.gmra.mxu0 %v6648_v61 }
 0x499   :  { %2532 = vmatmul.bf16.gmra.mxu1 %v6649_v26  ;;  %2706 = vmatmul.bf16.gmra.mxu2 %v6650_v39  ;;  %v6663_v26 = vld [vmem:[#allocation73_spill] sm:$0xff]  ;;  %v6664_v39 = vld [vmem:[#allocation68_spill] sm:$0xff] }
 0x4a0   :  { %2880 = vmatmul.bf16.gmra.mxu3 %v6651_v60 }
 0x4a1   :  { %3039 = vmatmul.bf16.gmra.mxu0 %v6652_v47 }
 0x4a3   :  { %v2841_v0 = vpop.f32.mrf.mxu3 }
 0x4a9   :  { %2537 = vmatmul.bf16.gmra.mxu1 %v6653_v33  ;;  %2711 = vmatmul.bf16.gmra.mxu2 %v6654_v10 }
 0x4ab   :  { %v2843_v13 = vpop.f32.mrf.mxu3 }
 0x4ac   :  { %v2672_v15 = vpop.f32.mrf.mxu2 }
 0x4b0   :  { %2885 = vmatmul.bf16.gmra.mxu3 %v6655_v62 }
 0x4b1   :  { %3044 = vmatmul.bf16.gmra.mxu0 %v6656_v16 }
 0x4b3   :  { %v2846_v31 = vpop.f32.mrf.mxu3 }
 0x4b4   :  { %v2674_v30 = vpop.f32.mrf.mxu2 }
 0x4b6   :  { %v2503_v43 = vpop.f32.mrf.mxu1 }
 0x4b7   :  { %v2504_v42 = vadd.f32 %v5970_v48, %v2503_v43 }
 0x4b9   :  { %v2673_v34 = vadd.f32 %v2672_v15, %v2504_v42  ;;  %2542 = vmatmul.bf16.gmra.mxu1 %v6657_v63  ;;  %2716 = vmatmul.bf16.gmra.mxu2 %v6658_v27 }
 0x4bb   :  { %v2842_v53 = vadd.f32 %v2841_v0, %v2673_v34  ;;  %v2848_v25 = vpop.f32.mrf.mxu3 }
 0x4bc   :  { %v2677_v19 = vpop.f32.mrf.mxu2 }
 0x4be   :  { %v3010_v38 = vpop.f32.mrf.mxu0  ;;  %v2505_v23 = vpop.f32.mrf.mxu1 }
 0x4bf   :  { %v3011_v22 = vadd.f32 %v3010_v38, %v2842_v53  ;;  %v2506_v1 = vadd.f32 %v5970_v48, %v2505_v23  ;;  %v6668_v38 = vld [vmem:[#allocation71_spill] sm:$0xff] }
 0x4c0   :  { %2890 = vmatmul.bf16.gmra.mxu3 %v6659_v37 }
 0x4c1   :  { %3171 = vst.msk [vmem:[%s6393_s6] sm:$0xff] %vm3170_vm2, %v3011_v22  ;;  %3049 = vmatmul.bf16.gmra.mxu0 %v6660_v17  ;;  %v2675_v59 = vadd.f32 %v2674_v30, %v2506_v1  ;;  %v6666_v30 = vld [vmem:[#allocation72_spill] sm:$0xff] }
 0x4c3   :  { %v2851_v18 = vpop.f32.mrf.mxu3  ;;  %v2844_v8 = vadd.f32 %v2843_v13, %v2675_v59 }
 0x4c4   :  { %v2679_v49 = vpop.f32.mrf.mxu2 }
 0x4c6   :  { %v3012_v3 = vpop.f32.mrf.mxu0  ;;  %v2508_v32 = vpop.f32.mrf.mxu1 }
 0x4c7   :  { %v3013_v46 = vadd.f32 %v3012_v3, %v2844_v8  ;;  %v2509_v54 = vadd.f32 %v5970_v48, %v2508_v32  ;;  %v6669_v3 = vld [vmem:[#allocation12_spill] sm:$0xff]  ;;  %v6670_v32 = vld [vmem:[#allocation75_spill] sm:$0xff] }
 0x4c9   :  { %3172 = vst.msk [vmem:[%s6393_s6 + $0x8] sm:$0xff] %vm3170_vm2, %v3013_v46  ;;  %v2678_v44 = vadd.f32 %v2677_v19, %v2509_v54  ;;  %2547 = vmatmul.bf16.gmra.mxu1 %v6661_v7  ;;  %2721 = vmatmul.bf16.gmra.mxu2 %v6662_v57  ;;  %v6667_v19 = vld [vmem:[#allocation76_spill] sm:$0xff] }
 0x4cb   :  { %v2847_v58 = vadd.f32 %v2846_v31, %v2678_v44  ;;  %v2853_v5 = vpop.f32.mrf.mxu3  ;;  %v6665_v31 = vld [vmem:[#allocation9_spill] sm:$0xff] }
 0x4cc   :  { %v2682_v41 = vpop.f32.mrf.mxu2 }
 0x4ce   :  { %v3015_v36 = vpop.f32.mrf.mxu0  ;;  %v2510_v45 = vpop.f32.mrf.mxu1 }
 0x4cf   :  { %v3016_v9 = vadd.f32 %v3015_v36, %v2847_v58  ;;  %v2511_v61 = vadd.f32 %v5970_v48, %v2510_v45  ;;  %v6672_v36 = vld [vmem:[#allocation74_spill] sm:$0xff] }
 0x4d0   :  { %2895 = vmatmul.bf16.gmra.mxu3 %v6663_v26 }
 0x4d1   :  { %3173 = vst.msk [vmem:[%s6393_s6 + $0x10] sm:$0xff] %vm3170_vm2, %v3016_v9  ;;  %3054 = vmatmul.bf16.gmra.mxu0 %v6664_v39  ;;  %v2680_v60 = vadd.f32 %v2679_v49, %v2511_v61 }
 0x4d3   :  { %v2856_v47 = vpop.f32.mrf.mxu3  ;;  %v2849_v33 = vadd.f32 %v2848_v25, %v2680_v60 }
 0x4d4   :  { %v2684_v0 = vpop.f32.mrf.mxu2 }
 0x4d6   :  { %v3017_v10 = vpop.f32.mrf.mxu0  ;;  %v2513_v13 = vpop.f32.mrf.mxu1 }
 0x4d7   :  { %v3018_v15 = vadd.f32 %v3017_v10, %v2849_v33  ;;  %v2514_v62 = vadd.f32 %v5970_v48, %v2513_v13  ;;  %v6673_v10 = vld [vmem:[#allocation15_spill] sm:$0xff]  ;;  %v6674_v13 = vld [vmem:[#allocation78_spill] sm:$0xff] }
 0x4d9   :  { %3174 = vst.msk [vmem:[%s6393_s6 + $0x18] sm:$0xff] %vm3170_vm2, %v3018_v15  ;;  %v2683_v16 = vadd.f32 %v2682_v41, %v2514_v62  ;;  %2552 = vmatmul.bf16.gmra.mxu1 %v6665_v31  ;;  %2726 = vmatmul.bf16.gmra.mxu2 %v6666_v30  ;;  %v6671_v41 = vld [vmem:[#allocation79_spill] sm:$0xff] }
 0x4db   :  { %v2852_v43 = vadd.f32 %v2851_v18, %v2683_v16  ;;  %v2858_v42 = vpop.f32.mrf.mxu3 }
 0x4dc   :  { %v2687_v34 = vpop.f32.mrf.mxu2 }
 0x4de   :  { %v3020_v63 = vpop.f32.mrf.mxu0  ;;  %v2515_v27 = vpop.f32.mrf.mxu1 }
 0x4df   :  { %v3021_v53 = vadd.f32 %v3020_v63, %v2852_v43  ;;  %v2516_v25 = vadd.f32 %v5970_v48, %v2515_v27  ;;  %v6676_v63 = vld [vmem:[#allocation77_spill] sm:$0xff] }
 0x4e0   :  { %2900 = vmatmul.bf16.gmra.mxu3 %v6667_v19 }
 0x4e1   :  { %3175 = vst.msk [vmem:[%s6393_s6 + $0x20] sm:$0xff] %vm3170_vm2, %v3021_v53  ;;  %3059 = vmatmul.bf16.gmra.mxu0 %v6668_v38  ;;  %v2685_v23 = vadd.f32 %v2684_v0, %v2516_v25 }
 0x4e3   :  { %v2861_v22 = vpop.f32.mrf.mxu3  ;;  %v2854_v37 = vadd.f32 %v2853_v5, %v2685_v23 }
 0x4e4   :  { %v2689_v1 = vpop.f32.mrf.mxu2 }
 0x4e6   :  { %v3022_v17 = vpop.f32.mrf.mxu0  ;;  %v2518_v59 = vpop.f32.mrf.mxu1 }
 0x4e7   :  { %v3023_v18 = vadd.f32 %v3022_v17, %v2854_v37  ;;  %v2519_v49 = vadd.f32 %v5970_v48, %v2518_v59  ;;  %v6677_v17 = vld [vmem:[#allocation18_spill] sm:$0xff]  ;;  %v6678_v59 = vld [vmem:[#allocation81_spill] sm:$0xff] }
 0x4e9   :  { %3176 = vst.msk [vmem:[%s6393_s6 + $0x28] sm:$0xff] %vm3170_vm2, %v3023_v18  ;;  %v2688_v8 = vadd.f32 %v2687_v34, %v2519_v49  ;;  %2557 = vmatmul.bf16.gmra.mxu1 %v6669_v3  ;;  %2731 = vmatmul.bf16.gmra.mxu2 %v6670_v32  ;;  %v6675_v34 = vld [vmem:[#allocation82_spill] sm:$0xff] }
 0x4eb   :  { %v2857_v46 = vadd.f32 %v2856_v47, %v2688_v8  ;;  %v2863_v54 = vpop.f32.mrf.mxu3 }
 0x4ec   :  { %v2692_v44 = vpop.f32.mrf.mxu2 }
 0x4ee   :  { %v3025_v7 = vpop.f32.mrf.mxu0  ;;  %v2520_v57 = vpop.f32.mrf.mxu1 }
 0x4ef   :  { %v3026_v58 = vadd.f32 %v3025_v7, %v2857_v46  ;;  %v2521_v5 = vadd.f32 %v5970_v48, %v2520_v57  ;;  %v6680_v7 = vld [vmem:[#allocation80_spill] sm:$0xff] }
 0x4f0   :  { %2905 = vmatmul.bf16.gmra.mxu3 %v6671_v41 }
 0x4f1   :  { %3177 = vst.msk [vmem:[%s6393_s6 + $0x30] sm:$0xff] %vm3170_vm2, %v3026_v58  ;;  %3064 = vmatmul.bf16.gmra.mxu0 %v6672_v36  ;;  %v2690_v45 = vadd.f32 %v2689_v1, %v2521_v5 }
 0x4f3   :  { %v2866_v9 = vpop.f32.mrf.mxu3  ;;  %v2859_v26 = vadd.f32 %v2858_v42, %v2690_v45 }
 0x4f4   :  { %v2694_v61 = vpop.f32.mrf.mxu2 }
 0x4f6   :  { %v3027_v39 = vpop.f32.mrf.mxu0  ;;  %v2523_v60 = vpop.f32.mrf.mxu1 }
 0x4f7   :  { %v3028_v47 = vadd.f32 %v3027_v39, %v2859_v26  ;;  %v2524_v0 = vadd.f32 %v5970_v48, %v2523_v60  ;;  %v6681_v39 = vld [vmem:[#allocation22_spill] sm:$0xff]  ;;  %v6682_v60 = vld [vmem:[#allocation84_spill] sm:$0xff] }
 0x4f9   :  { %3178 = vst.msk [vmem:[%s6393_s6 + $0x38] sm:$0xff] %vm3170_vm2, %v3028_v47  ;;  %v2693_v33 = vadd.f32 %v2692_v44, %v2524_v0  ;;  %2562 = vmatmul.bf16.gmra.mxu1 %v6673_v10  ;;  %2736 = vmatmul.bf16.gmra.mxu2 %v6674_v13  ;;  %v6679_v44 = vld [vmem:[#allocation85_spill] sm:$0xff] }
 0x4fb   :  { %v2862_v15 = vadd.f32 %v2861_v22, %v2693_v33  ;;  %v2868_v62 = vpop.f32.mrf.mxu3 }
 0x4fc   :  { %v2697_v16 = vpop.f32.mrf.mxu2 }
 0x4fe   :  { %v3030_v31 = vpop.f32.mrf.mxu0  ;;  %v2525_v30 = vpop.f32.mrf.mxu1 }
 0x4ff   :  { %v3031_v43 = vadd.f32 %v3030_v31, %v2862_v15  ;;  %v2526_v42 = vadd.f32 %v5970_v48, %v2525_v30  ;;  %v6684_v31 = vld [vmem:[#allocation83_spill] sm:$0xff] }
 0x500   :  { %2910 = vmatmul.bf16.gmra.mxu3 %v6675_v34 }
 0x501   :  { %3179 = vst.msk [vmem:[%s6393_s6 + $0x40] sm:$0xff] %vm3170_vm2, %v3031_v43  ;;  %3069 = vmatmul.bf16.gmra.mxu0 %v6676_v63  ;;  %v2695_v27 = vadd.f32 %v2694_v61, %v2526_v42 }
 0x503   :  { %v2871_v53 = vpop.f32.mrf.mxu3  ;;  %v2864_v19 = vadd.f32 %v2863_v54, %v2695_v27 }
 0x504   :  { %v2699_v25 = vpop.f32.mrf.mxu2 }
 0x506   :  { %v3032_v38 = vpop.f32.mrf.mxu0  ;;  %v2528_v23 = vpop.f32.mrf.mxu1 }
 0x507   :  { %v3033_v22 = vadd.f32 %v3032_v38, %v2864_v19  ;;  %v2529_v1 = vadd.f32 %v5970_v48, %v2528_v23  ;;  %v6685_v38 = vld [vmem:[#allocation26_spill] sm:$0xff]  ;;  %v6686_v23 = vld [vmem:[#allocation87_spill] sm:$0xff] }
 0x509   :  { %3180 = vst.msk [vmem:[%s6393_s6 + $0x48] sm:$0xff] %vm3170_vm2, %v3033_v22  ;;  %v2698_v37 = vadd.f32 %v2697_v16, %v2529_v1  ;;  %2567 = vmatmul.bf16.gmra.mxu1 %v6677_v17  ;;  %2741 = vmatmul.bf16.gmra.mxu2 %v6678_v59  ;;  %v6683_v16 = vld [vmem:[#allocation88_spill] sm:$0xff] }
 0x50b   :  { %v2867_v18 = vadd.f32 %v2866_v9, %v2698_v37  ;;  %v2873_v49 = vpop.f32.mrf.mxu3 }
 0x50c   :  { %v2702_v8 = vpop.f32.mrf.mxu2 }
 0x50e   :  { %v3035_v3 = vpop.f32.mrf.mxu0  ;;  %v2530_v32 = vpop.f32.mrf.mxu1 }
 0x50f   :  { %v3036_v46 = vadd.f32 %v3035_v3, %v2867_v18  ;;  %v2531_v54 = vadd.f32 %v5970_v48, %v2530_v32  ;;  %v6688_v3 = vld [vmem:[#allocation86_spill] sm:$0xff] }
 0x510   :  { %2915 = vmatmul.bf16.gmra.mxu3 %v6679_v44 }
 0x511   :  { %3181 = vst.msk [vmem:[%s6393_s6 + $0x50] sm:$0xff] %vm3170_vm2, %v3036_v46  ;;  %3074 = vmatmul.bf16.gmra.mxu0 %v6680_v7  ;;  %v2700_v57 = vadd.f32 %v2699_v25, %v2531_v54 }
 0x513   :  { %v2876_v58 = vpop.f32.mrf.mxu3  ;;  %v2869_v41 = vadd.f32 %v2868_v62, %v2700_v57 }
 0x514   :  { %v2704_v5 = vpop.f32.mrf.mxu2 }
 0x516   :  { %v3037_v36 = vpop.f32.mrf.mxu0  ;;  %v2533_v45 = vpop.f32.mrf.mxu1 }
 0x517   :  { %v3038_v9 = vadd.f32 %v3037_v36, %v2869_v41  ;;  %v2534_v61 = vadd.f32 %v5970_v48, %v2533_v45  ;;  %v6689_v36 = vld [vmem:[#allocation4_spill] sm:$0xff]  ;;  %v6690_v45 = vld [vmem:[#allocation90_spill] sm:$0xff] }
 0x519   :  { %3182 = vst.msk [vmem:[%s6393_s6 + $0x58] sm:$0xff] %vm3170_vm2, %v3038_v9  ;;  %v2703_v26 = vadd.f32 %v2702_v8, %v2534_v61  ;;  %2572 = vmatmul.bf16.gmra.mxu1 %v6681_v39  ;;  %2746 = vmatmul.bf16.gmra.mxu2 %v6682_v60  ;;  %v6687_v8 = vld [vmem:[#allocation91_spill] sm:$0xff] }
 0x51b   :  { %v2872_v47 = vadd.f32 %v2871_v53, %v2703_v26  ;;  %v2878_v0 = vpop.f32.mrf.mxu3 }
 0x51c   :  { %v2707_v33 = vpop.f32.mrf.mxu2 }
 0x51e   :  { %v3040_v10 = vpop.f32.mrf.mxu0  ;;  %v2535_v13 = vpop.f32.mrf.mxu1 }
 0x51f   :  { %v3041_v15 = vadd.f32 %v3040_v10, %v2872_v47  ;;  %v2536_v62 = vadd.f32 %v5970_v48, %v2535_v13 }
 0x520   :  { %2920 = vmatmul.bf16.gmra.mxu3 %v6683_v16 }
 0x521   :  { %3183 = vst.msk [vmem:[%s6393_s6 + $0x60] sm:$0xff] %vm3170_vm2, %v3041_v15  ;;  %3079 = vmatmul.bf16.gmra.mxu0 %v6684_v31  ;;  %v2705_v30 = vadd.f32 %v2704_v5, %v2536_v62 }
 0x523   :  { %v2881_v43 = vpop.f32.mrf.mxu3  ;;  %v2874_v34 = vadd.f32 %v2873_v49, %v2705_v30 }
 0x524   :  { %v2709_v42 = vpop.f32.mrf.mxu2 }
 0x526   :  { %v3042_v63 = vpop.f32.mrf.mxu0  ;;  %v2538_v27 = vpop.f32.mrf.mxu1 }
 0x527   :  { %v3043_v53 = vadd.f32 %v3042_v63, %v2874_v34  ;;  %v2539_v25 = vadd.f32 %v5970_v48, %v2538_v27 }
 0x529   :  { %3184 = vst.msk [vmem:[%s6393_s6 + $0x68] sm:$0xff] %vm3170_vm2, %v3043_v53  ;;  %v2708_v19 = vadd.f32 %v2707_v33, %v2539_v25  ;;  %2577 = vmatmul.bf16.gmra.mxu1 %v6685_v38  ;;  %2751 = vmatmul.bf16.gmra.mxu2 %v6686_v23  ;;  %v6691_v33 = vld [vmem:[#allocation89_spill] sm:$0xff]  ;;  %v6693_v23 = vld [vmem:[#allocation92_spill] sm:$0xff] }
 0x52b   :  { %v2877_v22 = vadd.f32 %v2876_v58, %v2708_v19  ;;  %v2883_v1 = vpop.f32.mrf.mxu3 }
 0x52c   :  { %v2712_v37 = vpop.f32.mrf.mxu2 }
 0x52e   :  { %v3045_v17 = vpop.f32.mrf.mxu0  ;;  %v2540_v59 = vpop.f32.mrf.mxu1 }
 0x52f   :  { %v3046_v18 = vadd.f32 %v3045_v17, %v2877_v22  ;;  %v2541_v49 = vadd.f32 %v5970_v48, %v2540_v59 }
 0x530   :  { %2925 = vmatmul.bf16.gmra.mxu3 %v6687_v8  ;;  %v6694_v8 = vld [vmem:[#allocation10_spill] sm:$0xff] }
 0x531   :  { %3185 = vst.msk [vmem:[%s6393_s6 + $0x70] sm:$0xff] %vm3170_vm2, %v3046_v18  ;;  %3084 = vmatmul.bf16.gmra.mxu0 %v6688_v3  ;;  %v2710_v32 = vadd.f32 %v2709_v42, %v2541_v49  ;;  %v6692_v42 = vld [vmem:[#allocation7_spill] sm:$0xff] }
 0x533   :  { %v2886_v46 = vpop.f32.mrf.mxu3  ;;  %v2879_v44 = vadd.f32 %v2878_v0, %v2710_v32 }
 0x534   :  { %v2714_v54 = vpop.f32.mrf.mxu2 }
 0x536   :  { %v3047_v7 = vpop.f32.mrf.mxu0  ;;  %v2543_v57 = vpop.f32.mrf.mxu1 }
 0x537   :  { %v3048_v58 = vadd.f32 %v3047_v7, %v2879_v44  ;;  %v2544_v5 = vadd.f32 %v5970_v48, %v2543_v57 }
 0x539   :  { %3186 = vst.msk [vmem:[%s6393_s6 + $0x78] sm:$0xff] %vm3170_vm2, %v3048_v58  ;;  %v2713_v41 = vadd.f32 %v2712_v37, %v2544_v5  ;;  %2582 = vmatmul.bf16.gmra.mxu1 %v6689_v36  ;;  %2756 = vmatmul.bf16.gmra.mxu2 %v6690_v45  ;;  %v6695_v58 = vld [vmem:[#allocation93_spill] sm:$0xff] }
 0x53b   :  { %v2882_v9 = vadd.f32 %v2881_v43, %v2713_v41  ;;  %v2888_v61 = vpop.f32.mrf.mxu3 }
 0x53c   :  { %v2717_v26 = vpop.f32.mrf.mxu2 }
 0x53e   :  { %v3050_v39 = vpop.f32.mrf.mxu0  ;;  %v2545_v60 = vpop.f32.mrf.mxu1 }
 0x53f   :  { %v3051_v47 = vadd.f32 %v3050_v39, %v2882_v9  ;;  %v2546_v0 = vadd.f32 %v5970_v48, %v2545_v60  ;;  %v6696_v39 = vld [vmem:[#allocation13_spill] sm:$0xff] }
 0x540   :  { %2930 = vmatmul.bf16.gmra.mxu3 %v5199_v55 }
 0x541   :  { %3187 = vst.msk [vmem:[%s6393_s6 + $0x80] sm:$0xff] %vm3170_vm2, %v3051_v47  ;;  %3089 = vmatmul.bf16.gmra.mxu0 %v6691_v33  ;;  %v2715_v10 = vadd.f32 %v2714_v54, %v2546_v0 }
 0x543   :  { %v2891_v13 = vpop.f32.mrf.mxu3  ;;  %v2884_v62 = vadd.f32 %v2883_v1, %v2715_v10 }
 0x544   :  { %v2719_v15 = vpop.f32.mrf.mxu2 }
 0x546   :  { %v3052_v16 = vpop.f32.mrf.mxu0  ;;  %v2548_v31 = vpop.f32.mrf.mxu1 }
 0x547   :  { %v3053_v30 = vadd.f32 %v3052_v16, %v2884_v62  ;;  %v2549_v43 = vadd.f32 %v5970_v48, %v2548_v31  ;;  %v6697_v62 = vld [vmem:[#allocation94_spill] sm:$0xff] }
 0x549   :  { %3188 = vst.msk [vmem:[%s6393_s6 + $0x88] sm:$0xff] %vm3170_vm2, %v3053_v30  ;;  %v2718_v55 = vadd.f32 %v2717_v26, %v2549_v43  ;;  %2587 = vmatmul.bf16.gmra.mxu1 %v6692_v42  ;;  %2761 = vmatmul.bf16.gmra.mxu2 %v5197_v35 }
 0x54b   :  { %v2887_v34 = vadd.f32 %v2886_v46, %v2718_v55  ;;  %v2893_v63 = vpop.f32.mrf.mxu3 }
 0x54c   :  { %v2722_v27 = vpop.f32.mrf.mxu2 }
 0x54e   :  { %v3055_v53 = vpop.f32.mrf.mxu0  ;;  %v2550_v25 = vpop.f32.mrf.mxu1 }
 0x54f   :  { %v3056_v19 = vadd.f32 %v3055_v53, %v2887_v34  ;;  %v2551_v38 = vadd.f32 %v5970_v48, %v2550_v25 }
 0x550   :  { %2935 = vmatmul.bf16.gmra.mxu3 %v5236_v51 }
 0x551   :  { %3189 = vst.msk [vmem:[%s6393_s6 + $0x90] sm:$0xff] %vm3170_vm2, %v3056_v19  ;;  %3094 = vmatmul.bf16.gmra.mxu0 %v6693_v23  ;;  %v2720_v22 = vadd.f32 %v2719_v15, %v2551_v38 }
 0x553   :  { %v2896_v1 = vpop.f32.mrf.mxu3  ;;  %v2889_v37 = vadd.f32 %v2888_v61, %v2720_v22 }
 0x554   :  { %v2724_v35 = vpop.f32.mrf.mxu2 }
 0x556   :  { %v3057_v17 = vpop.f32.mrf.mxu0  ;;  %v2553_v59 = vpop.f32.mrf.mxu1 }
 0x557   :  { %v3058_v18 = vadd.f32 %v3057_v17, %v2889_v37  ;;  %v2554_v49 = vadd.f32 %v5970_v48, %v2553_v59 }
 0x559   :  { %3190 = vst.msk [vmem:[%s6393_s6 + $0x98] sm:$0xff] %vm3170_vm2, %v3058_v18  ;;  %v2723_v51 = vadd.f32 %v2722_v27, %v2554_v49  ;;  %2592 = vmatmul.bf16.gmra.mxu1 %v6694_v8  ;;  %2766 = vmatmul.bf16.gmra.mxu2 %v5234_v4  ;;  %v6700_v8 = vld [vmem:[#allocation19_spill] sm:$0xff] }
 0x55b   :  { %v2892_v3 = vadd.f32 %v2891_v13, %v2723_v51  ;;  %v2898_v32 = vpop.f32.mrf.mxu3 }
 0x55c   :  { %v2727_v46 = vpop.f32.mrf.mxu2 }
 0x55e   :  { %v3060_v54 = vpop.f32.mrf.mxu0  ;;  %v2555_v44 = vpop.f32.mrf.mxu1 }
 0x55f   :  { %v3061_v7 = vadd.f32 %v3060_v54, %v2892_v3  ;;  %v2556_v57 = vadd.f32 %v5970_v48, %v2555_v44 }
 0x560   :  { %2940 = vmatmul.bf16.gmra.mxu3 %v5273_v50 }
 0x561   :  { %3191 = vst.msk [vmem:[%s6393_s6 + $0xa0] sm:$0xff] %vm3170_vm2, %v3061_v7  ;;  %3099 = vmatmul.bf16.gmra.mxu0 %v6695_v58  ;;  %v2725_v5 = vadd.f32 %v2724_v35, %v2556_v57  ;;  %v6701_v58 = vld [vmem:[#allocation96_spill] sm:$0xff] }
 0x563   :  { %v2901_v41 = vpop.f32.mrf.mxu3  ;;  %v2894_v36 = vadd.f32 %v2893_v63, %v2725_v5  ;;  %v6698_v63 = vld [vmem:[#allocation16_spill] sm:$0xff] }
 0x564   :  { %v2729_v4 = vpop.f32.mrf.mxu2 }
 0x566   :  { %v3062_v45 = vpop.f32.mrf.mxu0  ;;  %v2558_v9 = vpop.f32.mrf.mxu1 }
 0x567   :  { %v3063_v61 = vadd.f32 %v3062_v45, %v2894_v36  ;;  %v2559_v26 = vadd.f32 %v5970_v48, %v2558_v9 }
 0x569   :  { %3192 = vst.msk [vmem:[%s6393_s6 + $0xa8] sm:$0xff] %vm3170_vm2, %v3063_v61  ;;  %v2728_v50 = vadd.f32 %v2727_v46, %v2559_v26  ;;  %2597 = vmatmul.bf16.gmra.mxu1 %v6696_v39  ;;  %2771 = vmatmul.bf16.gmra.mxu2 %v5271_v56  ;;  %v6702_v26 = vld [vmem:[#allocation23_spill] sm:$0xff] }
 0x56b   :  { %v2897_v60 = vadd.f32 %v2896_v1, %v2728_v50  ;;  %v2903_v47 = vpop.f32.mrf.mxu3  ;;  %v6699_v1 = vld [vmem:[#allocation95_spill] sm:$0xff] }
 0x56c   :  { %v2732_v0 = vpop.f32.mrf.mxu2 }
 0x56e   :  { %v3065_v33 = vpop.f32.mrf.mxu0  ;;  %v2560_v10 = vpop.f32.mrf.mxu1 }
 0x56f   :  { %v3066_v13 = vadd.f32 %v3065_v33, %v2897_v60  ;;  %v2561_v15 = vadd.f32 %v5970_v48, %v2560_v10 }
 0x570   :  { %2945 = vmatmul.bf16.gmra.mxu3 %v5310_v24 }
 0x571   :  { %3193 = vst.msk [vmem:[%s6393_s6 + $0xb0] sm:$0xff] %vm3170_vm2, %v3066_v13  ;;  %3104 = vmatmul.bf16.gmra.mxu0 %v6697_v62  ;;  %v2730_v16 = vadd.f32 %v2729_v4, %v2561_v15  ;;  %v6703_v13 = vld [vmem:[#allocation97_spill] sm:$0xff] }
 0x573   :  { %v2906_v31 = vpop.f32.mrf.mxu3  ;;  %v2899_v30 = vadd.f32 %v2898_v32, %v2730_v16 }
 0x574   :  { %v2734_v56 = vpop.f32.mrf.mxu2 }
 0x576   :  { %v3067_v43 = vpop.f32.mrf.mxu0  ;;  %v2563_v55 = vpop.f32.mrf.mxu1 }
 0x577   :  { %v3068_v42 = vadd.f32 %v3067_v43, %v2899_v30  ;;  %v2564_v34 = vadd.f32 %v5970_v48, %v2563_v55  ;;  %v6704_v55 = vld [vmem:[#allocation27_spill] sm:$0xff] }
 0x579   :  { %3194 = vst.msk [vmem:[%s6393_s6 + $0xb8] sm:$0xff] %vm3170_vm2, %v3068_v42  ;;  %v2733_v24 = vadd.f32 %v2732_v0, %v2564_v34  ;;  %2602 = vmatmul.bf16.gmra.mxu1 %v6698_v63  ;;  %2776 = vmatmul.bf16.gmra.mxu2 %v5308_v11 }
 0x57b   :  { %v2902_v27 = vadd.f32 %v2901_v41, %v2733_v24  ;;  %v2908_v53 = vpop.f32.mrf.mxu3 }
 0x57c   :  { %v2737_v25 = vpop.f32.mrf.mxu2 }
 0x57e   :  { %v3070_v19 = vpop.f32.mrf.mxu0  ;;  %v2565_v38 = vpop.f32.mrf.mxu1 }
 0x57f   :  { %v3071_v23 = vadd.f32 %v3070_v19, %v2902_v27  ;;  %v2566_v22 = vadd.f32 %v5970_v48, %v2565_v38  ;;  %v6705_v19 = vld [vmem:[#allocation98_spill] sm:$0xff] }
 0x580   :  { %2950 = vmatmul.bf16.gmra.mxu3 %v5347_v12 }
 0x581   :  { %3195 = vst.msk [vmem:[%s6393_s6 + $0xc0] sm:$0xff] %vm3170_vm2, %v3071_v23  ;;  %3109 = vmatmul.bf16.gmra.mxu0 %v6699_v1  ;;  %v2735_v35 = vadd.f32 %v2734_v56, %v2566_v22 }
 0x583   :  { %v2911_v37 = vpop.f32.mrf.mxu3  ;;  %v2904_v17 = vadd.f32 %v2903_v47, %v2735_v35 }
 0x584   :  { %v2739_v11 = vpop.f32.mrf.mxu2 }
 0x586   :  { %v3072_v59 = vpop.f32.mrf.mxu0  ;;  %v2568_v18 = vpop.f32.mrf.mxu1 }
 0x587   :  { %v3073_v49 = vadd.f32 %v3072_v59, %v2904_v17  ;;  %v2569_v51 = vadd.f32 %v5970_v48, %v2568_v18  ;;  %v6706_v17 = vld [vmem:[#allocation5_spill] sm:$0xff]  ;;  %v6707_v59 = vld [vmem:[#allocation100_spill] sm:$0xff] }
 0x589   :  { %3196 = vst.msk [vmem:[%s6393_s6 + $0xc8] sm:$0xff] %vm3170_vm2, %v3073_v49  ;;  %v2738_v12 = vadd.f32 %v2737_v25, %v2569_v51  ;;  %2607 = vmatmul.bf16.gmra.mxu1 %v6700_v8  ;;  %2781 = vmatmul.bf16.gmra.mxu2 %v5345_v6 }
 0x58b   :  { %v2907_v3 = vadd.f32 %v2906_v31, %v2738_v12  ;;  %v2913_v32 = vpop.f32.mrf.mxu3 }
 0x58c   :  { %v2742_v46 = vpop.f32.mrf.mxu2 }
 0x58e   :  { %v3075_v54 = vpop.f32.mrf.mxu0  ;;  %v2570_v44 = vpop.f32.mrf.mxu1 }
 0x58f   :  { %v3076_v7 = vadd.f32 %v3075_v54, %v2907_v3  ;;  %v2571_v57 = vadd.f32 %v5970_v48, %v2570_v44 }
 0x590   :  { %2955 = vmatmul.bf16.gmra.mxu3 %v5384_v40 }
 0x591   :  { %3197 = vst.msk [vmem:[%s6393_s6 + $0xd0] sm:$0xff] %vm3170_vm2, %v3076_v7  ;;  %3114 = vmatmul.bf16.gmra.mxu0 %v6701_v58  ;;  %v2740_v5 = vadd.f32 %v2739_v11, %v2571_v57 }
 0x593   :  { %v2916_v41 = vpop.f32.mrf.mxu3  ;;  %v2909_v4 = vadd.f32 %v2908_v53, %v2740_v5 }
 0x594   :  { %v2744_v6 = vpop.f32.mrf.mxu2 }
 0x596   :  { %v3077_v36 = vpop.f32.mrf.mxu0  ;;  %v2573_v45 = vpop.f32.mrf.mxu1 }
 0x597   :  { %v3078_v9 = vadd.f32 %v3077_v36, %v2909_v4  ;;  %v2574_v61 = vadd.f32 %v5970_v48, %v2573_v45  ;;  %v6709_v4 = vld [vmem:[#allocation8_spill] sm:$0xff] }
 0x599   :  { %3198 = vst.msk [vmem:[%s6393_s6 + $0xd8] sm:$0xff] %vm3170_vm2, %v3078_v9  ;;  %v2743_v40 = vadd.f32 %v2742_v46, %v2574_v61  ;;  %2612 = vmatmul.bf16.gmra.mxu1 %v6702_v26  ;;  %2786 = vmatmul.bf16.gmra.mxu2 %v5382_v20  ;;  %v6708_v46 = vld [vmem:[#allocation99_spill] sm:$0xff] }
 0x59b   :  { %v2912_v50 = vadd.f32 %v2911_v37, %v2743_v40  ;;  %v2918_v39 = vpop.f32.mrf.mxu3 }
 0x59c   :  { %v2747_v60 = vpop.f32.mrf.mxu2 }
 0x59e   :  { %v3080_v47 = vpop.f32.mrf.mxu0  ;;  %v2575_v0 = vpop.f32.mrf.mxu1 }
 0x59f   :  { %v3081_v33 = vadd.f32 %v3080_v47, %v2912_v50  ;;  %v2576_v10 = vadd.f32 %v5970_v48, %v2575_v0 }
 0x5a0   :  { %2960 = vmatmul.bf16.gmra.mxu3 %v5421_v28 }
 0x5a1   :  { %3199 = vst.msk [vmem:[%s6393_s6 + $0xe0] sm:$0xff] %vm3170_vm2, %v3081_v33  ;;  %3119 = vmatmul.bf16.gmra.mxu0 %v6703_v13  ;;  %v2745_v15 = vadd.f32 %v2744_v6, %v2576_v10 }
 0x5a3   :  { %v2921_v62 = vpop.f32.mrf.mxu3  ;;  %v2914_v16 = vadd.f32 %v2913_v32, %v2745_v15 }
 0x5a4   :  { %v2749_v20 = vpop.f32.mrf.mxu2 }
 0x5a6   :  { %v3082_v31 = vpop.f32.mrf.mxu0  ;;  %v2578_v56 = vpop.f32.mrf.mxu1 }
 0x5a7   :  { %v3083_v30 = vadd.f32 %v3082_v31, %v2914_v16  ;;  %v2579_v43 = vadd.f32 %v5970_v48, %v2578_v56 }
 0x5a9   :  { %3200 = vst.msk [vmem:[%s6393_s6 + $0xe8] sm:$0xff] %vm3170_vm2, %v3083_v30  ;;  %v2748_v28 = vadd.f32 %v2747_v60, %v2579_v43  ;;  %2617 = vmatmul.bf16.gmra.mxu1 %v6704_v55  ;;  %2791 = vmatmul.bf16.gmra.mxu2 %v5419_v52 }
 0x5ab   :  { %v2917_v42 = vadd.f32 %v2916_v41, %v2748_v28  ;;  %v2923_v34 = vpop.f32.mrf.mxu3 }
 0x5ac   :  { %v2752_v24 = vpop.f32.mrf.mxu2 }
 0x5ae   :  { %v3085_v63 = vpop.f32.mrf.mxu0  ;;  %v2580_v27 = vpop.f32.mrf.mxu1 }
 0x5af   :  { %v3086_v53 = vadd.f32 %v3085_v63, %v2917_v42  ;;  %v2581_v25 = vadd.f32 %v5970_v48, %v2580_v27  ;;  %v6713_v42 = vld [vmem:[#allocation106_spill] sm:$0xff] }
 0x5b0   :  { %2965 = vmatmul.bf16.gmra.mxu3 %v5458_v29 }
 0x5b1   :  { %3201 = vst.msk [vmem:[%s6393_s6 + $0xf0] sm:$0xff] %vm3170_vm2, %v3086_v53  ;;  %3124 = vmatmul.bf16.gmra.mxu0 %v6705_v19  ;;  %v2750_v38 = vadd.f32 %v2749_v20, %v2581_v25  ;;  %v6712_v20 = vld [vmem:[#allocation103_spill] sm:$0xff] }
 0x5b3   :  { %v2926_v23 = vpop.f32.mrf.mxu3  ;;  %v2919_v22 = vadd.f32 %v2918_v39, %v2750_v38  ;;  %v6710_v39 = vld [vmem:[#allocation101_spill] sm:$0xff] }
 0x5b4   :  { %v2754_v52 = vpop.f32.mrf.mxu2 }
 0x5b6   :  { %v3087_v1 = vpop.f32.mrf.mxu0  ;;  %v2583_v35 = vpop.f32.mrf.mxu1 }
 0x5b7   :  { %v3088_v37 = vadd.f32 %v3087_v1, %v2919_v22  ;;  %v2584_v11 = vadd.f32 %v5970_v48, %v2583_v35  ;;  %v6715_v22 = vld [vmem:[#allocation14_spill] sm:$0xff]  ;;  %v6716_v1 = vld [vmem:[#allocation105_spill] sm:$0xff] }
 0x5b9   :  { %3202 = vst.msk [vmem:[%s6393_s6 + $0xf8] sm:$0xff] %vm3170_vm2, %v3088_v37  ;;  %v2753_v29 = vadd.f32 %v2752_v24, %v2584_v11  ;;  %2622 = vmatmul.bf16.gmra.mxu1 %v6706_v17  ;;  %2796 = vmatmul.bf16.gmra.mxu2 %v6707_v59 }
 0x5bb   :  { %v2922_v18 = vadd.f32 %v2921_v62, %v2753_v29  ;;  %v2928_v49 = vpop.f32.mrf.mxu3  ;;  %v6711_v62 = vld [vmem:[#allocation11_spill] sm:$0xff] }
 0x5bc   :  { %v2757_v51 = vpop.f32.mrf.mxu2 }
 0x5be   :  { %v3090_v12 = vpop.f32.mrf.mxu0  ;;  %v2585_v8 = vpop.f32.mrf.mxu1 }
 0x5bf   :  { %v3091_v3 = vadd.f32 %v3090_v12, %v2922_v18  ;;  %v2586_v32 = vadd.f32 %v5970_v48, %v2585_v8 }
 0x5c0   :  { %2970 = vmatmul.bf16.gmra.mxu3 %v5494_v21 }
 0x5c1   :  { %3203 = vst.msk [vmem:[%s6393_s6 + $0x100] sm:$0xff] %vm3170_vm2, %v3091_v3  ;;  %3129 = vmatmul.bf16.gmra.mxu0 %v6708_v46  ;;  %v2755_v54 = vadd.f32 %v2754_v52, %v2586_v32 }
 0x5c3   :  { %v2931_v44 = vpop.f32.mrf.mxu3  ;;  %v2924_v57 = vadd.f32 %v2923_v34, %v2755_v54  ;;  %v6714_v34 = vld [vmem:[#allocation102_spill] sm:$0xff] }
 0x5c4   :  { %v2759_v7 = vpop.f32.mrf.mxu2 }
 0x5c6   :  { %v3092_v58 = vpop.f32.mrf.mxu0  ;;  %v2588_v5 = vpop.f32.mrf.mxu1 }
 0x5c7   :  { %v3093_v41 = vadd.f32 %v3092_v58, %v2924_v57  ;;  %v2589_v6 = vadd.f32 %v5970_v48, %v2588_v5  ;;  %v6719_v58 = vld [vmem:[#allocation17_spill] sm:$0xff]  ;;  %v6720_v5 = vld [vmem:[#allocation108_spill] sm:$0xff] }
 0x5c9   :  { %3204 = vst.msk [vmem:[%s6393_s6 + $0x108] sm:$0xff] %vm3170_vm2, %v3093_v41  ;;  %v2758_v21 = vadd.f32 %v2757_v51, %v2589_v6  ;;  %2627 = vmatmul.bf16.gmra.mxu1 %v6709_v4  ;;  %2801 = vmatmul.bf16.gmra.mxu2 %v5492_v14  ;;  %v6718_v51 = vld [vmem:[#allocation104_spill] sm:$0xff] }
 0x5cb   :  { %v2927_v36 = vadd.f32 %v2926_v23, %v2758_v21  ;;  %v2933_v45 = vpop.f32.mrf.mxu3 }
 0x5cc   :  { %v2762_v9 = vpop.f32.mrf.mxu2 }
 0x5ce   :  { %v3095_v61 = vpop.f32.mrf.mxu0  ;;  %v2590_v40 = vpop.f32.mrf.mxu1 }
 0x5cf   :  { %v3096_v26 = vadd.f32 %v3095_v61, %v2927_v36  ;;  %v2591_v50 = vadd.f32 %v5970_v48, %v2590_v40  ;;  %v6721_v61 = vld [vmem:[#allocation112_spill] sm:$0xff]  ;;  %v6722_v40 = vld [vmem:[#allocation107_spill] sm:$0xff] }
 0x5d0   :  { %2975 = vmatmul.bf16.gmra.mxu3 %v5531_v2 }
 0x5d1   :  { %3205 = vst.msk [vmem:[%s6393_s6 + $0x110] sm:$0xff] %vm3170_vm2, %v3096_v26  ;;  %3134 = vmatmul.bf16.gmra.mxu0 %v6710_v39  ;;  %v2760_v60 = vadd.f32 %v2759_v7, %v2591_v50 }
 0x5d3   :  { %v2936_v47 = vpop.f32.mrf.mxu3  ;;  %v2929_v0 = vadd.f32 %v2928_v49, %v2760_v60  ;;  %v6717_v49 = vld [vmem:[#allocation109_spill] sm:$0xff] }
 0x5d4   :  { %v2764_v14 = vpop.f32.mrf.mxu2 }
 0x5d6   :  { %v3097_v33 = vpop.f32.mrf.mxu0  ;;  %v2593_v10 = vpop.f32.mrf.mxu1 }
 0x5d7   :  { %v3098_v13 = vadd.f32 %v3097_v33, %v2929_v0  ;;  %v2594_v15 = vadd.f32 %v5970_v48, %v2593_v10 }
 0x5d9   :  { %3206 = vst.msk [vmem:[%s6393_s6 + $0x118] sm:$0xff] %vm3170_vm2, %v3098_v13  ;;  %v2763_v2 = vadd.f32 %v2762_v9, %v2594_v15  ;;  %2632 = vmatmul.bf16.gmra.mxu1 %v6711_v62  ;;  %2806 = vmatmul.bf16.gmra.mxu2 %v6712_v20  ;;  %v6723_v13 = vld [vmem:[#allocation20_spill] sm:$0xff]  ;;  %v6724_v15 = vld [vmem:[#allocation111_spill] sm:$0xff] }
 0x5db   :  { %v2932_v16 = vadd.f32 %v2931_v44, %v2763_v2  ;;  %v2938_v31 = vpop.f32.mrf.mxu3 }
 0x5dc   :  { %v2767_v56 = vpop.f32.mrf.mxu2 }
 0x5de   :  { %v3100_v30 = vpop.f32.mrf.mxu0  ;;  %v2595_v43 = vpop.f32.mrf.mxu1 }
 0x5df   :  { %v3101_v28 = vadd.f32 %v3100_v30, %v2932_v16  ;;  %v2596_v55 = vadd.f32 %v5970_v48, %v2595_v43  ;;  %v6725_v43 = vld [vmem:[#allocation115_spill] sm:$0xff] }
 0x5e0   :  { %2980 = vmatmul.bf16.gmra.mxu3 %v6713_v42 }
 0x5e1   :  { %3207 = vst.msk [vmem:[%s6393_s6 + $0x120] sm:$0xff] %vm3170_vm2, %v3101_v28  ;;  %3139 = vmatmul.bf16.gmra.mxu0 %v6714_v34  ;;  %v2765_v24 = vadd.f32 %v2764_v14, %v2596_v55  ;;  %v6726_v28 = vld [vmem:[#allocation110_spill] sm:$0xff] }
 0x5e3   :  { %v2941_v63 = vpop.f32.mrf.mxu3  ;;  %v2934_v53 = vadd.f32 %v2933_v45, %v2765_v24 }
 0x5e4   :  { %v2769_v27 = vpop.f32.mrf.mxu2 }
 0x5e6   :  { %v3102_v25 = vpop.f32.mrf.mxu0  ;;  %v2598_v19 = vpop.f32.mrf.mxu1 }
 0x5e7   :  { %v3103_v38 = vadd.f32 %v3102_v25, %v2934_v53  ;;  %v2599_v23 = vadd.f32 %v5970_v48, %v2598_v19 }
 0x5e9   :  { %3208 = vst.msk [vmem:[%s6393_s6 + $0x128] sm:$0xff] %vm3170_vm2, %v3103_v38  ;;  %v2768_v52 = vadd.f32 %v2767_v56, %v2599_v23  ;;  %2637 = vmatmul.bf16.gmra.mxu1 %v6715_v22  ;;  %2811 = vmatmul.bf16.gmra.mxu2 %v6716_v1  ;;  %v6727_v38 = vld [vmem:[#allocation24_spill] sm:$0xff]  ;;  %v6728_v23 = vld [vmem:[#allocation114_spill] sm:$0xff] }
 0x5eb   :  { %v2937_v35 = vadd.f32 %v2936_v47, %v2768_v52  ;;  %v2943_v37 = vpop.f32.mrf.mxu3 }
 0x5ec   :  { %v2772_v11 = vpop.f32.mrf.mxu2 }
 0x5ee   :  { %v3105_v29 = vpop.f32.mrf.mxu0  ;;  %v2600_v17 = vpop.f32.mrf.mxu1 }
 0x5ef   :  { %v3106_v59 = vadd.f32 %v3105_v29, %v2937_v35  ;;  %v2601_v18 = vadd.f32 %v5970_v48, %v2600_v17  ;;  %v6729_v17 = vld [vmem:[#allocation113_spill] sm:$0xff] }
 0x5f0   :  { %2985 = vmatmul.bf16.gmra.mxu3 %v6717_v49 }
 0x5f1   :  { %3209 = vst.msk [vmem:[%s6393_s6 + $0x130] sm:$0xff] %vm3170_vm2, %v3106_v59  ;;  %3144 = vmatmul.bf16.gmra.mxu0 %v6718_v51  ;;  %v2770_v12 = vadd.f32 %v2769_v27, %v2601_v18 }
 0x5f3   :  { %v2946_v8 = vpop.f32.mrf.mxu3  ;;  %v2939_v32 = vadd.f32 %v2938_v31, %v2770_v12 }
 0x5f4   :  { %v2774_v3 = vpop.f32.mrf.mxu2 }
 0x5f6   :  { %v3107_v46 = vpop.f32.mrf.mxu0  ;;  %v2603_v54 = vpop.f32.mrf.mxu1 }
 0x5f7   :  { %v3108_v44 = vadd.f32 %v3107_v46, %v2939_v32  ;;  %v2604_v7 = vadd.f32 %v5970_v48, %v2603_v54  ;;  %v6730_v54 = vld [vmem:[#allocation28_spill] sm:$0xff] }
 0x5f9   :  { %3210 = vst.msk [vmem:[%s6393_s6 + $0x138] sm:$0xff] %vm3170_vm2, %v3108_v44  ;;  %v2773_v57 = vadd.f32 %v2772_v11, %v2604_v7  ;;  %2642 = vmatmul.bf16.gmra.mxu1 %v6719_v58  ;;  %2816 = vmatmul.bf16.gmra.mxu2 %v6720_v5 }
 0x5fb   :  { %v2942_v41 = vadd.f32 %v2941_v63, %v2773_v57  ;;  %v2948_v6 = vpop.f32.mrf.mxu3 }
 0x5fc   :  { %v2777_v21 = vpop.f32.mrf.mxu2 }
 0x5fe   :  { %v3110_v4 = vpop.f32.mrf.mxu0  ;;  %v2605_v36 = vpop.f32.mrf.mxu1 }
 0x5ff   :  { %v3111_v45 = vadd.f32 %v3110_v4, %v2942_v41  ;;  %v2606_v9 = vadd.f32 %v5970_v48, %v2605_v36 }
 0x600   :  { %2990 = vmatmul.bf16.gmra.mxu3 %v6721_v61 }
 0x601   :  { %3211 = vst.msk [vmem:[%s6393_s6 + $0x140] sm:$0xff] %vm3170_vm2, %v3111_v45  ;;  %3149 = vmatmul.bf16.gmra.mxu0 %v6722_v40  ;;  %v2775_v26 = vadd.f32 %v2774_v3, %v2606_v9 }
 0x603   :  { %v2951_v50 = vpop.f32.mrf.mxu3  ;;  %v2944_v60 = vadd.f32 %v2943_v37, %v2775_v26 }
 0x604   :  { %v2779_v39 = vpop.f32.mrf.mxu2 }
 0x606   :  { %v3112_v47 = vpop.f32.mrf.mxu0  ;;  %v2608_v14 = vpop.f32.mrf.mxu1 }
 0x607   :  { %v3113_v0 = vadd.f32 %v3112_v47, %v2944_v60  ;;  %v2609_v33 = vadd.f32 %v5970_v48, %v2608_v14 }
 0x609   :  { %3212 = vst.msk [vmem:[%s6393_s6 + $0x148] sm:$0xff] %vm3170_vm2, %v3113_v0  ;;  %v2778_v10 = vadd.f32 %v2777_v21, %v2609_v33  ;;  %2647 = vmatmul.bf16.gmra.mxu1 %v6723_v13  ;;  %2821 = vmatmul.bf16.gmra.mxu2 %v6724_v15 }
 0x60b   :  { %v2947_v2 = vadd.f32 %v2946_v8, %v2778_v10  ;;  %v2953_v62 = vpop.f32.mrf.mxu3 }
 0x60c   :  { %v2782_v20 = vpop.f32.mrf.mxu2 }
 0x60e   :  { %v3115_v16 = vpop.f32.mrf.mxu0  ;;  %v2610_v31 = vpop.f32.mrf.mxu1 }
 0x60f   :  { %v3116_v56 = vadd.f32 %v3115_v16, %v2947_v2  ;;  %v2611_v30 = vadd.f32 %v5970_v48, %v2610_v31 }
 0x610   :  { %2995 = vmatmul.bf16.gmra.mxu3 %v6725_v43 }
 0x611   :  { %3213 = vst.msk [vmem:[%s6393_s6 + $0x150] sm:$0xff] %vm3170_vm2, %v3116_v56  ;;  %3154 = vmatmul.bf16.gmra.mxu0 %v6726_v28  ;;  %v2780_v55 = vadd.f32 %v2779_v39, %v2611_v30 }
 0x613   :  { %v2956_v42 = vpop.f32.mrf.mxu3  ;;  %v2949_v24 = vadd.f32 %v2948_v6, %v2780_v55  ;;  %v6295_v6 = vld [vmem:[#allocation2] ss:$0 sm:$0xff] }
 0x614   :  { %v2784_v34 = vpop.f32.mrf.mxu2 }
 0x616   :  { %v3117_v63 = vpop.f32.mrf.mxu0  ;;  %v2613_v27 = vpop.f32.mrf.mxu1 }
 0x617   :  { %v3118_v53 = vadd.f32 %v3117_v63, %v2949_v24  ;;  %v2614_v25 = vadd.f32 %v5970_v48, %v2613_v27 }
 0x619   :  { %3214 = vst.msk [vmem:[%s6393_s6 + $0x158] sm:$0xff] %vm3170_vm2, %v3118_v53  ;;  %v2783_v19 = vadd.f32 %v2782_v20, %v2614_v25  ;;  %2652 = vmatmul.bf16.gmra.mxu1 %v6727_v38  ;;  %2826 = vmatmul.bf16.gmra.mxu2 %v6728_v23 }
 0x61b   :  { %v2952_v52 = vadd.f32 %v2951_v50, %v2783_v19  ;;  %v2958_v22 = vpop.f32.mrf.mxu3 }
 0x61c   :  { %v2787_v1 = vpop.f32.mrf.mxu2 }
 0x61e   :  { %v3120_v35 = vpop.f32.mrf.mxu0  ;;  %v2615_v37 = vpop.f32.mrf.mxu1 }
 0x61f   :  { %v3121_v11 = vadd.f32 %v3120_v35, %v2952_v52  ;;  %v2616_v29 = vadd.f32 %v5970_v48, %v2615_v37 }
 0x621   :  { %3215 = vst.msk [vmem:[%s6393_s6 + $0x160] sm:$0xff] %vm3170_vm2, %v3121_v11  ;;  %3159 = vmatmul.bf16.gmra.mxu0 %v6729_v17  ;;  %v2785_v59 = vadd.f32 %v2784_v34, %v2616_v29 }
 0x623   :  { %v2961_v18 = vpop.f32.mrf.mxu3  ;;  %v2954_v51 = vadd.f32 %v2953_v62, %v2785_v59 }
 0x624   :  { %v2789_v49 = vpop.f32.mrf.mxu2 }
 0x626   :  { %v3122_v12 = vpop.f32.mrf.mxu0  ;;  %v2618_v8 = vpop.f32.mrf.mxu1 }
 0x627   :  { %v3123_v3 = vadd.f32 %v3122_v12, %v2954_v51  ;;  %v2619_v32 = vadd.f32 %v5970_v48, %v2618_v8  ;;  %v6731_v48 = vld [vmem:[#allocation116_spill] sm:$0xff] }
 0x629   :  { %3216 = vst.msk [vmem:[%s6393_s6 + $0x168] sm:$0xff] %vm3170_vm2, %v3123_v3  ;;  %v2788_v46 = vadd.f32 %v2787_v1, %v2619_v32  ;;  %2657 = vmatmul.bf16.gmra.mxu1 %v6730_v54 }
 0x62b   :  { %v2957_v44 = vadd.f32 %v2956_v42, %v2788_v46  ;;  %v2963_v7 = vpop.f32.mrf.mxu3 }
 0x62c   :  { %v2792_v57 = vpop.f32.mrf.mxu2 }
 0x62e   :  { %v3125_v58 = vpop.f32.mrf.mxu0  ;;  %v2620_v5 = vpop.f32.mrf.mxu1 }
 0x62f   :  { %v3126_v41 = vadd.f32 %v3125_v58, %v2957_v44  ;;  %v2621_v21 = vadd.f32 %v6295_v6, %v2620_v5 }
 0x631   :  { %3217 = vst.msk [vmem:[%s6393_s6 + $0x170] sm:$0xff] %vm3170_vm2, %v3126_v41  ;;  %3164 = vmatmul.bf16.gmra.mxu0 %v6731_v48  ;;  %v2790_v4 = vadd.f32 %v2789_v49, %v2621_v21 }
 0x633   :  { %v2966_v36 = vpop.f32.mrf.mxu3  ;;  %v2959_v9 = vadd.f32 %v2958_v22, %v2790_v4 }
 0x634   :  { %v2794_v45 = vpop.f32.mrf.mxu2 }
 0x636   :  { %v3127_v61 = vpop.f32.mrf.mxu0  ;;  %v2623_v40 = vpop.f32.mrf.mxu1 }
 0x637   :  { %v3128_v26 = vadd.f32 %v3127_v61, %v2959_v9  ;;  %v2624_v50 = vadd.f32 %v6295_v6, %v2623_v40 }
 0x639   :  { %3218 = vst.msk [vmem:[%s6393_s6 + $0x178] sm:$0xff] %vm3170_vm2, %v3128_v26  ;;  %v2793_v39 = vadd.f32 %v2792_v57, %v2624_v50 }
 0x63b   :  { %v2962_v60 = vadd.f32 %v2961_v18, %v2793_v39  ;;  %v2968_v47 = vpop.f32.mrf.mxu3 }
 0x63c   :  { %v2797_v14 = vpop.f32.mrf.mxu2 }
 0x63e   :  { %v3130_v0 = vpop.f32.mrf.mxu0  ;;  %v2625_v33 = vpop.f32.mrf.mxu1 }
 0x63f   :  { %v3131_v10 = vadd.f32 %v3130_v0, %v2962_v60  ;;  %v2626_v13 = vadd.f32 %v6295_v6, %v2625_v33 }
 0x641   :  { %3219 = vst.msk [vmem:[%s6393_s6 + $0x180] sm:$0xff] %vm3170_vm2, %v3131_v10  ;;  %v2795_v15 = vadd.f32 %v2794_v45, %v2626_v13 }
 0x643   :  { %v2964_v62 = vadd.f32 %v2963_v7, %v2795_v15  ;;  %v2971_v20 = vpop.f32.mrf.mxu3 }
 0x644   :  { %v2799_v2 = vpop.f32.mrf.mxu2 }
 0x646   :  { %v3132_v16 = vpop.f32.mrf.mxu0  ;;  %v2628_v31 = vpop.f32.mrf.mxu1 }
 0x647   :  { %v3133_v56 = vadd.f32 %v3132_v16, %v2964_v62  ;;  %v2629_v30 = vadd.f32 %v6295_v6, %v2628_v31 }
 0x649   :  { %3220 = vst.msk [vmem:[%s6393_s6 + $0x188] sm:$0xff] %vm3170_vm2, %v3133_v56  ;;  %v2798_v43 = vadd.f32 %v2797_v14, %v2629_v30 }
 0x64b   :  { %v2967_v28 = vadd.f32 %v2966_v36, %v2798_v43  ;;  %v2973_v27 = vpop.f32.mrf.mxu3 }
 0x64c   :  { %v2802_v55 = vpop.f32.mrf.mxu2 }
 0x64e   :  { %v3135_v42 = vpop.f32.mrf.mxu0  ;;  %v2630_v34 = vpop.f32.mrf.mxu1 }
 0x64f   :  { %v3136_v24 = vadd.f32 %v3135_v42, %v2967_v28  ;;  %v2631_v63 = vadd.f32 %v6295_v6, %v2630_v34 }
 0x651   :  { %3221 = vst.msk [vmem:[%s6393_s6 + $0x190] sm:$0xff] %vm3170_vm2, %v3136_v24  ;;  %v2800_v53 = vadd.f32 %v2799_v2, %v2631_v63 }
 0x653   :  { %v2969_v19 = vadd.f32 %v2968_v47, %v2800_v53  ;;  %v2976_v35 = vpop.f32.mrf.mxu3 }
 0x654   :  { %v2804_v25 = vpop.f32.mrf.mxu2 }
 0x656   :  { %v3137_v38 = vpop.f32.mrf.mxu0  ;;  %v2633_v23 = vpop.f32.mrf.mxu1 }
 0x657   :  { %v3138_v52 = vadd.f32 %v3137_v38, %v2969_v19  ;;  %v2634_v22 = vadd.f32 %v6295_v6, %v2633_v23 }
 0x659   :  { %3222 = vst.msk [vmem:[%s6393_s6 + $0x198] sm:$0xff] %vm3170_vm2, %v3138_v52  ;;  %v2803_v1 = vadd.f32 %v2802_v55, %v2634_v22 }
 0x65b   :  { %v2972_v37 = vadd.f32 %v2971_v20, %v2803_v1  ;;  %v2978_v51 = vpop.f32.mrf.mxu3 }
 0x65c   :  { %v2807_v11 = vpop.f32.mrf.mxu2 }
 0x65e   :  { %v3140_v29 = vpop.f32.mrf.mxu0  ;;  %v2635_v17 = vpop.f32.mrf.mxu1 }
 0x65f   :  { %v3141_v59 = vadd.f32 %v3140_v29, %v2972_v37  ;;  %v2636_v18 = vadd.f32 %v6295_v6, %v2635_v17 }
 0x661   :  { %3223 = vst.msk [vmem:[%s6393_s6 + $0x1a0] sm:$0xff] %vm3170_vm2, %v3141_v59  ;;  %v2805_v49 = vadd.f32 %v2804_v25, %v2636_v18 }
 0x663   :  { %v2974_v8 = vadd.f32 %v2973_v27, %v2805_v49  ;;  %v2981_v58 = vpop.f32.mrf.mxu3 }
 0x664   :  { %v2809_v12 = vpop.f32.mrf.mxu2 }
 0x666   :  { %v3142_v3 = vpop.f32.mrf.mxu0  ;;  %v2638_v32 = vpop.f32.mrf.mxu1 }
 0x667   :  { %v3143_v46 = vadd.f32 %v3142_v3, %v2974_v8  ;;  %v2639_v54 = vadd.f32 %v6295_v6, %v2638_v32 }
 0x669   :  { %3224 = vst.msk [vmem:[%s6393_s6 + $0x1a8] sm:$0xff] %vm3170_vm2, %v3143_v46  ;;  %v2808_v44 = vadd.f32 %v2807_v11, %v2639_v54 }
 0x66b   :  { %v2977_v7 = vadd.f32 %v2976_v35, %v2808_v44  ;;  %v2983_v50 = vpop.f32.mrf.mxu3 }
 0x66c   :  { %v2812_v57 = vpop.f32.mrf.mxu2 }
 0x66e   :  { %v3145_v5 = vpop.f32.mrf.mxu0  ;;  %v2640_v41 = vpop.f32.mrf.mxu1 }
 0x66f   :  { %v3146_v21 = vadd.f32 %v3145_v5, %v2977_v7  ;;  %v2641_v48 = vadd.f32 %v6295_v6, %v2640_v41 }
 0x671   :  { %3225 = vst.msk [vmem:[%s6393_s6 + $0x1b0] sm:$0xff] %vm3170_vm2, %v3146_v21  ;;  %v2810_v4 = vadd.f32 %v2809_v12, %v2641_v48 }
 0x673   :  { %v2979_v45 = vadd.f32 %v2978_v51, %v2810_v4  ;;  %v2986_v15 = vpop.f32.mrf.mxu3 }
 0x674   :  { %v2814_v36 = vpop.f32.mrf.mxu2 }
 0x676   :  { %v3147_v9 = vpop.f32.mrf.mxu0  ;;  %v2643_v61 = vpop.f32.mrf.mxu1 }
 0x677   :  { %v3148_v40 = vadd.f32 %v3147_v9, %v2979_v45  ;;  %v2644_v26 = vadd.f32 %v6295_v6, %v2643_v61 }
 0x679   :  { %3226 = vst.msk [vmem:[%s6393_s6 + $0x1b8] sm:$0xff] %vm3170_vm2, %v3148_v40  ;;  %v2813_v39 = vadd.f32 %v2812_v57, %v2644_v26 }
 0x67b   :  { %v2982_v60 = vadd.f32 %v2981_v58, %v2813_v39  ;;  %v2988_v28 = vpop.f32.mrf.mxu3 }
 0x67c   :  { %v2817_v47 = vpop.f32.mrf.mxu2 }
 0x67e   :  { %v3150_v14 = vpop.f32.mrf.mxu0  ;;  %v2645_v0 = vpop.f32.mrf.mxu1 }
 0x67f   :  { %v3151_v33 = vadd.f32 %v3150_v14, %v2982_v60  ;;  %v2646_v10 = vadd.f32 %v6295_v6, %v2645_v0 }
 0x681   :  { %3227 = vst.msk [vmem:[%s6393_s6 + $0x1c0] sm:$0xff] %vm3170_vm2, %v3151_v33  ;;  %v2815_v13 = vadd.f32 %v2814_v36, %v2646_v10 }
 0x683   :  { %v2984_v2 = vadd.f32 %v2983_v50, %v2815_v13  ;;  %v2991_v25 = vpop.f32.mrf.mxu3 }
 0x684   :  { %v2819_v56 = vpop.f32.mrf.mxu2 }
 0x686   :  { %v3152_v62 = vpop.f32.mrf.mxu0  ;;  %v2648_v20 = vpop.f32.mrf.mxu1 }
 0x687   :  { %v3153_v16 = vadd.f32 %v3152_v62, %v2984_v2  ;;  %v2649_v31 = vadd.f32 %v6295_v6, %v2648_v20 }
 0x689   :  { %3228 = vst.msk [vmem:[%s6393_s6 + $0x1c8] sm:$0xff] %vm3170_vm2, %v3153_v16  ;;  %v2818_v30 = vadd.f32 %v2817_v47, %v2649_v31 }
 0x68b   :  { %v2987_v43 = vadd.f32 %v2986_v15, %v2818_v30  ;;  %v2993_v59 = vpop.f32.mrf.mxu3 }
 0x68c   :  { %v2822_v27 = vpop.f32.mrf.mxu2 }
 0x68e   :  { %v3155_v55 = vpop.f32.mrf.mxu0  ;;  %v2650_v42 = vpop.f32.mrf.mxu1 }
 0x68f   :  { %v3156_v34 = vadd.f32 %v3155_v55, %v2987_v43  ;;  %v2651_v24 = vadd.f32 %v6295_v6, %v2650_v42 }
 0x691   :  { %3229 = vst.msk [vmem:[%s6393_s6 + $0x1d0] sm:$0xff] %vm3170_vm2, %v3156_v34  ;;  %v2820_v63 = vadd.f32 %v2819_v56, %v2651_v24 }
 0x693   :  { %v2989_v53 = vadd.f32 %v2988_v28, %v2820_v63  ;;  %v2996_v54 = vpop.f32.mrf.mxu3 }
 0x694   :  { %v2824_v35 = vpop.f32.mrf.mxu2 }
 0x696   :  { %v3157_v19 = vpop.f32.mrf.mxu0  ;;  %v2653_v38 = vpop.f32.mrf.mxu1 }
 0x697   :  { %v3158_v23 = vadd.f32 %v3157_v19, %v2989_v53  ;;  %v2654_v52 = vadd.f32 %v6295_v6, %v2653_v38 }
 0x699   :  { %3230 = vst.msk [vmem:[%s6393_s6 + $0x1d8] sm:$0xff] %vm3170_vm2, %v3158_v23  ;;  %v2823_v22 = vadd.f32 %v2822_v27, %v2654_v52 }
 0x69b   :  { %v2992_v1 = vadd.f32 %v2991_v25, %v2823_v22  ;;  %v2998_v48 = vpop.f32.mrf.mxu3 }
 0x69c   :  { %v2827_v51 = vpop.f32.mrf.mxu2 }
 0x69e   :  { %v3160_v37 = vpop.f32.mrf.mxu0  ;;  %v2655_v11 = vpop.f32.mrf.mxu1 }
 0x69f   :  { %v3161_v29 = vadd.f32 %v3160_v37, %v2992_v1  ;;  %v2656_v17 = vadd.f32 %v6295_v6, %v2655_v11 }
 0x6a1   :  { %3231 = vst.msk [vmem:[%s6393_s6 + $0x1e0] sm:$0xff] %vm3170_vm2, %v3161_v29  ;;  %v2825_v18 = vadd.f32 %v2824_v35, %v2656_v17 }
 0x6a3   :  { %v2994_v49 = vadd.f32 %v2993_v59, %v2825_v18 }
 0x6a4   :  { %v2829_v41 = vpop.f32.mrf.mxu2 }
 0x6a6   :  { %v3162_v12 = vpop.f32.mrf.mxu0  ;;  %v2658_v8 = vpop.f32.mrf.mxu1 }
 0x6a7   :  { %v3163_v3 = vadd.f32 %v3162_v12, %v2994_v49  ;;  %v2659_v32 = vadd.f32 %v6295_v6, %v2658_v8 }
 0x6a9   :  { %3232 = vst.msk [vmem:[%s6393_s6 + $0x1e8] sm:$0xff] %vm3170_vm2, %v3163_v3  ;;  %v2828_v46 = vadd.f32 %v2827_v51, %v2659_v32 }
 0x6ab   :  { %v2997_v44 = vadd.f32 %v2996_v54, %v2828_v46 }
 0x6ae   :  { %v3165_v7 = vpop.f32.mrf.mxu0  ;;  %v2660_v57 = vpop.f32.mrf.mxu1 }
 0x6af   :  { %v3166_v58 = vadd.f32 %v3165_v7, %v2997_v44  ;;  %v2661_v5 = vadd.f32 %v6295_v6, %v2660_v57 }
 0x6b1   :  { %3233 = vst.msk [vmem:[%s6393_s6 + $0x1f0] sm:$0xff] %vm3170_vm2, %v3166_v58  ;;  %v2830_v21 = vadd.f32 %v2829_v41, %v2661_v5 }
 0x6b3   :  { %v2999_v4 = vadd.f32 %v2998_v48, %v2830_v21 }
 0x6b6   :  { %v3167_v36 = vpop.f32.mrf.mxu0 }
 0x6b7   :  { %v3168_v45 = vadd.f32 %v3167_v36, %v2999_v4 }
 0x6b9   :  { %3234 = vst.msk [vmem:[%s6393_s6 + $0x1f8] sm:$0xff] %vm3170_vm2, %v3168_v45 }

</bundles_post_ra>
